<compile_context>
chip_gen: v7x
topology: tpu7x:2x2x1
jax: 0.10.0
libtpu: 0.0.40
codegen_flags: <defaults>
</compile_context>

<pallas_src>
import functools

import jax
import jax.numpy as jnp
import numpy as np
from jax.experimental import pallas as pl

# ----------------------------- model hyper-params ---------------------------
IMG = 16          # input resolution
PATCH = 4         # patch size  -> grid = 4, tokens = 16, seq = 17 (with CLS)
WIDTH = 32        # transformer width
LAYERS = 2        # number of residual attention blocks
HEADS = 4         # attention heads (head_dim = 8)
OUTPUT_DIM = 16   # CLIP visual projection dim
NUM_CLASSES = 8   # fc head output


# ------------------------------- kernel helpers -----------------------------
def _ln(x, g, b, eps=1e-5):
    mu = jnp.mean(x, axis=-1, keepdims=True)
    var = jnp.mean(jnp.square(x - mu), axis=-1, keepdims=True)
    return (x - mu) * jax.lax.rsqrt(var + eps) * g + b


def _round_up(x, m):
    return (x + m - 1) // m * m


# ------------------------------- fused kernel -------------------------------
def _farl_fused_kernel(patches_ref, conv_w_ref, embed_ref, mask_ref, hmask_ref,
                       vec_ref, wq_ref, wk_ref, wv_ref, wo_ref,
                       wfc_ref, bfc_ref, wproj_ref,
                       proj_ref, fcw_ref, fcb_ref,
                       logits_ref, *, B, BN, R, H, L):
    f32, bf16 = jnp.float32, jnp.bfloat16
    D = wq_ref.shape[-1]
    hd = D // H
    scale = 1.0 / float(np.sqrt(hd))

    vec = vec_ref[...]        # [4 + 9L, D] f32: LN gains/biases + attn/MLP biases
    mask = mask_ref[...]      # [H*R, R]    f32 block-diag bias, pre-tiled per head
    hmask = hmask_ref[...]    # [H*R, D]    f32 per-head lane mask (sublane-stacked)
    bfc = bfc_ref[...]        # [L, 4D]     f32 MLP fc biases

    # ---- patch embedding (conv1-as-matmul over zero-padded rows) + embeddings
    x = jnp.dot(patches_ref[...], conv_w_ref[...],
                preferred_element_type=f32) + embed_ref[...]            # [R, D]

    # ---- ln_pre
    x = _ln(x, vec[0:1, :], vec[1:2, :])

    for l in range(L):                               # static unroll (L == 2)
        vb = 4 + 9 * l
        ln1g, ln1b = vec[vb + 0:vb + 1, :], vec[vb + 1:vb + 2, :]
        bq = vec[vb + 2:vb + 3, :]
        bk = vec[vb + 3:vb + 4, :]
        bv = vec[vb + 4:vb + 5, :]
        bo = vec[vb + 5:vb + 6, :]
        ln2g, ln2b = vec[vb + 6:vb + 7, :], vec[vb + 7:vb + 8, :]
        bproj = vec[vb + 8:vb + 9, :]

        # ---- multi-head self-attention -------------------------------------
        h1 = _ln(x, ln1g, ln1b)
        h1b = h1.astype(bf16)
        q = jnp.dot(h1b, wq_ref[l], preferred_element_type=f32) + bq    # [R, D]
        k = jnp.dot(h1b, wk_ref[l], preferred_element_type=f32) + bk
        v = jnp.dot(h1b, wv_ref[l], preferred_element_type=f32) + bv

        # All H heads' scores in ONE matmul: head-h rows of q_stack keep only
        # head-h lanes, so contracting against the full K picks out q_h . k_h.
        q_stack = jnp.concatenate([q] * H, axis=0) * hmask              # [H*R, D]
        s = jax.lax.dot_general((q_stack * scale).astype(bf16), k.astype(bf16),
                                (((1,), (1,)), ((), ())),
                                preferred_element_type=f32) + mask      # [H*R, R]

        # batched softmax over all heads (f32)
        s = s - jnp.max(s, axis=-1, keepdims=True)
        p = jnp.exp(s)
        p = p * pl.reciprocal(jnp.sum(p, axis=-1, keepdims=True), approx=True)

        # per-head P @ (lane-masked V): each head lands in its own lane block
        # of a dense [R, D] accumulator, then a single dense out-projection.
        attn = jnp.zeros((R, D), f32)
        for h in range(H):
            p_h = p[h * R:(h + 1) * R, :]                               # [R, R]
            v_h = v * hmask[h * R:(h + 1) * R, :]                       # [R, D]
            attn = attn + jnp.dot(p_h.astype(bf16), v_h.astype(bf16),
                                  preferred_element_type=f32)
        x = x + jnp.dot(attn.astype(bf16), wo_ref[l],
                        preferred_element_type=f32) + bo

        # ---- MLP with QuickGELU ---------------------------------------------
        h2 = _ln(x, ln2g, ln2b)
        m = jnp.dot(h2.astype(bf16), wfc_ref[l],
                    preferred_element_type=f32) + bfc[l:l + 1, :]
        m = m * jax.nn.sigmoid(1.702 * m)
        x = x + jnp.dot(m.astype(bf16), wproj_ref[l],
                        preferred_element_type=f32) + bproj

    # ---- CLS rows (full 8-row sublane group starting at BN) -> ln_post ->
    #      CLIP projection -> fc head; only the first B rows are real.
    cls8 = _ln(x[BN:BN + 8, :], vec[2:3, :], vec[3:4, :])               # [8, D]
    rep = jnp.dot(cls8.astype(bf16), proj_ref[...], preferred_element_type=f32)
    out8 = jnp.dot(rep.astype(bf16), fcw_ref[...],
                   preferred_element_type=f32) + fcb_ref[...]           # [8, classes]
    logits_ref[...] = out8[0:B, :]


# ---------------------------- wrapper-side packing ---------------------------
def _pack_params(params, B, N):
    """Pack all weights into a few dense slabs (few large DMAs, bf16 matmul operands)."""
    D, H = WIDTH, HEADS
    blocks = params["blocks"]
    f32, bf16 = jnp.float32, jnp.bfloat16

    BN = B * N
    BS = B * (N + 1)
    # pad the row count so (a) it is a multiple of 8 and (b) the B CLS rows plus
    # the pad rows form one full 8-row sublane group starting at BN.
    R = max(_round_up(BS, 8), BN + 8)

    WQ, WK, WV = [], [], []
    vec_rows = [params["ln_pre_g"], params["ln_pre_b"],
                params["ln_post_g"], params["ln_post_b"]]
    for blk in blocks:
        wqkv, bqkv = blk["wqkv"], blk["bqkv"]
        WQ.append(wqkv[:, 0 * D:1 * D])
        WK.append(wqkv[:, 1 * D:2 * D])
        WV.append(wqkv[:, 2 * D:3 * D])
        vec_rows += [blk["ln1_g"], blk["ln1_b"],
                     bqkv[0 * D:1 * D], bqkv[1 * D:2 * D], bqkv[2 * D:3 * D],
                     blk["bo"], blk["ln2_g"], blk["ln2_b"], blk["bproj"]]
    WQ = jnp.stack(WQ).astype(bf16)                                    # [L, D, D]
    WK = jnp.stack(WK).astype(bf16)
    WV = jnp.stack(WV).astype(bf16)
    WO = jnp.stack([blk["wo"] for blk in blocks]).astype(bf16)         # [L, D, D]
    WFC = jnp.stack([blk["wfc"] for blk in blocks]).astype(bf16)       # [L, D, 4D]
    BFC = jnp.stack([blk["bfc"] for blk in blocks]).astype(f32)        # [L, 4D]
    WPROJ = jnp.stack([blk["wproj"] for blk in blocks]).astype(bf16)   # [L, 4D, D]
    VEC = jnp.stack(vec_rows).astype(f32)                              # [4 + 9L, D]

    # additive embedding, padded "tokens | cls | pad" row layout
    cls_plus = params["class_emb"] + params["pos_emb"][0]
    embed_add = jnp.concatenate(
        [jnp.tile(params["pos_emb"][1:], (B, 1)),                      # [BN, D]
         jnp.broadcast_to(cls_plus[None, :], (B, D)),                  # [B, D]
         jnp.zeros((R - BN - B, D), f32)], axis=0)                     # pad rows

    # Block-diagonal additive mask (pre-tiled across heads).  Pad rows get
    # unique ids -> they only attend to themselves and are never attended to.
    ids = jnp.concatenate([jnp.repeat(jnp.arange(B), N), jnp.arange(B),
                           B + jnp.arange(R - BS)])
    mask1 = jnp.where(ids[:, None] == ids[None, :], 0.0, -1e30).astype(f32)
    mask = jnp.tile(mask1, (H, 1))                                     # [H*R, R]

    # per-head lane mask, stacked on the sublane axis in head order
    head_of_lane = jnp.arange(D) // (D // H)                           # [D]
    hmask = jnp.concatenate(
        [jnp.broadcast_to((head_of_lane == h).astype(f32)[None, :], (R, D))
         for h in range(H)], axis=0)                                   # [H*R, D]

    conv_w = params["conv_w"].astype(bf16)                             # [C*P*P, D]
    proj = params["proj"].astype(bf16)
    fcw = params["fc_w"].astype(bf16)
    fcb = params["fc_b"][None, :].astype(f32)                          # [1, classes]

    operands = (conv_w, embed_add, mask, hmask, VEC,
                WQ, WK, WV, WO, WFC, BFC, WPROJ, proj, fcw, fcb)
    return R, operands


# ------------------------------ parameter init -------------------------------
def init_params(key):
    D, P = WIDTH, PATCH
    ks = iter(jax.random.split(key, 64))
    nrm = lambda shape, s=0.02: s * jax.random.normal(next(ks), shape, jnp.float32)

    params = {
        "conv_w": nrm((3 * P * P, D)),            # conv1 (patch embed), flattened
        "class_emb": nrm((D,)),
        "pos_emb": nrm(((IMG // P) ** 2 + 1, D)),
        "ln_pre_g": jnp.ones((D,), jnp.float32),
        "ln_pre_b": jnp.zeros((D,), jnp.float32),
        "ln_post_g": jnp.ones((D,), jnp.float32),
        "ln_post_b": jnp.zeros((D,), jnp.float32),
        "proj": nrm((D, OUTPUT_DIM)),
        "fc_w": nrm((OUTPUT_DIM, NUM_CLASSES)),
        "fc_b": jnp.zeros((NUM_CLASSES,), jnp.float32),
        "blocks": [],
    }
    for _ in range(LAYERS):
        params["blocks"].append({
            "ln1_g": jnp.ones((D,), jnp.float32),
            "ln1_b": jnp.zeros((D,), jnp.float32),
            "wqkv": nrm((D, 3 * D)),
            "bqkv": jnp.zeros((3 * D,), jnp.float32),
            "wo": nrm((D, D)),
            "bo": jnp.zeros((D,), jnp.float32),
            "ln2_g": jnp.ones((D,), jnp.float32),
            "ln2_b": jnp.zeros((D,), jnp.float32),
            "wfc": nrm((D, 4 * D)),
            "bfc": jnp.zeros((4 * D,), jnp.float32),
            "wproj": nrm((4 * D, D)),
            "bproj": jnp.zeros((D,), jnp.float32),
        })
    return params


# -------------------------------- forward pass --------------------------------
def farl_forward(image, params):
    # image: NCHW [B, 3, IMG, IMG]; cast like FarlModule.forward's `image.type(dtype)`.
    B, C, Himg, Wimg = image.shape
    g = Himg // PATCH
    N = g * g
    BN = B * N
    assert B <= 8, "CLS rows must fit in one sublane group"

    x = image.astype(jnp.float32)

    # patch extraction (pure reshape/transpose glue) -> conv-as-matmul in kernel
    patches = (x.reshape(B, C, g, PATCH, g, PATCH)
                .transpose(0, 2, 4, 1, 3, 5)
                .reshape(BN, C * PATCH * PATCH))

    R, packed = _pack_params(params, B, N)

    # zero-pad CLS/alignment rows straight through the (bias-free) conv matmul
    patches_pad = jnp.concatenate(
        [patches, jnp.zeros((R - BN, C * PATCH * PATCH), patches.dtype)],
        axis=0).astype(jnp.bfloat16)

    kernel = functools.partial(_farl_fused_kernel, B=B, BN=BN, R=R,
                               H=HEADS, L=len(params["blocks"]))
    logits = pl.pallas_call(
        kernel,
        out_shape=jax.ShapeDtypeStruct((B, NUM_CLASSES), jnp.float32),
        # no grid / no index-map BlockSpecs: every operand is a whole-array
        # VMEM-resident block (total working set is well under 1 MiB).
    )(patches_pad, *packed)
    return logits


if __name__ == "__main__":
    root = jax.random.PRNGKey(0)
    k_img, k_par = jax.random.split(root)
    image = jax.random.normal(k_img, (2, 3, IMG, IMG), jnp.float32)  # NCHW
    params = init_params(k_par)

    logits = jax.jit(farl_forward)(image, params)
    logits = jax.block_until_ready(logits)

    assert logits.shape == (2, NUM_CLASSES)
    assert bool(jnp.all(jnp.isfinite(logits)))
    print("KERNEL_OK")
</pallas_src>

<mosaic_0001>
module attributes {stable_mosaic.version = 11 : i64} {
  func.func @_farl_fused_kernel(%arg0: memref<40x48xbf16, #tpu.memory_space<vmem>>, %arg1: memref<48x32xbf16, #tpu.memory_space<vmem>>, %arg2: memref<40x32xf32, #tpu.memory_space<vmem>>, %arg3: memref<160x40xf32, #tpu.memory_space<vmem>>, %arg4: memref<160x32xf32, #tpu.memory_space<vmem>>, %arg5: memref<22x32xf32, #tpu.memory_space<vmem>>, %arg6: memref<2x32x32xbf16, #tpu.memory_space<vmem>>, %arg7: memref<2x32x32xbf16, #tpu.memory_space<vmem>>, %arg8: memref<2x32x32xbf16, #tpu.memory_space<vmem>>, %arg9: memref<2x32x32xbf16, #tpu.memory_space<vmem>>, %arg10: memref<2x32x128xbf16, #tpu.memory_space<vmem>>, %arg11: memref<2x128xf32, #tpu.memory_space<vmem>>, %arg12: memref<2x128x32xbf16, #tpu.memory_space<vmem>>, %arg13: memref<32x16xbf16, #tpu.memory_space<vmem>>, %arg14: memref<16x8xbf16, #tpu.memory_space<vmem>>, %arg15: memref<1x8xf32, #tpu.memory_space<vmem>>, %arg16: memref<2x8xf32, #tpu.memory_space<vmem>>) attributes {dimension_semantics = [], scalar_prefetch = 0 : i64, scratch_operands = 0 : i64, tpu.core_type = #tpu.core_type<tc>} {
    %c0 = arith.constant 0 : index
    %c0_0 = arith.constant 0 : index
    %0 = vector.load %arg5[%c0, %c0_0] : memref<22x32xf32, #tpu.memory_space<vmem>>, vector<22x32xf32>
    %c0_1 = arith.constant 0 : index
    %c0_2 = arith.constant 0 : index
    %1 = vector.load %arg3[%c0_1, %c0_2] : memref<160x40xf32, #tpu.memory_space<vmem>>, vector<160x40xf32>
    %c0_3 = arith.constant 0 : index
    %c0_4 = arith.constant 0 : index
    %2 = vector.load %arg4[%c0_3, %c0_4] : memref<160x32xf32, #tpu.memory_space<vmem>>, vector<160x32xf32>
    %c0_5 = arith.constant 0 : index
    %c0_6 = arith.constant 0 : index
    %3 = vector.load %arg11[%c0_5, %c0_6] : memref<2x128xf32, #tpu.memory_space<vmem>>, vector<2x128xf32>
    %c0_7 = arith.constant 0 : index
    %c0_8 = arith.constant 0 : index
    %4 = vector.load %arg0[%c0_7, %c0_8] : memref<40x48xbf16, #tpu.memory_space<vmem>>, vector<40x48xbf16>
    %c0_9 = arith.constant 0 : index
    %c0_10 = arith.constant 0 : index
    %5 = vector.load %arg1[%c0_9, %c0_10] : memref<48x32xbf16, #tpu.memory_space<vmem>>, vector<48x32xbf16>
    %cst = arith.constant dense<0.000000e+00> : vector<40x32xf32>
    %6 = tpu.matmul %4, %5, %cst {dimension_numbers = #tpu.dot_dimension_numbers<[1], [0], [0], [1], [0, 0, 1, 1], [], []>} : vector<40x48xbf16>, vector<48x32xbf16>, vector<40x32xf32> -> vector<40x32xf32>
    %c0_11 = arith.constant 0 : index
    %c0_12 = arith.constant 0 : index
    %7 = vector.load %arg2[%c0_11, %c0_12] : memref<40x32xf32, #tpu.memory_space<vmem>>, vector<40x32xf32>
    %8 = arith.addf %6, %7 : vector<40x32xf32>
    %9 = vector.extract_strided_slice %0 {offsets = [0, 0], sizes = [1, 32], strides = [1, 1]} : vector<22x32xf32> to vector<1x32xf32>
    %10 = vector.extract_strided_slice %0 {offsets = [1, 0], sizes = [1, 32], strides = [1, 1]} : vector<22x32xf32> to vector<1x32xf32>
    %cst_13 = arith.constant dense<0.000000e+00> : vector<40xf32>
    %11 = vector.multi_reduction <add>, %8, %cst_13 [1] : vector<40x32xf32> to vector<40xf32>
    %12 = vector.shape_cast %11 : vector<40xf32> to vector<40x1xf32>
    %cst_14 = arith.constant 3.200000e+01 : f32
    %13 = vector.broadcast %cst_14 : f32 to vector<40x1xf32>
    %14 = arith.divf %12, %13 : vector<40x1xf32>
    %15 = vector.broadcast %14 : vector<40x1xf32> to vector<40x32xf32>
    %16 = arith.subf %8, %15 : vector<40x32xf32>
    %17 = arith.mulf %16, %16 : vector<40x32xf32>
    %cst_15 = arith.constant dense<0.000000e+00> : vector<40xf32>
    %18 = vector.multi_reduction <add>, %17, %cst_15 [1] : vector<40x32xf32> to vector<40xf32>
    %19 = vector.shape_cast %18 : vector<40xf32> to vector<40x1xf32>
    %cst_16 = arith.constant 3.200000e+01 : f32
    %20 = vector.broadcast %cst_16 : f32 to vector<40x1xf32>
    %21 = arith.divf %19, %20 : vector<40x1xf32>
    %22 = vector.broadcast %14 : vector<40x1xf32> to vector<40x32xf32>
    %23 = arith.subf %8, %22 : vector<40x32xf32>
    %cst_17 = arith.constant 9.99999974E-6 : f32
    %24 = vector.broadcast %cst_17 : f32 to vector<40x1xf32>
    %25 = arith.addf %21, %24 : vector<40x1xf32>
    %26 = math.rsqrt %25 : vector<40x1xf32>
    %27 = vector.broadcast %26 : vector<40x1xf32> to vector<40x32xf32>
    %28 = arith.mulf %23, %27 : vector<40x32xf32>
    %29 = vector.broadcast %9 : vector<1x32xf32> to vector<40x32xf32>
    %30 = arith.mulf %28, %29 : vector<40x32xf32>
    %31 = vector.broadcast %10 : vector<1x32xf32> to vector<40x32xf32>
    %32 = arith.addf %30, %31 : vector<40x32xf32>
    %33 = vector.extract_strided_slice %0 {offsets = [4, 0], sizes = [1, 32], strides = [1, 1]} : vector<22x32xf32> to vector<1x32xf32>
    %34 = vector.extract_strided_slice %0 {offsets = [5, 0], sizes = [1, 32], strides = [1, 1]} : vector<22x32xf32> to vector<1x32xf32>
    %35 = vector.extract_strided_slice %0 {offsets = [6, 0], sizes = [1, 32], strides = [1, 1]} : vector<22x32xf32> to vector<1x32xf32>
    %36 = vector.extract_strided_slice %0 {offsets = [7, 0], sizes = [1, 32], strides = [1, 1]} : vector<22x32xf32> to vector<1x32xf32>
    %37 = vector.extract_strided_slice %0 {offsets = [8, 0], sizes = [1, 32], strides = [1, 1]} : vector<22x32xf32> to vector<1x32xf32>
    %38 = vector.extract_strided_slice %0 {offsets = [9, 0], sizes = [1, 32], strides = [1, 1]} : vector<22x32xf32> to vector<1x32xf32>
    %39 = vector.extract_strided_slice %0 {offsets = [10, 0], sizes = [1, 32], strides = [1, 1]} : vector<22x32xf32> to vector<1x32xf32>
    %40 = vector.extract_strided_slice %0 {offsets = [11, 0], sizes = [1, 32], strides = [1, 1]} : vector<22x32xf32> to vector<1x32xf32>
    %41 = vector.extract_strided_slice %0 {offsets = [12, 0], sizes = [1, 32], strides = [1, 1]} : vector<22x32xf32> to vector<1x32xf32>
    %cst_18 = arith.constant dense<0.000000e+00> : vector<40xf32>
    %42 = vector.multi_reduction <add>, %32, %cst_18 [1] : vector<40x32xf32> to vector<40xf32>
    %43 = vector.shape_cast %42 : vector<40xf32> to vector<40x1xf32>
    %cst_19 = arith.constant 3.200000e+01 : f32
    %44 = vector.broadcast %cst_19 : f32 to vector<40x1xf32>
    %45 = arith.divf %43, %44 : vector<40x1xf32>
    %46 = vector.broadcast %45 : vector<40x1xf32> to vector<40x32xf32>
    %47 = arith.subf %32, %46 : vector<40x32xf32>
    %48 = arith.mulf %47, %47 : vector<40x32xf32>
    %cst_20 = arith.constant dense<0.000000e+00> : vector<40xf32>
    %49 = vector.multi_reduction <add>, %48, %cst_20 [1] : vector<40x32xf32> to vector<40xf32>
    %50 = vector.shape_cast %49 : vector<40xf32> to vector<40x1xf32>
    %cst_21 = arith.constant 3.200000e+01 : f32
    %51 = vector.broadcast %cst_21 : f32 to vector<40x1xf32>
    %52 = arith.divf %50, %51 : vector<40x1xf32>
    %53 = vector.broadcast %45 : vector<40x1xf32> to vector<40x32xf32>
    %54 = arith.subf %32, %53 : vector<40x32xf32>
    %cst_22 = arith.constant 9.99999974E-6 : f32
    %55 = vector.broadcast %cst_22 : f32 to vector<40x1xf32>
    %56 = arith.addf %52, %55 : vector<40x1xf32>
    %57 = math.rsqrt %56 : vector<40x1xf32>
    %58 = vector.broadcast %57 : vector<40x1xf32> to vector<40x32xf32>
    %59 = arith.mulf %54, %58 : vector<40x32xf32>
    %60 = vector.broadcast %33 : vector<1x32xf32> to vector<40x32xf32>
    %61 = arith.mulf %59, %60 : vector<40x32xf32>
    %62 = vector.broadcast %34 : vector<1x32xf32> to vector<40x32xf32>
    %63 = arith.addf %61, %62 : vector<40x32xf32>
    %64 = arith.truncf %63 : vector<40x32xf32> to vector<40x32xbf16>
    %c0_23 = arith.constant 0 : index
    %c0_24 = arith.constant 0 : index
    %c0_25 = arith.constant 0 : index
    %65 = vector.load %arg6[%c0_23, %c0_24, %c0_25] : memref<2x32x32xbf16, #tpu.memory_space<vmem>>, vector<1x32x32xbf16>
    %66 = vector.shape_cast %65 : vector<1x32x32xbf16> to vector<32x32xbf16>
    %cst_26 = arith.constant dense<0.000000e+00> : vector<40x32xf32>
    %67 = tpu.matmul %64, %66, %cst_26 {dimension_numbers = #tpu.dot_dimension_numbers<[1], [0], [0], [1], [0, 0, 1, 1], [], []>} : vector<40x32xbf16>, vector<32x32xbf16>, vector<40x32xf32> -> vector<40x32xf32>
    %68 = vector.broadcast %35 : vector<1x32xf32> to vector<40x32xf32>
    %69 = arith.addf %67, %68 : vector<40x32xf32>
    %c0_27 = arith.constant 0 : index
    %c0_28 = arith.constant 0 : index
    %c0_29 = arith.constant 0 : index
    %70 = vector.load %arg7[%c0_27, %c0_28, %c0_29] : memref<2x32x32xbf16, #tpu.memory_space<vmem>>, vector<1x32x32xbf16>
    %71 = vector.shape_cast %70 : vector<1x32x32xbf16> to vector<32x32xbf16>
    %cst_30 = arith.constant dense<0.000000e+00> : vector<40x32xf32>
    %72 = tpu.matmul %64, %71, %cst_30 {dimension_numbers = #tpu.dot_dimension_numbers<[1], [0], [0], [1], [0, 0, 1, 1], [], []>} : vector<40x32xbf16>, vector<32x32xbf16>, vector<40x32xf32> -> vector<40x32xf32>
    %73 = vector.broadcast %36 : vector<1x32xf32> to vector<40x32xf32>
    %74 = arith.addf %72, %73 : vector<40x32xf32>
    %c0_31 = arith.constant 0 : index
    %c0_32 = arith.constant 0 : index
    %c0_33 = arith.constant 0 : index
    %75 = vector.load %arg8[%c0_31, %c0_32, %c0_33] : memref<2x32x32xbf16, #tpu.memory_space<vmem>>, vector<1x32x32xbf16>
    %76 = vector.shape_cast %75 : vector<1x32x32xbf16> to vector<32x32xbf16>
    %cst_34 = arith.constant dense<0.000000e+00> : vector<40x32xf32>
    %77 = tpu.matmul %64, %76, %cst_34 {dimension_numbers = #tpu.dot_dimension_numbers<[1], [0], [0], [1], [0, 0, 1, 1], [], []>} : vector<40x32xbf16>, vector<32x32xbf16>, vector<40x32xf32> -> vector<40x32xf32>
    %78 = vector.broadcast %37 : vector<1x32xf32> to vector<40x32xf32>
    %79 = arith.addf %77, %78 : vector<40x32xf32>
    %80 = tpu.concatenate %69, %69, %69, %69 in 0 : vector<40x32xf32>, vector<40x32xf32>, vector<40x32xf32>, vector<40x32xf32> -> vector<160x32xf32>
    %81 = arith.mulf %80, %2 : vector<160x32xf32>
    %cst_35 = arith.constant 0.353553385 : f32
    %82 = vector.broadcast %cst_35 : f32 to vector<160x32xf32>
    %83 = arith.mulf %81, %82 : vector<160x32xf32>
    %84 = arith.truncf %83 : vector<160x32xf32> to vector<160x32xbf16>
    %85 = arith.truncf %74 : vector<40x32xf32> to vector<40x32xbf16>
    %cst_36 = arith.constant dense<0.000000e+00> : vector<160x40xf32>
    %86 = tpu.matmul %84, %85, %cst_36 {dimension_numbers = #tpu.dot_dimension_numbers<[1], [1], [0], [0], [0, 0, 1, 0], [], []>} : vector<160x32xbf16>, vector<40x32xbf16>, vector<160x40xf32> -> vector<160x40xf32>
    %87 = arith.addf %86, %1 : vector<160x40xf32>
    %cst_37 = arith.constant dense<0xFF800000> : vector<160xf32>
    %88 = vector.multi_reduction <maximumf>, %87, %cst_37 [1] : vector<160x40xf32> to vector<160xf32>
    %89 = vector.shape_cast %88 : vector<160xf32> to vector<160x1xf32>
    %90 = vector.broadcast %89 : vector<160x1xf32> to vector<160x40xf32>
    %91 = arith.subf %87, %90 : vector<160x40xf32>
    %92 = math.exp %91 : vector<160x40xf32>
    %cst_38 = arith.constant dense<0.000000e+00> : vector<160xf32>
    %93 = vector.multi_reduction <add>, %92, %cst_38 [1] : vector<160x40xf32> to vector<160xf32>
    %94 = vector.shape_cast %93 : vector<160xf32> to vector<160x1xf32>
    %95 = tpu.reciprocal %94 {approx = true} : vector<160x1xf32> -> vector<160x1xf32>
    %96 = vector.broadcast %95 : vector<160x1xf32> to vector<160x40xf32>
    %97 = arith.mulf %92, %96 : vector<160x40xf32>
    %cst_39 = arith.constant 0.000000e+00 : f32
    %98 = vector.broadcast %cst_39 : f32 to vector<40x32xf32>
    %99 = vector.extract_strided_slice %97 {offsets = [0, 0], sizes = [40, 40], strides = [1, 1]} : vector<160x40xf32> to vector<40x40xf32>
    %100 = vector.extract_strided_slice %2 {offsets = [0, 0], sizes = [40, 32], strides = [1, 1]} : vector<160x32xf32> to vector<40x32xf32>
    %101 = arith.mulf %79, %100 : vector<40x32xf32>
    %102 = arith.truncf %99 : vector<40x40xf32> to vector<40x40xbf16>
    %103 = arith.truncf %101 : vector<40x32xf32> to vector<40x32xbf16>
    %cst_40 = arith.constant dense<0.000000e+00> : vector<40x32xf32>
    %104 = tpu.matmul %102, %103, %cst_40 {dimension_numbers = #tpu.dot_dimension_numbers<[1], [0], [0], [1], [0, 0, 1, 1], [], []>} : vector<40x40xbf16>, vector<40x32xbf16>, vector<40x32xf32> -> vector<40x32xf32>
    %105 = arith.addf %98, %104 : vector<40x32xf32>
    %106 = vector.extract_strided_slice %97 {offsets = [40, 0], sizes = [40, 40], strides = [1, 1]} : vector<160x40xf32> to vector<40x40xf32>
    %107 = vector.extract_strided_slice %2 {offsets = [40, 0], sizes = [40, 32], strides = [1, 1]} : vector<160x32xf32> to vector<40x32xf32>
    %108 = arith.mulf %79, %107 : vector<40x32xf32>
    %109 = arith.truncf %106 : vector<40x40xf32> to vector<40x40xbf16>
    %110 = arith.truncf %108 : vector<40x32xf32> to vector<40x32xbf16>
    %cst_41 = arith.constant dense<0.000000e+00> : vector<40x32xf32>
    %111 = tpu.matmul %109, %110, %cst_41 {dimension_numbers = #tpu.dot_dimension_numbers<[1], [0], [0], [1], [0, 0, 1, 1], [], []>} : vector<40x40xbf16>, vector<40x32xbf16>, vector<40x32xf32> -> vector<40x32xf32>
    %112 = arith.addf %105, %111 : vector<40x32xf32>
    %113 = vector.extract_strided_slice %97 {offsets = [80, 0], sizes = [40, 40], strides = [1, 1]} : vector<160x40xf32> to vector<40x40xf32>
    %114 = vector.extract_strided_slice %2 {offsets = [80, 0], sizes = [40, 32], strides = [1, 1]} : vector<160x32xf32> to vector<40x32xf32>
    %115 = arith.mulf %79, %114 : vector<40x32xf32>
    %116 = arith.truncf %113 : vector<40x40xf32> to vector<40x40xbf16>
    %117 = arith.truncf %115 : vector<40x32xf32> to vector<40x32xbf16>
    %cst_42 = arith.constant dense<0.000000e+00> : vector<40x32xf32>
    %118 = tpu.matmul %116, %117, %cst_42 {dimension_numbers = #tpu.dot_dimension_numbers<[1], [0], [0], [1], [0, 0, 1, 1], [], []>} : vector<40x40xbf16>, vector<40x32xbf16>, vector<40x32xf32> -> vector<40x32xf32>
    %119 = arith.addf %112, %118 : vector<40x32xf32>
    %120 = vector.extract_strided_slice %97 {offsets = [120, 0], sizes = [40, 40], strides = [1, 1]} : vector<160x40xf32> to vector<40x40xf32>
    %121 = vector.extract_strided_slice %2 {offsets = [120, 0], sizes = [40, 32], strides = [1, 1]} : vector<160x32xf32> to vector<40x32xf32>
    %122 = arith.mulf %79, %121 : vector<40x32xf32>
    %123 = arith.truncf %120 : vector<40x40xf32> to vector<40x40xbf16>
    %124 = arith.truncf %122 : vector<40x32xf32> to vector<40x32xbf16>
    %cst_43 = arith.constant dense<0.000000e+00> : vector<40x32xf32>
    %125 = tpu.matmul %123, %124, %cst_43 {dimension_numbers = #tpu.dot_dimension_numbers<[1], [0], [0], [1], [0, 0, 1, 1], [], []>} : vector<40x40xbf16>, vector<40x32xbf16>, vector<40x32xf32> -> vector<40x32xf32>
    %126 = arith.addf %119, %125 : vector<40x32xf32>
    %127 = arith.truncf %126 : vector<40x32xf32> to vector<40x32xbf16>
    %c0_44 = arith.constant 0 : index
    %c0_45 = arith.constant 0 : index
    %c0_46 = arith.constant 0 : index
    %128 = vector.load %arg9[%c0_44, %c0_45, %c0_46] : memref<2x32x32xbf16, #tpu.memory_space<vmem>>, vector<1x32x32xbf16>
    %129 = vector.shape_cast %128 : vector<1x32x32xbf16> to vector<32x32xbf16>
    %cst_47 = arith.constant dense<0.000000e+00> : vector<40x32xf32>
    %130 = tpu.matmul %127, %129, %cst_47 {dimension_numbers = #tpu.dot_dimension_numbers<[1], [0], [0], [1], [0, 0, 1, 1], [], []>} : vector<40x32xbf16>, vector<32x32xbf16>, vector<40x32xf32> -> vector<40x32xf32>
    %131 = arith.addf %32, %130 : vector<40x32xf32>
    %132 = vector.broadcast %38 : vector<1x32xf32> to vector<40x32xf32>
    %133 = arith.addf %131, %132 : vector<40x32xf32>
    %cst_48 = arith.constant dense<0.000000e+00> : vector<40xf32>
    %134 = vector.multi_reduction <add>, %133, %cst_48 [1] : vector<40x32xf32> to vector<40xf32>
    %135 = vector.shape_cast %134 : vector<40xf32> to vector<40x1xf32>
    %cst_49 = arith.constant 3.200000e+01 : f32
    %136 = vector.broadcast %cst_49 : f32 to vector<40x1xf32>
    %137 = arith.divf %135, %136 : vector<40x1xf32>
    %138 = vector.broadcast %137 : vector<40x1xf32> to vector<40x32xf32>
    %139 = arith.subf %133, %138 : vector<40x32xf32>
    %140 = arith.mulf %139, %139 : vector<40x32xf32>
    %cst_50 = arith.constant dense<0.000000e+00> : vector<40xf32>
    %141 = vector.multi_reduction <add>, %140, %cst_50 [1] : vector<40x32xf32> to vector<40xf32>
    %142 = vector.shape_cast %141 : vector<40xf32> to vector<40x1xf32>
    %cst_51 = arith.constant 3.200000e+01 : f32
    %143 = vector.broadcast %cst_51 : f32 to vector<40x1xf32>
    %144 = arith.divf %142, %143 : vector<40x1xf32>
    %145 = vector.broadcast %137 : vector<40x1xf32> to vector<40x32xf32>
    %146 = arith.subf %133, %145 : vector<40x32xf32>
    %cst_52 = arith.constant 9.99999974E-6 : f32
    %147 = vector.broadcast %cst_52 : f32 to vector<40x1xf32>
    %148 = arith.addf %144, %147 : vector<40x1xf32>
    %149 = math.rsqrt %148 : vector<40x1xf32>
    %150 = vector.broadcast %149 : vector<40x1xf32> to vector<40x32xf32>
    %151 = arith.mulf %146, %150 : vector<40x32xf32>
    %152 = vector.broadcast %39 : vector<1x32xf32> to vector<40x32xf32>
    %153 = arith.mulf %151, %152 : vector<40x32xf32>
    %154 = vector.broadcast %40 : vector<1x32xf32> to vector<40x32xf32>
    %155 = arith.addf %153, %154 : vector<40x32xf32>
    %156 = arith.truncf %155 : vector<40x32xf32> to vector<40x32xbf16>
    %c0_53 = arith.constant 0 : index
    %c0_54 = arith.constant 0 : index
    %c0_55 = arith.constant 0 : index
    %157 = vector.load %arg10[%c0_53, %c0_54, %c0_55] : memref<2x32x128xbf16, #tpu.memory_space<vmem>>, vector<1x32x128xbf16>
    %158 = vector.shape_cast %157 : vector<1x32x128xbf16> to vector<32x128xbf16>
    %cst_56 = arith.constant dense<0.000000e+00> : vector<40x128xf32>
    %159 = tpu.matmul %156, %158, %cst_56 {dimension_numbers = #tpu.dot_dimension_numbers<[1], [0], [0], [1], [0, 0, 1, 1], [], []>} : vector<40x32xbf16>, vector<32x128xbf16>, vector<40x128xf32> -> vector<40x128xf32>
    %160 = vector.extract_strided_slice %3 {offsets = [0, 0], sizes = [1, 128], strides = [1, 1]} : vector<2x128xf32> to vector<1x128xf32>
    %161 = vector.broadcast %160 : vector<1x128xf32> to vector<40x128xf32>
    %162 = arith.addf %159, %161 : vector<40x128xf32>
    %cst_57 = arith.constant 1.702000e+00 : f32
    %163 = vector.broadcast %cst_57 : f32 to vector<40x128xf32>
    %164 = arith.mulf %163, %162 : vector<40x128xf32>
    %165 = arith.negf %164 : vector<40x128xf32>
    %166 = math.exp %165 : vector<40x128xf32>
    %cst_58 = arith.constant 1.000000e+00 : f32
    %167 = vector.broadcast %cst_58 : f32 to vector<40x128xf32>
    %168 = arith.addf %167, %166 : vector<40x128xf32>
    %169 = arith.divf %167, %168 : vector<40x128xf32>
    %170 = arith.mulf %162, %169 : vector<40x128xf32>
    %171 = arith.truncf %170 : vector<40x128xf32> to vector<40x128xbf16>
    %c0_59 = arith.constant 0 : index
    %c0_60 = arith.constant 0 : index
    %c0_61 = arith.constant 0 : index
    %172 = vector.load %arg12[%c0_59, %c0_60, %c0_61] : memref<2x128x32xbf16, #tpu.memory_space<vmem>>, vector<1x128x32xbf16>
    %173 = vector.shape_cast %172 : vector<1x128x32xbf16> to vector<128x32xbf16>
    %cst_62 = arith.constant dense<0.000000e+00> : vector<40x32xf32>
    %174 = tpu.matmul %171, %173, %cst_62 {dimension_numbers = #tpu.dot_dimension_numbers<[1], [0], [0], [1], [0, 0, 1, 1], [], []>} : vector<40x128xbf16>, vector<128x32xbf16>, vector<40x32xf32> -> vector<40x32xf32>
    %175 = arith.addf %133, %174 : vector<40x32xf32>
    %176 = vector.broadcast %41 : vector<1x32xf32> to vector<40x32xf32>
    %177 = arith.addf %175, %176 : vector<40x32xf32>
    %178 = vector.extract_strided_slice %0 {offsets = [13, 0], sizes = [1, 32], strides = [1, 1]} : vector<22x32xf32> to vector<1x32xf32>
    %179 = vector.extract_strided_slice %0 {offsets = [14, 0], sizes = [1, 32], strides = [1, 1]} : vector<22x32xf32> to vector<1x32xf32>
    %180 = vector.extract_strided_slice %0 {offsets = [15, 0], sizes = [1, 32], strides = [1, 1]} : vector<22x32xf32> to vector<1x32xf32>
    %181 = vector.extract_strided_slice %0 {offsets = [16, 0], sizes = [1, 32], strides = [1, 1]} : vector<22x32xf32> to vector<1x32xf32>
    %182 = vector.extract_strided_slice %0 {offsets = [17, 0], sizes = [1, 32], strides = [1, 1]} : vector<22x32xf32> to vector<1x32xf32>
    %183 = vector.extract_strided_slice %0 {offsets = [18, 0], sizes = [1, 32], strides = [1, 1]} : vector<22x32xf32> to vector<1x32xf32>
    %184 = vector.extract_strided_slice %0 {offsets = [19, 0], sizes = [1, 32], strides = [1, 1]} : vector<22x32xf32> to vector<1x32xf32>
    %185 = vector.extract_strided_slice %0 {offsets = [20, 0], sizes = [1, 32], strides = [1, 1]} : vector<22x32xf32> to vector<1x32xf32>
    %186 = vector.extract_strided_slice %0 {offsets = [21, 0], sizes = [1, 32], strides = [1, 1]} : vector<22x32xf32> to vector<1x32xf32>
    %cst_63 = arith.constant dense<0.000000e+00> : vector<40xf32>
    %187 = vector.multi_reduction <add>, %177, %cst_63 [1] : vector<40x32xf32> to vector<40xf32>
    %188 = vector.shape_cast %187 : vector<40xf32> to vector<40x1xf32>
    %cst_64 = arith.constant 3.200000e+01 : f32
    %189 = vector.broadcast %cst_64 : f32 to vector<40x1xf32>
    %190 = arith.divf %188, %189 : vector<40x1xf32>
    %191 = vector.broadcast %190 : vector<40x1xf32> to vector<40x32xf32>
    %192 = arith.subf %177, %191 : vector<40x32xf32>
    %193 = arith.mulf %192, %192 : vector<40x32xf32>
    %cst_65 = arith.constant dense<0.000000e+00> : vector<40xf32>
    %194 = vector.multi_reduction <add>, %193, %cst_65 [1] : vector<40x32xf32> to vector<40xf32>
    %195 = vector.shape_cast %194 : vector<40xf32> to vector<40x1xf32>
    %cst_66 = arith.constant 3.200000e+01 : f32
    %196 = vector.broadcast %cst_66 : f32 to vector<40x1xf32>
    %197 = arith.divf %195, %196 : vector<40x1xf32>
    %198 = vector.broadcast %190 : vector<40x1xf32> to vector<40x32xf32>
    %199 = arith.subf %177, %198 : vector<40x32xf32>
    %cst_67 = arith.constant 9.99999974E-6 : f32
    %200 = vector.broadcast %cst_67 : f32 to vector<40x1xf32>
    %201 = arith.addf %197, %200 : vector<40x1xf32>
    %202 = math.rsqrt %201 : vector<40x1xf32>
    %203 = vector.broadcast %202 : vector<40x1xf32> to vector<40x32xf32>
    %204 = arith.mulf %199, %203 : vector<40x32xf32>
    %205 = vector.broadcast %178 : vector<1x32xf32> to vector<40x32xf32>
    %206 = arith.mulf %204, %205 : vector<40x32xf32>
    %207 = vector.broadcast %179 : vector<1x32xf32> to vector<40x32xf32>
    %208 = arith.addf %206, %207 : vector<40x32xf32>
    %209 = arith.truncf %208 : vector<40x32xf32> to vector<40x32xbf16>
    %c1 = arith.constant 1 : index
    %c0_68 = arith.constant 0 : index
    %c0_69 = arith.constant 0 : index
    %210 = vector.load %arg6[%c1, %c0_68, %c0_69] : memref<2x32x32xbf16, #tpu.memory_space<vmem>>, vector<1x32x32xbf16>
    %211 = vector.shape_cast %210 : vector<1x32x32xbf16> to vector<32x32xbf16>
    %cst_70 = arith.constant dense<0.000000e+00> : vector<40x32xf32>
    %212 = tpu.matmul %209, %211, %cst_70 {dimension_numbers = #tpu.dot_dimension_numbers<[1], [0], [0], [1], [0, 0, 1, 1], [], []>} : vector<40x32xbf16>, vector<32x32xbf16>, vector<40x32xf32> -> vector<40x32xf32>
    %213 = vector.broadcast %180 : vector<1x32xf32> to vector<40x32xf32>
    %214 = arith.addf %212, %213 : vector<40x32xf32>
    %c1_71 = arith.constant 1 : index
    %c0_72 = arith.constant 0 : index
    %c0_73 = arith.constant 0 : index
    %215 = vector.load %arg7[%c1_71, %c0_72, %c0_73] : memref<2x32x32xbf16, #tpu.memory_space<vmem>>, vector<1x32x32xbf16>
    %216 = vector.shape_cast %215 : vector<1x32x32xbf16> to vector<32x32xbf16>
    %cst_74 = arith.constant dense<0.000000e+00> : vector<40x32xf32>
    %217 = tpu.matmul %209, %216, %cst_74 {dimension_numbers = #tpu.dot_dimension_numbers<[1], [0], [0], [1], [0, 0, 1, 1], [], []>} : vector<40x32xbf16>, vector<32x32xbf16>, vector<40x32xf32> -> vector<40x32xf32>
    %218 = vector.broadcast %181 : vector<1x32xf32> to vector<40x32xf32>
    %219 = arith.addf %217, %218 : vector<40x32xf32>
    %c1_75 = arith.constant 1 : index
    %c0_76 = arith.constant 0 : index
    %c0_77 = arith.constant 0 : index
    %220 = vector.load %arg8[%c1_75, %c0_76, %c0_77] : memref<2x32x32xbf16, #tpu.memory_space<vmem>>, vector<1x32x32xbf16>
    %221 = vector.shape_cast %220 : vector<1x32x32xbf16> to vector<32x32xbf16>
    %cst_78 = arith.constant dense<0.000000e+00> : vector<40x32xf32>
    %222 = tpu.matmul %209, %221, %cst_78 {dimension_numbers = #tpu.dot_dimension_numbers<[1], [0], [0], [1], [0, 0, 1, 1], [], []>} : vector<40x32xbf16>, vector<32x32xbf16>, vector<40x32xf32> -> vector<40x32xf32>
    %223 = vector.broadcast %182 : vector<1x32xf32> to vector<40x32xf32>
    %224 = arith.addf %222, %223 : vector<40x32xf32>
    %225 = tpu.concatenate %214, %214, %214, %214 in 0 : vector<40x32xf32>, vector<40x32xf32>, vector<40x32xf32>, vector<40x32xf32> -> vector<160x32xf32>
    %226 = arith.mulf %225, %2 : vector<160x32xf32>
    %cst_79 = arith.constant 0.353553385 : f32
    %227 = vector.broadcast %cst_79 : f32 to vector<160x32xf32>
    %228 = arith.mulf %226, %227 : vector<160x32xf32>
    %229 = arith.truncf %228 : vector<160x32xf32> to vector<160x32xbf16>
    %230 = arith.truncf %219 : vector<40x32xf32> to vector<40x32xbf16>
    %cst_80 = arith.constant dense<0.000000e+00> : vector<160x40xf32>
    %231 = tpu.matmul %229, %230, %cst_80 {dimension_numbers = #tpu.dot_dimension_numbers<[1], [1], [0], [0], [0, 0, 1, 0], [], []>} : vector<160x32xbf16>, vector<40x32xbf16>, vector<160x40xf32> -> vector<160x40xf32>
    %232 = arith.addf %231, %1 : vector<160x40xf32>
    %cst_81 = arith.constant dense<0xFF800000> : vector<160xf32>
    %233 = vector.multi_reduction <maximumf>, %232, %cst_81 [1] : vector<160x40xf32> to vector<160xf32>
    %234 = vector.shape_cast %233 : vector<160xf32> to vector<160x1xf32>
    %235 = vector.broadcast %234 : vector<160x1xf32> to vector<160x40xf32>
    %236 = arith.subf %232, %235 : vector<160x40xf32>
    %237 = math.exp %236 : vector<160x40xf32>
    %cst_82 = arith.constant dense<0.000000e+00> : vector<160xf32>
    %238 = vector.multi_reduction <add>, %237, %cst_82 [1] : vector<160x40xf32> to vector<160xf32>
    %239 = vector.shape_cast %238 : vector<160xf32> to vector<160x1xf32>
    %240 = tpu.reciprocal %239 {approx = true} : vector<160x1xf32> -> vector<160x1xf32>
    %241 = vector.broadcast %240 : vector<160x1xf32> to vector<160x40xf32>
    %242 = arith.mulf %237, %241 : vector<160x40xf32>
    %cst_83 = arith.constant 0.000000e+00 : f32
    %243 = vector.broadcast %cst_83 : f32 to vector<40x32xf32>
    %244 = vector.extract_strided_slice %242 {offsets = [0, 0], sizes = [40, 40], strides = [1, 1]} : vector<160x40xf32> to vector<40x40xf32>
    %245 = vector.extract_strided_slice %2 {offsets = [0, 0], sizes = [40, 32], strides = [1, 1]} : vector<160x32xf32> to vector<40x32xf32>
    %246 = arith.mulf %224, %245 : vector<40x32xf32>
    %247 = arith.truncf %244 : vector<40x40xf32> to vector<40x40xbf16>
    %248 = arith.truncf %246 : vector<40x32xf32> to vector<40x32xbf16>
    %cst_84 = arith.constant dense<0.000000e+00> : vector<40x32xf32>
    %249 = tpu.matmul %247, %248, %cst_84 {dimension_numbers = #tpu.dot_dimension_numbers<[1], [0], [0], [1], [0, 0, 1, 1], [], []>} : vector<40x40xbf16>, vector<40x32xbf16>, vector<40x32xf32> -> vector<40x32xf32>
    %250 = arith.addf %243, %249 : vector<40x32xf32>
    %251 = vector.extract_strided_slice %242 {offsets = [40, 0], sizes = [40, 40], strides = [1, 1]} : vector<160x40xf32> to vector<40x40xf32>
    %252 = vector.extract_strided_slice %2 {offsets = [40, 0], sizes = [40, 32], strides = [1, 1]} : vector<160x32xf32> to vector<40x32xf32>
    %253 = arith.mulf %224, %252 : vector<40x32xf32>
    %254 = arith.truncf %251 : vector<40x40xf32> to vector<40x40xbf16>
    %255 = arith.truncf %253 : vector<40x32xf32> to vector<40x32xbf16>
    %cst_85 = arith.constant dense<0.000000e+00> : vector<40x32xf32>
    %256 = tpu.matmul %254, %255, %cst_85 {dimension_numbers = #tpu.dot_dimension_numbers<[1], [0], [0], [1], [0, 0, 1, 1], [], []>} : vector<40x40xbf16>, vector<40x32xbf16>, vector<40x32xf32> -> vector<40x32xf32>
    %257 = arith.addf %250, %256 : vector<40x32xf32>
    %258 = vector.extract_strided_slice %242 {offsets = [80, 0], sizes = [40, 40], strides = [1, 1]} : vector<160x40xf32> to vector<40x40xf32>
    %259 = vector.extract_strided_slice %2 {offsets = [80, 0], sizes = [40, 32], strides = [1, 1]} : vector<160x32xf32> to vector<40x32xf32>
    %260 = arith.mulf %224, %259 : vector<40x32xf32>
    %261 = arith.truncf %258 : vector<40x40xf32> to vector<40x40xbf16>
    %262 = arith.truncf %260 : vector<40x32xf32> to vector<40x32xbf16>
    %cst_86 = arith.constant dense<0.000000e+00> : vector<40x32xf32>
    %263 = tpu.matmul %261, %262, %cst_86 {dimension_numbers = #tpu.dot_dimension_numbers<[1], [0], [0], [1], [0, 0, 1, 1], [], []>} : vector<40x40xbf16>, vector<40x32xbf16>, vector<40x32xf32> -> vector<40x32xf32>
    %264 = arith.addf %257, %263 : vector<40x32xf32>
    %265 = vector.extract_strided_slice %242 {offsets = [120, 0], sizes = [40, 40], strides = [1, 1]} : vector<160x40xf32> to vector<40x40xf32>
    %266 = vector.extract_strided_slice %2 {offsets = [120, 0], sizes = [40, 32], strides = [1, 1]} : vector<160x32xf32> to vector<40x32xf32>
    %267 = arith.mulf %224, %266 : vector<40x32xf32>
    %268 = arith.truncf %265 : vector<40x40xf32> to vector<40x40xbf16>
    %269 = arith.truncf %267 : vector<40x32xf32> to vector<40x32xbf16>
    %cst_87 = arith.constant dense<0.000000e+00> : vector<40x32xf32>
    %270 = tpu.matmul %268, %269, %cst_87 {dimension_numbers = #tpu.dot_dimension_numbers<[1], [0], [0], [1], [0, 0, 1, 1], [], []>} : vector<40x40xbf16>, vector<40x32xbf16>, vector<40x32xf32> -> vector<40x32xf32>
    %271 = arith.addf %264, %270 : vector<40x32xf32>
    %272 = arith.truncf %271 : vector<40x32xf32> to vector<40x32xbf16>
    %c1_88 = arith.constant 1 : index
    %c0_89 = arith.constant 0 : index
    %c0_90 = arith.constant 0 : index
    %273 = vector.load %arg9[%c1_88, %c0_89, %c0_90] : memref<2x32x32xbf16, #tpu.memory_space<vmem>>, vector<1x32x32xbf16>
    %274 = vector.shape_cast %273 : vector<1x32x32xbf16> to vector<32x32xbf16>
    %cst_91 = arith.constant dense<0.000000e+00> : vector<40x32xf32>
    %275 = tpu.matmul %272, %274, %cst_91 {dimension_numbers = #tpu.dot_dimension_numbers<[1], [0], [0], [1], [0, 0, 1, 1], [], []>} : vector<40x32xbf16>, vector<32x32xbf16>, vector<40x32xf32> -> vector<40x32xf32>
    %276 = arith.addf %177, %275 : vector<40x32xf32>
    %277 = vector.broadcast %183 : vector<1x32xf32> to vector<40x32xf32>
    %278 = arith.addf %276, %277 : vector<40x32xf32>
    %cst_92 = arith.constant dense<0.000000e+00> : vector<40xf32>
    %279 = vector.multi_reduction <add>, %278, %cst_92 [1] : vector<40x32xf32> to vector<40xf32>
    %280 = vector.shape_cast %279 : vector<40xf32> to vector<40x1xf32>
    %cst_93 = arith.constant 3.200000e+01 : f32
    %281 = vector.broadcast %cst_93 : f32 to vector<40x1xf32>
    %282 = arith.divf %280, %281 : vector<40x1xf32>
    %283 = vector.broadcast %282 : vector<40x1xf32> to vector<40x32xf32>
    %284 = arith.subf %278, %283 : vector<40x32xf32>
    %285 = arith.mulf %284, %284 : vector<40x32xf32>
    %cst_94 = arith.constant dense<0.000000e+00> : vector<40xf32>
    %286 = vector.multi_reduction <add>, %285, %cst_94 [1] : vector<40x32xf32> to vector<40xf32>
    %287 = vector.shape_cast %286 : vector<40xf32> to vector<40x1xf32>
    %cst_95 = arith.constant 3.200000e+01 : f32
    %288 = vector.broadcast %cst_95 : f32 to vector<40x1xf32>
    %289 = arith.divf %287, %288 : vector<40x1xf32>
    %290 = vector.broadcast %282 : vector<40x1xf32> to vector<40x32xf32>
    %291 = arith.subf %278, %290 : vector<40x32xf32>
    %cst_96 = arith.constant 9.99999974E-6 : f32
    %292 = vector.broadcast %cst_96 : f32 to vector<40x1xf32>
    %293 = arith.addf %289, %292 : vector<40x1xf32>
    %294 = math.rsqrt %293 : vector<40x1xf32>
    %295 = vector.broadcast %294 : vector<40x1xf32> to vector<40x32xf32>
    %296 = arith.mulf %291, %295 : vector<40x32xf32>
    %297 = vector.broadcast %184 : vector<1x32xf32> to vector<40x32xf32>
    %298 = arith.mulf %296, %297 : vector<40x32xf32>
    %299 = vector.broadcast %185 : vector<1x32xf32> to vector<40x32xf32>
    %300 = arith.addf %298, %299 : vector<40x32xf32>
    %301 = arith.truncf %300 : vector<40x32xf32> to vector<40x32xbf16>
    %c1_97 = arith.constant 1 : index
    %c0_98 = arith.constant 0 : index
    %c0_99 = arith.constant 0 : index
    %302 = vector.load %arg10[%c1_97, %c0_98, %c0_99] : memref<2x32x128xbf16, #tpu.memory_space<vmem>>, vector<1x32x128xbf16>
    %303 = vector.shape_cast %302 : vector<1x32x128xbf16> to vector<32x128xbf16>
    %cst_100 = arith.constant dense<0.000000e+00> : vector<40x128xf32>
    %304 = tpu.matmul %301, %303, %cst_100 {dimension_numbers = #tpu.dot_dimension_numbers<[1], [0], [0], [1], [0, 0, 1, 1], [], []>} : vector<40x32xbf16>, vector<32x128xbf16>, vector<40x128xf32> -> vector<40x128xf32>
    %305 = vector.extract_strided_slice %3 {offsets = [1, 0], sizes = [1, 128], strides = [1, 1]} : vector<2x128xf32> to vector<1x128xf32>
    %306 = vector.broadcast %305 : vector<1x128xf32> to vector<40x128xf32>
    %307 = arith.addf %304, %306 : vector<40x128xf32>
    %cst_101 = arith.constant 1.702000e+00 : f32
    %308 = vector.broadcast %cst_101 : f32 to vector<40x128xf32>
    %309 = arith.mulf %308, %307 : vector<40x128xf32>
    %310 = arith.negf %309 : vector<40x128xf32>
    %311 = math.exp %310 : vector<40x128xf32>
    %cst_102 = arith.constant 1.000000e+00 : f32
    %312 = vector.broadcast %cst_102 : f32 to vector<40x128xf32>
    %313 = arith.addf %312, %311 : vector<40x128xf32>
    %314 = arith.divf %312, %313 : vector<40x128xf32>
    %315 = arith.mulf %307, %314 : vector<40x128xf32>
    %316 = arith.truncf %315 : vector<40x128xf32> to vector<40x128xbf16>
    %c1_103 = arith.constant 1 : index
    %c0_104 = arith.constant 0 : index
    %c0_105 = arith.constant 0 : index
    %317 = vector.load %arg12[%c1_103, %c0_104, %c0_105] : memref<2x128x32xbf16, #tpu.memory_space<vmem>>, vector<1x128x32xbf16>
    %318 = vector.shape_cast %317 : vector<1x128x32xbf16> to vector<128x32xbf16>
    %cst_106 = arith.constant dense<0.000000e+00> : vector<40x32xf32>
    %319 = tpu.matmul %316, %318, %cst_106 {dimension_numbers = #tpu.dot_dimension_numbers<[1], [0], [0], [1], [0, 0, 1, 1], [], []>} : vector<40x128xbf16>, vector<128x32xbf16>, vector<40x32xf32> -> vector<40x32xf32>
    %320 = arith.addf %278, %319 : vector<40x32xf32>
    %321 = vector.broadcast %186 : vector<1x32xf32> to vector<40x32xf32>
    %322 = arith.addf %320, %321 : vector<40x32xf32>
    %323 = vector.extract_strided_slice %322 {offsets = [32, 0], sizes = [8, 32], strides = [1, 1]} : vector<40x32xf32> to vector<8x32xf32>
    %324 = vector.extract_strided_slice %0 {offsets = [2, 0], sizes = [1, 32], strides = [1, 1]} : vector<22x32xf32> to vector<1x32xf32>
    %325 = vector.extract_strided_slice %0 {offsets = [3, 0], sizes = [1, 32], strides = [1, 1]} : vector<22x32xf32> to vector<1x32xf32>
    %cst_107 = arith.constant dense<0.000000e+00> : vector<8xf32>
    %326 = vector.multi_reduction <add>, %323, %cst_107 [1] : vector<8x32xf32> to vector<8xf32>
    %327 = vector.shape_cast %326 : vector<8xf32> to vector<8x1xf32>
    %cst_108 = arith.constant 3.200000e+01 : f32
    %328 = vector.broadcast %cst_108 : f32 to vector<8x1xf32>
    %329 = arith.divf %327, %328 : vector<8x1xf32>
    %330 = vector.broadcast %329 : vector<8x1xf32> to vector<8x32xf32>
    %331 = arith.subf %323, %330 : vector<8x32xf32>
    %332 = arith.mulf %331, %331 : vector<8x32xf32>
    %cst_109 = arith.constant dense<0.000000e+00> : vector<8xf32>
    %333 = vector.multi_reduction <add>, %332, %cst_109 [1] : vector<8x32xf32> to vector<8xf32>
    %334 = vector.shape_cast %333 : vector<8xf32> to vector<8x1xf32>
    %cst_110 = arith.constant 3.200000e+01 : f32
    %335 = vector.broadcast %cst_110 : f32 to vector<8x1xf32>
    %336 = arith.divf %334, %335 : vector<8x1xf32>
    %337 = vector.broadcast %329 : vector<8x1xf32> to vector<8x32xf32>
    %338 = arith.subf %323, %337 : vector<8x32xf32>
    %cst_111 = arith.constant 9.99999974E-6 : f32
    %339 = vector.broadcast %cst_111 : f32 to vector<8x1xf32>
    %340 = arith.addf %336, %339 : vector<8x1xf32>
    %341 = math.rsqrt %340 : vector<8x1xf32>
    %342 = vector.broadcast %341 : vector<8x1xf32> to vector<8x32xf32>
    %343 = arith.mulf %338, %342 : vector<8x32xf32>
    %344 = vector.broadcast %324 : vector<1x32xf32> to vector<8x32xf32>
    %345 = arith.mulf %343, %344 : vector<8x32xf32>
    %346 = vector.broadcast %325 : vector<1x32xf32> to vector<8x32xf32>
    %347 = arith.addf %345, %346 : vector<8x32xf32>
    %348 = arith.truncf %347 : vector<8x32xf32> to vector<8x32xbf16>
    %c0_112 = arith.constant 0 : index
    %c0_113 = arith.constant 0 : index
    %349 = vector.load %arg13[%c0_112, %c0_113] : memref<32x16xbf16, #tpu.memory_space<vmem>>, vector<32x16xbf16>
    %cst_114 = arith.constant dense<0.000000e+00> : vector<8x16xf32>
    %350 = tpu.matmul %348, %349, %cst_114 {dimension_numbers = #tpu.dot_dimension_numbers<[1], [0], [0], [1], [0, 0, 1, 1], [], []>} : vector<8x32xbf16>, vector<32x16xbf16>, vector<8x16xf32> -> vector<8x16xf32>
    %351 = arith.truncf %350 : vector<8x16xf32> to vector<8x16xbf16>
    %c0_115 = arith.constant 0 : index
    %c0_116 = arith.constant 0 : index
    %352 = vector.load %arg14[%c0_115, %c0_116] : memref<16x8xbf16, #tpu.memory_space<vmem>>, vector<16x8xbf16>
    %cst_117 = arith.constant dense<0.000000e+00> : vector<8x8xf32>
    %353 = tpu.matmul %351, %352, %cst_117 {dimension_numbers = #tpu.dot_dimension_numbers<[1], [0], [0], [1], [0, 0, 1, 1], [], []>} : vector<8x16xbf16>, vector<16x8xbf16>, vector<8x8xf32> -> vector<8x8xf32>
    %c0_118 = arith.constant 0 : index
    %c0_119 = arith.constant 0 : index
    %354 = vector.load %arg15[%c0_118, %c0_119] : memref<1x8xf32, #tpu.memory_space<vmem>>, vector<1x8xf32>
    %355 = vector.broadcast %354 : vector<1x8xf32> to vector<8x8xf32>
    %356 = arith.addf %353, %355 : vector<8x8xf32>
    %357 = vector.extract_strided_slice %356 {offsets = [0, 0], sizes = [2, 8], strides = [1, 1]} : vector<8x8xf32> to vector<2x8xf32>
    %c0_120 = arith.constant 0 : index
    %c0_121 = arith.constant 0 : index
    %358 = vector.load %arg16[%c0_120, %c0_121] : memref<2x8xf32, #tpu.memory_space<vmem>>, vector<2x8xf32>
    tpu.vector_store %arg16[%c0_120, %c0_121], %357 {strides = array<i32>} : memref<2x8xf32, #tpu.memory_space<vmem>>, vector<2x8xf32>,
    return
  }
}

</mosaic_0001>

<bundles_post_ra>
// kernel: farl_forward.1
= control target key start
LH: loop header
LB: loop body
LE: loop exit
PB: predicated region body
PF: predicated region fallthrough
CT: control target
= control target key end

     0   :  { %s6495_s0 = inlined_call_operand.vmem [shape: bf16[40,48], index: 0, kind: input, shape index: {}]   ;;  %s6496_s1 = inlined_call_operand.vmem [shape: bf16[48,32], index: 1, kind: input, shape index: {}]   ;;  %s6497_s2 = inlined_call_operand.vmem [shape: f32[40,32], index: 2, kind: input, shape index: {}]   ;;  %s6498_s3 = inlined_call_operand.vmem [shape: f32[160,40], index: 3, kind: input, shape index: {}]   ;;  %s6499_s4 = inlined_call_operand.vmem [shape: f32[160,32], index: 4, kind: input, shape index: {}]   ;;  %s6500_s5 = inlined_call_operand.vmem [shape: f32[22,32], index: 5, kind: input, shape index: {}]   ;;  %s6501_s6 = inlined_call_operand.vmem [shape: bf16[2,32,32], index: 6, kind: input, shape index: {}]   ;;  %s6502_s7 = inlined_call_operand.vmem [shape: bf16[2,32,32], index: 7, kind: input, shape index: {}]   ;;  %s6503_s8 = inlined_call_operand.vmem [shape: bf16[2,32,32], index: 8, kind: input, shape index: {}]   ;;  %s6504_s9 = inlined_call_operand.vmem [shape: bf16[2,32,32], index: 9, kind: input, shape index: {}]   ;;  %s6505_s10 = inlined_call_operand.vmem [shape: bf16[2,32,128], index: 10, kind: input, shape index: {}]   ;;  %s6506_s11 = inlined_call_operand.vmem [shape: f32[2,128], index: 11, kind: input, shape index: {}]   ;;  %s6507_s12 = inlined_call_operand.vmem [shape: bf16[2,128,32], index: 12, kind: input, shape index: {}]   ;;  %s6508_s13 = inlined_call_operand.vmem [shape: bf16[32,16], index: 13, kind: input, shape index: {}]   ;;  %s6509_s14 = inlined_call_operand.vmem [shape: bf16[16,8], index: 14, kind: input, shape index: {}]   ;;  %s6510_s15 = inlined_call_operand.vmem [shape: f32[1,8], index: 15, kind: input, shape index: {}]   ;;  %s6511_s16 = inlined_call_operand.hbm [shape: f32[2,8], index: 16, kind: output, shape index: {}]  }
   0x1   :  { %6515 = sst [smem:[#allocation5_spill]] %s6495_s0 }
   0x2   :  { %v4345_v0 = vld [vmem:[%s6496_s1] sm:$0xff]   ;;  %v4710_v1 = vmov 0.0   ;;  %v4346_v2 = vld [vmem:[%s6496_s1 + $0x8] sm:$0xff]   ;;  %vm4711_vm0 = vmmov 0   ;;  %v4347_v3 = vld [vmem:[%s6496_s1 + $0x10] sm:$0xff]   ;;  %vm146_vm1 = vcmask 392192  }
   0x3   :  { %3820 = vmatprep.subr.bf16.mxu0 %v4710_v1  ;;  %3838 = vmatprep.subr.bf16.mxu1 %v4710_v1  ;;  %s6516_s29 = sld [smem:[#allocation5_spill]] }
   0x4   :  { %3821 = vmatpush3.bf16.msra.mxu0 %v4345_v0  ;;  %3826 = vmatprep.mubr.msk.bf16.mxu0 %vm4711_vm0, %v4710_v1 }
   0x5   :  { %3822 = vmatprep.subr.bf16.mxu0 %v4710_v1  ;;  %3842 = vmatprep.mubr.msk.bf16.mxu1 %vm4711_vm0, %v4710_v1 }
   0x8   :  { %3823 = vmatpush3.bf16.msra.mxu0 %v4346_v2 }
   0x9   :  { %3824 = vmatprep.subr.bf16.mxu0 %v4710_v1  ;;  %v4348_v4 = vld [vmem:[%s6516_s29] sm:$0xff]   ;;  %v4349_v5 = vld [vmem:[%s6516_s29 + $0x8] sm:$0xff]   ;;  %v4350_v6 = vld [vmem:[%s6516_s29 + $0x10] ss:$0 sps:$4 sm:$0xff]  }
   0xc   :  { %3825 = vmatpush3.bf16.msra.mxu0 %v4347_v3 }
   0xd   :  { %3870 = vmatprep.subr.bf16.mxu0 %v4710_v1 }
   0xf   :  { %3827 = vmatmul.mubr.msk.bf16.vlgmr.msra.gmra.mrb[0].mxu0 %vm146_vm1, %v4348_v4 }
  0x10   :  { %3830 = vmatprep.mubr.msk.bf16.mxu0 %vm4711_vm0, %v4710_v1 }
  0x17   :  { %3831 = vmatmul.mubr.msk.bf16.gmra.mrb[4].mxu0 %vm146_vm1, %v4349_v5 }
  0x18   :  { %3834 = vmatprep.mubr.msk.bf16.mxu0 %vm4711_vm0, %v4710_v1 }
  0x1f   :  { %3835 = vmatmul.mubr.msk.bf16.gmra.mrb[8].mxu0 %vm146_vm1, %v4350_v6 }
  0x20   :  { %3874 = vmatprep.mubr.msk.bf16.mxu0 %vm4711_vm0, %v4710_v1 }
  0x21   :  { %21 = vsyncpa [#allocation3], 0  ;;  %v110_v7 = vld [vmem:[%s6497_s2] sm:$0xff]  ;;  %v111_v9 = vld [vmem:[%s6497_s2 + $0x8] sm:$0xff]  ;;  %vm212_vm2 = vcmask 261120   ;;  %v279_v61 = vlaneseq  ;;  %vm1077_vm3 = vcmask 1043456  }
  0x22   :  { %v112_v16 = vld [vmem:[%s6497_s2 + $0x10] sm:$0xff]  ;;  %v113_v19 = vld [vmem:[%s6497_s2 + $0x18] sm:$0xff]  ;;  %v114_v26 = vld [vmem:[%s6497_s2 + $0x20] sm:$0xff]  ;;  %vm825_vm4 = vcmask 326656   ;;  %vm3432_vm5 = vcmask 130048   ;;  %vm3476_vm6 = vcmask 58368  }
  0x23   :  { %v4856_v2 = vshrl.u32 %v279_v61, 7 }
  0x25   :  { %v4859_v6 = vsub.s32 0, %v4856_v2 }
  0xe2   :  { %v190_v8 = vpop.f32.mrb[0].mxu0 }
  0xe3   :  { %v191_v10 = vadd.f32 %v190_v8, %v110_v7  ;;  %v3828_v11 = vpop.f32.mrb[1].mxu0  ;;  %v4864_v8 = vld [vmem:[%s6500_s5] sm:$0xff] }
  0xe4   :  { %v193_v12 = vpop.f32.mrb[2].mxu0 }
  0xe5   :  { %v194_v13 = vadd.f32 %v193_v12, %v111_v9  ;;  %v3829_v14 = vpop.f32.mrb[3].mxu0  ;;  %v213_v15 = vsel %vm212_vm2, %v191_v10, 0.0  ;;  %v282_v12 = vrot.slane %v4864_v8, %v4859_v6 }
  0xe6   :  { %214 = vadd.xlane.f32.xlu0 %v213_v15 }
  0xe7   :  { %v216_v17 = vsel %vm212_vm2, %v194_v13, 0.0 }
  0xea   :  { %217 = vadd.xlane.f32.xlu0 %v216_v17  ;;  %v198_v18 = vpop.f32.mrb[4].mxu0 }
  0xeb   :  { %v199_v20 = vadd.f32 %v198_v18, %v112_v16  ;;  %v3832_v21 = vpop.f32.mrb[5].mxu0 }
  0xec   :  { %v201_v22 = vpop.f32.mrb[6].mxu0 }
  0xed   :  { %v202_v23 = vadd.f32 %v201_v22, %v113_v19  ;;  %v3833_v24 = vpop.f32.mrb[7].mxu0  ;;  %v219_v25 = vsel %vm212_vm2, %v199_v20, 0.0 }
  0xee   :  { %220 = vadd.xlane.f32.xlu1 %v219_v25 }
  0xef   :  { %v222_v27 = vsel %vm212_vm2, %v202_v23, 0.0 }
  0xf2   :  { %223 = vadd.xlane.f32.xlu1 %v222_v27  ;;  %v206_v28 = vpop.f32.mrb[8].mxu0 }
  0xf3   :  { %v207_v29 = vadd.f32 %v206_v28, %v114_v26  ;;  %v3836_v30 = vpop.f32.mrb[9].mxu0 }
  0xf4   :  { %v209_v31 = vpop.f32.mrb[10].mxu0 }
  0xf5   :  { %v225_v32 = vsel %vm212_vm2, %v207_v29, 0.0  ;;  %v3837_v33 = vpop.f32.mrb[11].mxu0 }
  0xf6   :  { %226 = vadd.xlane.f32.xlu0 %v225_v32 }
 0x173   :  { %v215_v34 = vpop.xlane.xlu0 %214 }
 0x174   :  { %v229_v35 = vmul.f32 0.03125, %v215_v34 }
 0x176   :  { %v234_v36 = vsub.f32 %v191_v10, %v229_v35  ;;  %v4867_v10 = vsub.s32 1, %v4856_v2 }
 0x177   :  { %v218_v37 = vpop.xlane.xlu0 %217 }
 0x178   :  { %v230_v38 = vmul.f32 0.03125, %v218_v37  ;;  %v239_v39 = vmul.f32 %v234_v36, %v234_v36  ;;  %v291_v17 = vrot.slane %v4864_v8, %v4867_v10 }
 0x17a   :  { %v235_v40 = vsub.f32 %v194_v13, %v230_v38  ;;  %v244_v41 = vsel %vm212_vm2, %v239_v39, 0.0 }
 0x17b   :  { %v221_v42 = vpop.xlane.xlu1 %220  ;;  %245 = vadd.xlane.f32.xlu1 %v244_v41 }
 0x17c   :  { %v231_v43 = vmul.f32 0.03125, %v221_v42  ;;  %v240_v44 = vmul.f32 %v235_v40, %v235_v40 }
 0x17e   :  { %v236_v45 = vsub.f32 %v199_v20, %v231_v43  ;;  %v247_v46 = vsel %vm212_vm2, %v240_v44, 0.0 }
 0x17f   :  { %v224_v47 = vpop.xlane.xlu1 %223  ;;  %248 = vadd.xlane.f32.xlu0 %v247_v46 }
 0x180   :  { %v232_v48 = vmul.f32 0.03125, %v224_v47  ;;  %v241_v49 = vmul.f32 %v236_v45, %v236_v45 }
 0x182   :  { %v237_v50 = vsub.f32 %v202_v23, %v232_v48  ;;  %v250_v51 = vsel %vm212_vm2, %v241_v49, 0.0 }
 0x183   :  { %251 = vadd.xlane.f32.xlu1 %v250_v51  ;;  %v227_v52 = vpop.xlane.xlu0 %226 }
 0x184   :  { %v233_v53 = vmul.f32 0.03125, %v227_v52  ;;  %v242_v54 = vmul.f32 %v237_v50, %v237_v50 }
 0x186   :  { %v238_v55 = vsub.f32 %v207_v29, %v233_v53  ;;  %v253_v56 = vsel %vm212_vm2, %v242_v54, 0.0 }
 0x187   :  { %254 = vadd.xlane.f32.xlu0 %v253_v56 }
 0x188   :  { %v243_v57 = vmul.f32 %v238_v55, %v238_v55 }
 0x18a   :  { %v256_v58 = vsel %vm212_vm2, %v243_v57, 0.0 }
 0x18b   :  { %257 = vadd.xlane.f32.xlu1 %v256_v58 }
 0x208   :  { %v246_v59 = vpop.xlane.xlu1 %245 }
 0x209   :  { %v259_v60 = vmul.f32 0.03125, %v246_v59 }
 0x20b   :  { %v264_v62 = vadd.f32 1e-05, %v259_v60 }
 0x20c   :  { %v249_v63 = vpop.xlane.xlu0 %248 }
 0x20d   :  { %4390 = vrsqrt.f32 %v264_v62  ;;  %v260_v0 = vmul.f32 0.03125, %v249_v63 }
 0x20f   :  { %v265_v3 = vadd.f32 1e-05, %v260_v0 }
 0x210   :  { %v252_v4 = vpop.xlane.xlu1 %251 }
 0x211   :  { %4392 = vrsqrt.f32 %v265_v3  ;;  %v261_v5 = vmul.f32 0.03125, %v252_v4 }
 0x213   :  { %v266_v7 = vadd.f32 1e-05, %v261_v5 }
 0x214   :  { %v255_v9 = vpop.xlane.xlu0 %254 }
 0x215   :  { %4394 = vrsqrt.f32 %v266_v7  ;;  %v262_v11 = vmul.f32 0.03125, %v255_v9  ;;  %v4351_v7 = vld [vmem:[%s6501_s6] sm:$0xff]  }
 0x216   :  { %v4352_v9 = vld [vmem:[%s6503_s8] sm:$0xff]   ;;  %3839 = vmatpush3.bf16.msra.mxu1 %v4351_v7  ;;  %v88_v7 = vld [vmem:[%s6499_s4 + $0x50] sm:$0xff] }
 0x217   :  { %v4391_v13 = vpop.eup %4390  ;;  %v267_v14 = vadd.f32 1e-05, %v262_v11  ;;  %3871 = vmatpush3.bf16.msra.mxu0 %v4352_v9  ;;  %v4353_v11 = vld [vmem:[%s6501_s6 + $0x8] sm:$0xff]   ;;  %3840 = vmatprep.subr.bf16.mxu1 %v4710_v1  ;;  %v93_v9 = vld [vmem:[%s6499_s4 + $0x78] sm:$0xff] }
 0x218   :  { %v258_v15 = vpop.xlane.xlu1 %257  ;;  %v274_v16 = vmul.f32 %v4391_v13, %v234_v36  ;;  %3872 = vmatprep.subr.bf16.mxu0 %v4710_v1 }
 0x219   :  { %4396 = vrsqrt.f32 %v267_v14  ;;  %v263_v18 = vmul.f32 0.03125, %v258_v15 }
 0x21a   :  { %v283_v19 = vmul.f32 %v282_v12, %v274_v16  ;;  %3841 = vmatpush3.bf16.msra.mxu1 %v4353_v11 }
 0x21b   :  { %v4393_v20 = vpop.eup %4392  ;;  %v268_v21 = vadd.f32 1e-05, %v263_v18  ;;  %3854 = vmatprep.subr.bf16.mxu1 %v4710_v1 }
 0x21c   :  { %v4873_v22 = vadd.f32 %v291_v17, %v283_v19  ;;  %v275_v23 = vmul.f32 %v4393_v20, %v235_v40 }
 0x21d   :  { %4398 = vrsqrt.f32 %v268_v21 }
 0x21e   :  { %v297_v24 = vsel %vm212_vm2, %v4873_v22, 0.0  ;;  %v284_v25 = vmul.f32 %v282_v12, %v275_v23 }
 0x21f   :  { %v4395_v26 = vpop.eup %4394  ;;  %298 = vadd.xlane.f32.xlu0 %v297_v24  ;;  %v4932_v24 = vsub.s32 4, %v4856_v2 }
 0x220   :  { %v4877_v27 = vadd.f32 %v291_v17, %v284_v25  ;;  %v276_v28 = vmul.f32 %v4395_v26, %v236_v45 }
 0x222   :  { %v300_v29 = vsel %vm212_vm2, %v4877_v27, 0.0  ;;  %v285_v30 = vmul.f32 %v282_v12, %v276_v28 }
 0x223   :  { %v4397_v31 = vpop.eup %4396  ;;  %301 = vadd.xlane.f32.xlu1 %v300_v29 }
 0x224   :  { %v4881_v32 = vadd.f32 %v291_v17, %v285_v30  ;;  %v277_v33 = vmul.f32 %v4397_v31, %v237_v50  ;;  %v365_v31 = vrot.slane %v4864_v8, %v4932_v24 }
 0x226   :  { %v303_v34 = vsel %vm212_vm2, %v4881_v32, 0.0  ;;  %v286_v35 = vmul.f32 %v282_v12, %v277_v33  ;;  %v4937_v33 = vsub.s32 5, %v4856_v2 }
 0x227   :  { %v4399_v36 = vpop.eup %4398  ;;  %304 = vadd.xlane.f32.xlu0 %v303_v34 }
 0x228   :  { %v4885_v37 = vadd.f32 %v291_v17, %v286_v35  ;;  %v278_v38 = vmul.f32 %v4399_v36, %v238_v55 }
 0x22a   :  { %v306_v39 = vsel %vm212_vm2, %v4885_v37, 0.0  ;;  %v287_v40 = vmul.f32 %v282_v12, %v278_v38  ;;  %v4354_v12 = vld [vmem:[%s6503_s8 + $0x8] sm:$0xff]  }
 0x22b   :  { %307 = vadd.xlane.f32.xlu1 %v306_v39  ;;  %3873 = vmatpush3.bf16.msra.mxu0 %v4354_v12 }
 0x22c   :  { %v4889_v41 = vadd.f32 %v291_v17, %v287_v40  ;;  %3912 = vmatprep.subr.bf16.mxu0 %v4710_v1  ;;  %v374_v40 = vrot.slane %v4864_v8, %v4937_v33 }
 0x22e   :  { %v309_v42 = vsel %vm212_vm2, %v4889_v41, 0.0 }
 0x22f   :  { %310 = vadd.xlane.f32.xlu0 %v309_v42 }
 0x2ac   :  { %v299_v43 = vpop.xlane.xlu0 %298 }
 0x2ad   :  { %v312_v44 = vmul.f32 0.03125, %v299_v43 }
 0x2af   :  { %v317_v45 = vsub.f32 %v4873_v22, %v312_v44 }
 0x2b0   :  { %v302_v46 = vpop.xlane.xlu1 %301 }
 0x2b1   :  { %v313_v47 = vmul.f32 0.03125, %v302_v46  ;;  %v322_v48 = vmul.f32 %v317_v45, %v317_v45 }
 0x2b3   :  { %v318_v49 = vsub.f32 %v4877_v27, %v313_v47  ;;  %v327_v50 = vsel %vm212_vm2, %v322_v48, 0.0  ;;  %v4355_v47 = vld [vmem:[%s6502_s7] sm:$0xff]  }
 0x2b4   :  { %328 = vadd.xlane.f32.xlu1 %v327_v50  ;;  %v305_v51 = vpop.xlane.xlu0 %304 }
 0x2b5   :  { %v314_v52 = vmul.f32 0.03125, %v305_v51  ;;  %v323_v53 = vmul.f32 %v318_v49, %v318_v49 }
 0x2b7   :  { %v4897_v54 = vsub.f32 %v4881_v32, %v314_v52  ;;  %v330_v55 = vsel %vm212_vm2, %v323_v53, 0.0  ;;  %v4356_v52 = vld [vmem:[%s6502_s7 + $0x8] sm:$0xff]  }
 0x2b8   :  { %v308_v56 = vpop.xlane.xlu1 %307  ;;  %331 = vadd.xlane.f32.xlu0 %v330_v55 }
 0x2b9   :  { %v315_v57 = vmul.f32 0.03125, %v308_v56  ;;  %v324_v58 = vmul.f32 %v4897_v54, %v4897_v54 }
 0x2bb   :  { %v4903_v59 = vsub.f32 %v4885_v37, %v315_v57  ;;  %v333_v60 = vsel %vm212_vm2, %v324_v58, 0.0 }
 0x2bc   :  { %334 = vadd.xlane.f32.xlu1 %v333_v60  ;;  %v311_v61 = vpop.xlane.xlu0 %310 }
 0x2bd   :  { %v316_v62 = vmul.f32 0.03125, %v311_v61  ;;  %v325_v63 = vmul.f32 %v4903_v59, %v4903_v59 }
 0x2bf   :  { %v4909_v0 = vsub.f32 %v4889_v41, %v316_v62  ;;  %v336_v3 = vsel %vm212_vm2, %v325_v63, 0.0  ;;  %v6514_v62 = vsub.s32 6, %v4856_v2  ;;  %v56_v63 = vld [vmem:[%s6500_s5 + $0x8] sm:$0xff] }
 0x2c0   :  { %337 = vadd.xlane.f32.xlu0 %v336_v3  ;;  %v4986_v3 = vrot.slane %v56_v63, %v4859_v6 }
 0x2c1   :  { %v326_v4 = vmul.f32 %v4909_v0, %v4909_v0 }
 0x2c3   :  { %v339_v5 = vsel %vm212_vm2, %v326_v4, 0.0  ;;  %v78_v4 = vld [vmem:[%s6499_s4] sm:$0xff] }
 0x2c4   :  { %340 = vadd.xlane.f32.xlu1 %v339_v5  ;;  %v83_v5 = vld [vmem:[%s6499_s4 + $0x28] sm:$0xff] }
 0x341   :  { %v329_v13 = vpop.xlane.xlu1 %328 }
 0x342   :  { %v342_v14 = vmul.f32 0.03125, %v329_v13  ;;  %v6513_v13 = vsub.s32 7, %v4856_v2 }
 0x344   :  { %v347_v15 = vadd.f32 1e-05, %v342_v14 }
 0x345   :  { %v332_v16 = vpop.xlane.xlu0 %331 }
 0x346   :  { %4400 = vrsqrt.f32 %v347_v15  ;;  %v343_v17 = vmul.f32 0.03125, %v332_v16 }
 0x348   :  { %v348_v18 = vadd.f32 1e-05, %v343_v17 }
 0x349   :  { %v335_v19 = vpop.xlane.xlu1 %334 }
 0x34a   :  { %4402 = vrsqrt.f32 %v348_v18  ;;  %v344_v20 = vmul.f32 0.03125, %v335_v19 }
 0x34c   :  { %v349_v21 = vadd.f32 1e-05, %v344_v20 }
 0x34d   :  { %v338_v23 = vpop.xlane.xlu0 %337 }
 0x34e   :  { %4404 = vrsqrt.f32 %v349_v21  ;;  %v345_v25 = vmul.f32 0.03125, %v338_v23 }
 0x350   :  { %v4401_v26 = vpop.eup %4400  ;;  %v350_v28 = vadd.f32 1e-05, %v345_v25 }
 0x351   :  { %v341_v29 = vpop.xlane.xlu1 %340  ;;  %v357_v30 = vmul.f32 %v4401_v26, %v317_v45 }
 0x352   :  { %4406 = vrsqrt.f32 %v350_v28  ;;  %v346_v34 = vmul.f32 0.03125, %v341_v29 }
 0x353   :  { %v366_v39 = vmul.f32 %v365_v31, %v357_v30  ;;  %v79_v30 = vld [vmem:[%s6499_s4 + $0x8] sm:$0xff] }
 0x354   :  { %v4403_v35 = vpop.eup %4402  ;;  %v351_v36 = vadd.f32 1e-05, %v346_v34  ;;  %v89_v34 = vld [vmem:[%s6499_s4 + $0x58] sm:$0xff] }
 0x355   :  { %v358_v38 = vmul.f32 %v4403_v35, %v318_v49  ;;  %v375_v44 = vadd.f32 %v374_v40, %v366_v39  ;;  %v5017_v35 = vrot.slane %v4864_v8, %v6513_v13 }
 0x356   :  { %4408 = vrsqrt.f32 %v351_v36 }
 0x357   :  { %v367_v42 = vmul.f32 %v365_v31, %v358_v38 }
 0x358   :  { %v4405_v43 = vpop.eup %4404 }
 0x359   :  { %v376_v45 = vadd.f32 %v374_v40, %v367_v42  ;;  %v359_v46 = vmul.f32 %v4405_v43, %v4897_v54 }
 0x35b   :  { %v380_v48 = vpack.c.bf16 %v376_v45, %v375_v44  ;;  %v368_v51 = vmul.f32 %v365_v31, %v359_v46 }
 0x35c   :  { %v4407_v50 = vpop.eup %4406 }
 0x35d   :  { %3843 = vmatmul.mubr.msk.bf16.vlgmr.msra.gmra.mrb[0].mxu1 %vm212_vm2, %v380_v48  ;;  %3875 = vmatmul.mubr.msk.bf16.vlgmr.msra.gmra.mrb[12].mxu0 %vm212_vm2, %v380_v48  ;;  %v360_v49 = vmul.f32 %v4407_v50, %v4903_v59  ;;  %v377_v55 = vadd.f32 %v374_v40, %v368_v51 }
 0x35e   :  { %3855 = vmatpush3.bf16.msra.mxu1 %v4355_v47  ;;  %3846 = vmatprep.mubr.msk.bf16.mxu1 %vm4711_vm0, %v4710_v1 }
 0x35f   :  { %3878 = vmatprep.mubr.msk.bf16.mxu0 %vm4711_vm0, %v4710_v1  ;;  %v369_v53 = vmul.f32 %v365_v31, %v360_v49  ;;  %3856 = vmatprep.subr.bf16.mxu1 %v4710_v1  ;;  %v80_v49 = vld [vmem:[%s6499_s4 + $0x10] sm:$0xff] }
 0x360   :  { %v4409_v54 = vpop.eup %4408 }
 0x361   :  { %v378_v56 = vadd.f32 %v374_v40, %v369_v53  ;;  %v361_v57 = vmul.f32 %v4409_v54, %v4909_v0  ;;  %v4983_v0 = vrot.slane %v4864_v8, %v6514_v62 }
 0x362   :  { %3857 = vmatpush3.bf16.msra.mxu1 %v4356_v52 }
 0x363   :  { %v381_v58 = vpack.c.bf16 %v378_v56, %v377_v55  ;;  %v370_v59 = vmul.f32 %v365_v31, %v361_v57  ;;  %v84_v31 = vld [vmem:[%s6499_s4 + $0x30] sm:$0xff]  ;;  %v85_v55 = vld [vmem:[%s6499_s4 + $0x38] sm:$0xff]  ;;  %v90_v56 = vld [vmem:[%s6499_s4 + $0x60] sm:$0xff] }
 0x364   :  { %v95_v57 = vld [vmem:[%s6499_s4 + $0x88] sm:$0xff] }
 0x365   :  { %3847 = vmatmul.mubr.msk.bf16.gmra.mrb[4].mxu1 %vm212_vm2, %v381_v58  ;;  %3879 = vmatmul.mubr.msk.bf16.gmra.mrb[16].mxu0 %vm212_vm2, %v381_v58  ;;  %v379_v60 = vadd.f32 %v374_v40, %v370_v59  ;;  %v94_v40 = vld [vmem:[%s6499_s4 + $0x80] sm:$0xff] }
 0x366   :  { %3850 = vmatprep.mubr.msk.bf16.mxu1 %vm4711_vm0, %v4710_v1  ;;  %3882 = vmatprep.mubr.msk.bf16.mxu0 %vm4711_vm0, %v4710_v1 }
 0x367   :  { %v382_v61 = vpack.c.bf16 %v379_v60, %v379_v60 }
 0x36d   :  { %3851 = vmatmul.mubr.msk.bf16.gmra.mrb[8].mxu1 %vm212_vm2, %v382_v61  ;;  %3883 = vmatmul.mubr.msk.bf16.gmra.mrb[20].mxu0 %vm212_vm2, %v382_v61 }
 0x36e   :  { %3858 = vmatprep.mubr.msk.bf16.mxu1 %vm4711_vm0, %v4710_v1  ;;  %3918 = vmatprep.mubr.msk.bf16.mxu0 %vm4711_vm0, %v4710_v1 }
 0x375   :  { %3859 = vmatmul.mubr.msk.bf16.vlgmr.msra.gmra.mrb[12].mxu1 %vm212_vm2, %v380_v48 }
 0x376   :  { %3862 = vmatprep.mubr.msk.bf16.mxu1 %vm4711_vm0, %v4710_v1 }
 0x37d   :  { %3863 = vmatmul.mubr.msk.bf16.gmra.mrb[16].mxu1 %vm212_vm2, %v381_v58 }
 0x37e   :  { %3866 = vmatprep.mubr.msk.bf16.mxu1 %vm4711_vm0, %v4710_v1 }
 0x385   :  { %3867 = vmatmul.mubr.msk.bf16.gmra.mrb[20].mxu1 %vm212_vm2, %v382_v61 }
 0x430   :  { %v446_v11 = vpop.f32.mrb[0].mxu1  ;;  %v598_v12 = vpop.f32.mrb[12].mxu0 }
 0x431   :  { %v447_v14 = vadd.f32 %v446_v11, %v4983_v0  ;;  %v599_v15 = vadd.f32 %v598_v12, %v4986_v3  ;;  %v3844_v16 = vpop.f32.mrb[1].mxu1  ;;  %v3876_v17 = vpop.f32.mrb[13].mxu0 }
 0x432   :  { %v449_v18 = vpop.f32.mrb[2].mxu1  ;;  %v601_v19 = vpop.f32.mrb[14].mxu0 }
 0x433   :  { %v620_v20 = vmul.f32 %v447_v14, %v78_v4  ;;  %v625_v21 = vmul.f32 %v447_v14, %v83_v5  ;;  %v630_v23 = vmul.f32 %v447_v14, %v88_v7  ;;  %v635_v25 = vmul.f32 %v447_v14, %v93_v9  ;;  %v3845_v26 = vpop.f32.mrb[3].mxu1  ;;  %v3877_v28 = vpop.f32.mrb[15].mxu0 }
 0x434   :  { %v5003_v29 = vmul.f32 %v599_v15, %v78_v4  ;;  %v1057_v36 = vmul.f32 %v599_v15, %v83_v5  ;;  %v5019_v38 = vmul.f32 %v599_v15, %v88_v7  ;;  %v5021_v39 = vmul.f32 %v599_v15, %v93_v9 }
 0x435   :  { %v450_v42 = vadd.f32 %v449_v18, %v4983_v0  ;;  %v5027_v43 = vmul.f32 0.35355338, %v620_v20  ;;  %v5029_v44 = vmul.f32 0.35355338, %v625_v21  ;;  %v5031_v45 = vmul.f32 0.35355338, %v630_v23 }
 0x436   :  { %v602_v8 = vadd.f32 %v601_v19, %v4986_v3  ;;  %v5034_v46 = vmul.f32 0.35355338, %v635_v25  ;;  %v81_v19 = vld [vmem:[%s6499_s4 + $0x18] sm:$0xff] }
 0x437   :  { %v621_v47 = vmul.f32 %v450_v42, %v79_v30  ;;  %v626_v48 = vmul.f32 %v450_v42, %v84_v31  ;;  %v631_v50 = vmul.f32 %v450_v42, %v89_v34  ;;  %v636_v51 = vmul.f32 %v450_v42, %v94_v40 }
 0x438   :  { %v5039_v52 = vmul.f32 %v602_v8, %v79_v30  ;;  %v1058_v53 = vmul.f32 %v602_v8, %v84_v31  ;;  %v5041_v54 = vmul.f32 %v602_v8, %v89_v34  ;;  %v454_v58 = vpop.f32.mrb[4].mxu1  ;;  %v606_v59 = vpop.f32.mrb[16].mxu0  ;;  %v5054_v63 = vmul.f32 %v602_v8, %v94_v40  ;;  %v86_v30 = vld [vmem:[%s6499_s4 + $0x40] sm:$0xff]  ;;  %v91_v31 = vld [vmem:[%s6499_s4 + $0x68] sm:$0xff] }
 0x439   :  { %v641_v60 = vmul.f32 0.35355338, %v621_v47  ;;  %v5052_v61 = vmul.f32 0.35355338, %v626_v48  ;;  %v455_v4 = vadd.f32 %v454_v58, %v4983_v0  ;;  %v5057_v5 = vmul.f32 0.35355338, %v631_v50 }
 0x43a   :  { %v607_v7 = vadd.f32 %v606_v59, %v4986_v3  ;;  %v3848_v9 = vpop.f32.mrb[5].mxu1  ;;  %v3880_v11 = vpop.f32.mrb[17].mxu0  ;;  %v1065_v12 = vpack.c.bf16 %v1058_v53, %v1057_v36  ;;  %v1054_v14 = vpack.c.bf16 %v5039_v52, %v5003_v29  ;;  %v5065_v23 = vmul.f32 0.35355338, %v636_v51  ;;  %v96_v47 = vld [vmem:[%s6499_s4 + $0x90] sm:$0xff] }
 0x43b   :  { %v622_v15 = vmul.f32 %v455_v4, %v80_v49  ;;  %v627_v16 = vmul.f32 %v455_v4, %v85_v55  ;;  %v632_v17 = vmul.f32 %v455_v4, %v90_v56  ;;  %v637_v18 = vmul.f32 %v455_v4, %v95_v57  ;;  %v457_v20 = vpop.f32.mrb[6].mxu1  ;;  %v609_v21 = vpop.f32.mrb[18].mxu0  ;;  %v5112_v11 = vld [vmem:[%s6499_s4 + $0x70] sm:$0xff] }
 0x43c   :  { %v5067_v25 = vmul.f32 %v607_v7, %v80_v49  ;;  %v1059_v26 = vmul.f32 %v607_v7, %v85_v55  ;;  %v5069_v28 = vmul.f32 %v607_v7, %v90_v56  ;;  %3913 = vmatpush3.bf16.msra.mxu0 %v1065_v12  ;;  %v3849_v34 = vpop.f32.mrb[7].mxu1  ;;  %v3881_v36 = vpop.f32.mrb[19].mxu0  ;;  %v5081_v8 = vmul.f32 %v607_v7, %v95_v57 }
 0x43d   :  { %v5077_v40 = vmul.f32 0.35355338, %v622_v15  ;;  %v5079_v42 = vmul.f32 0.35355338, %v627_v16  ;;  %v458_v48 = vadd.f32 %v457_v20, %v4983_v0  ;;  %3914 = vmatprep.subr.bf16.mxu0 %v4710_v1  ;;  %v5088_v50 = vmul.f32 0.35355338, %v632_v17 }
 0x43e   :  { %v610_v49 = vadd.f32 %v609_v21, %v4986_v3  ;;  %v660_v51 = vpack.c.bf16 %v641_v60, %v5027_v43  ;;  %v665_v53 = vpack.c.bf16 %v5057_v5, %v5031_v45  ;;  %v5094_v55 = vmul.f32 0.35355338, %v637_v18  ;;  %v5104_v43 = vld [vmem:[%s6499_s4 + $0x20] sm:$0xff]  ;;  %v87_v60 = vld [vmem:[%s6499_s4 + $0x48] sm:$0xff]  ;;  %v64_v45 = vld [vmem:[%s6498_s3 + $0x30] sm:$0xff] }
 0x43f   :  { %v623_v56 = vmul.f32 %v458_v48, %v81_v19  ;;  %v628_v57 = vmul.f32 %v458_v48, %v86_v30  ;;  %v633_v58 = vmul.f32 %v458_v48, %v91_v31  ;;  %v638_v59 = vmul.f32 %v458_v48, %v96_v47 }
 0x440   :  { %v5096_v4 = vmul.f32 %v610_v49, %v81_v19  ;;  %v1060_v7 = vmul.f32 %v610_v49, %v86_v30  ;;  %v5098_v9 = vmul.f32 %v610_v49, %v91_v31  ;;  %3892 = vmatprep.mubr.msk.bf16.mxu1 %vm212_vm2, %v660_v51  ;;  %v462_v12 = vpop.f32.mrb[8].mxu1  ;;  %v614_v15 = vpop.f32.mrb[20].mxu0  ;;  %v5118_v18 = vmul.f32 %v610_v49, %v96_v47  ;;  %v5123_v19 = vld [vmem:[%s6499_s4 + $0x98] sm:$0xff] }
 0x441   :  { %v5114_v16 = vmul.f32 0.35355338, %v623_v56  ;;  %v5116_v17 = vmul.f32 0.35355338, %v633_v58  ;;  %v463_v20 = vadd.f32 %v462_v12, %v4983_v0  ;;  %v5126_v21 = vmul.f32 0.35355338, %v628_v57 }
 0x442   :  { %v5129_v30 = vadd.f32 %v614_v15, %v4986_v3  ;;  %v3852_v31 = vpop.f32.mrb[9].mxu1  ;;  %v3884_v34 = vpop.f32.mrb[21].mxu0  ;;  %v1066_v36 = vpack.c.bf16 %v1060_v7, %v1059_v26  ;;  %v663_v48 = vpack.c.bf16 %v5079_v42, %v5052_v61 }
 0x443   :  { %v661_v47 = vpack.c.bf16 %v5114_v16, %v5077_v40  ;;  %v624_v49 = vmul.f32 %v463_v20, %v5104_v43  ;;  %v629_v51 = vmul.f32 %v463_v20, %v87_v60  ;;  %v634_v56 = vmul.f32 %v463_v20, %v5112_v11  ;;  %v465_v0 = vpop.f32.mrb[10].mxu1  ;;  %v617_v57 = vpop.f32.mrb[22].mxu0 }
 0x444   :  { %v639_v58 = vmul.f32 %v463_v20, %v5123_v19  ;;  %3915 = vmatpush3.bf16.msra.mxu0 %v1066_v36  ;;  %v3853_v3 = vpop.f32.mrb[11].mxu1  ;;  %v3885_v12 = vpop.f32.mrb[23].mxu0  ;;  %v1061_v26 = vmul.f32 %v5129_v30, %v87_v60  ;;  %v666_v7 = vpack.c.bf16 %v5116_v17, %v5088_v50  ;;  %v668_v40 = vpack.c.bf16 %v5094_v55, %v5065_v23 }
 0x445   :  { %v644_v15 = vmul.f32 0.35355338, %v624_v49  ;;  %v649_v16 = vmul.f32 0.35355338, %v629_v51  ;;  %v654_v31 = vmul.f32 0.35355338, %v634_v56  ;;  %3916 = vmatprep.subr.bf16.mxu0 %v4710_v1  ;;  %v1055_v34 = vpack.c.bf16 %v5096_v4, %v5067_v25 }
 0x446   :  { %v658_v20 = vmul.f32 0.35355338, %v638_v59  ;;  %v659_v36 = vmul.f32 0.35355338, %v639_v58  ;;  %v1067_v0 = vpack.c.bf16 %v1061_v26, %v1061_v26  ;;  %v1213_v60 = vpack.c.bf16 %v5041_v54, %v5019_v38 }
 0x447   :  { %v662_v57 = vpack.c.bf16 %v5029_v44, %v644_v15  ;;  %v664_v50 = vpack.c.bf16 %v649_v16, %v5126_v21  ;;  %v667_v23 = vpack.c.bf16 %v5034_v46, %v654_v31 }
 0x448   :  { %v522_v17 = vpop.f32.mrb[12].mxu1  ;;  %v1079_v49 = vsel %vm1077_vm3, %v1067_v0, 0  ;;  %v669_v51 = vpack.c.bf16 %v659_v36, %v658_v20 }
 0x449   :  { %3917 = vmatpush3.bf16.msra.mxu0 %v1079_v49  ;;  %v3860_v59 = vpop.f32.mrb[13].mxu1  ;;  %v523_v46 = vadd.f32 %v522_v17, %v5017_v35 }
 0x44a   :  { %v525_v44 = vpop.f32.mrb[14].mxu1  ;;  %3930 = vmatprep.subr.bf16.mxu0 %v4710_v1 }
 0x44b   :  { %v526_v21 = vadd.f32 %v525_v44, %v5017_v35  ;;  %v3861_v3 = vpop.f32.mrb[15].mxu1 }
 0x44d   :  { %v670_v12 = vpack.c.bf16 %v526_v21, %v523_v46 }
 0x44f   :  { %4336 = vmatprep.subr.msk.bf16.mxu1 %vm212_vm2, %v670_v12  ;;  %v704_v26 = vsel %vm212_vm2, %v670_v12, 0 }
 0x450   :  { %v530_v15 = vpop.f32.mrb[16].mxu1  ;;  %3887 = vmatpush3.bf16.xpose.msra.mxu1 %v704_v26 }
 0x451   :  { %v3864_v16 = vpop.f32.mrb[17].mxu1  ;;  %v531_v20 = vadd.f32 %v530_v15, %v5017_v35 }
 0x452   :  { %v533_v31 = vpop.f32.mrb[18].mxu1 }
 0x453   :  { %v534_v36 = vadd.f32 %v533_v31, %v5017_v35  ;;  %v3865_v0 = vpop.f32.mrb[19].mxu1  ;;  %v66_v31 = vld [vmem:[%s6498_s3 + $0x40] sm:$0xff] }
 0x455   :  { %v671_v49 = vpack.c.bf16 %v534_v36, %v531_v20  ;;  %v58_v36 = vld [vmem:[%s6498_s3] sm:$0xff] }
 0x457   :  { %4337 = vmatprep.subr.msk.bf16.mxu1 %vm212_vm2, %v671_v49  ;;  %v707_v17 = vsel %vm212_vm2, %v671_v49, 0  ;;  %v67_v49 = vld [vmem:[%s6498_s3 + $0x48] sm:$0xff] }
 0x458   :  { %v538_v59 = vpop.f32.mrb[20].mxu1  ;;  %3889 = vmatpush3.bf16.xpose.msra.mxu1 %v707_v17 }
 0x459   :  { %v539_v44 = vadd.f32 %v538_v59, %v5017_v35  ;;  %v3868_v46 = vpop.f32.mrb[21].mxu1 }
 0x45a   :  { %v541_v21 = vpop.f32.mrb[22].mxu1  ;;  %v59_v46 = vld [vmem:[%s6498_s3 + $0x8] sm:$0xff] }
 0x45b   :  { %v672_v3 = vpack.c.bf16 %v539_v44, %v539_v44  ;;  %v3869_v12 = vpop.f32.mrb[23].mxu1 }
 0x45d   :  { %4338 = vmatprep.subr.msk.bf16.mxu1 %vm212_vm2, %v672_v3  ;;  %v710_v26 = vsel %vm212_vm2, %v672_v3, 0 }
 0x460   :  { %3891 = vmatpush3.bf16.xpose.msra.mxu1 %v710_v26 }
 0x461   :  { %3984 = vmatprep.subr.bf16.mxu1 %v4710_v1 }
 0x467   :  { %3893 = vmatmul.mubr.msk.bf16.vlgmr.msra.gmra.mrb[24].mxu1 %vm212_vm2, %v661_v47 }
 0x468   :  { %3896 = vmatprep.mubr.msk.bf16.mxu1 %vm212_vm2, %v662_v57  ;;  %v65_v57 = vld [vmem:[%s6498_s3 + $0x38] sm:$0xff] }
 0x46f   :  { %3897 = vmatmul.mubr.msk.bf16.gmra.mrb[28].mxu1 %vm212_vm2, %v663_v48 }
 0x470   :  { %3900 = vmatprep.mubr.msk.bf16.mxu1 %vm212_vm2, %v664_v50 }
 0x477   :  { %3901 = vmatmul.mubr.msk.bf16.gmra.mrb[32].mxu1 %vm212_vm2, %v665_v53 }
 0x478   :  { %3904 = vmatprep.mubr.msk.bf16.mxu1 %vm212_vm2, %v666_v7  ;;  %v63_v7 = vld [vmem:[%s6498_s3 + $0x28] sm:$0xff] }
 0x47f   :  { %3905 = vmatmul.mubr.msk.bf16.gmra.mrb[36].mxu1 %vm212_vm2, %v667_v23 }
 0x480   :  { %3908 = vmatprep.mubr.msk.bf16.mxu1 %vm212_vm2, %v668_v40 }
 0x487   :  { %3909 = vmatmul.mubr.msk.bf16.gmra.mrb[40].mxu1 %vm212_vm2, %v669_v51 }
 0x488   :  { %3988 = vmatprep.mubr.msk.bf16.mxu1 %vm4711_vm0, %v4710_v1 }
 0x53a   :  { %v3894_v35 = vpop.f32.mrb[24].mxu1 }
 0x53b   :  { %v746_v61 = vpop.f32.mrb[25].mxu1 }
 0x53c   :  { %v3895_v42 = vpop.f32.mrb[26].mxu1  ;;  %v5223_v3 = vadd.f32 %v746_v61, %v58_v36  ;;  %v61_v61 = vld [vmem:[%s6498_s3 + $0x18] sm:$0xff] }
 0x53d   :  { %v749_v48 = vpop.f32.mrb[27].mxu1 }
 0x542   :  { %v3898_v5 = vpop.f32.mrb[28].mxu1 }
 0x543   :  { %v5191_v53 = vadd.f32 %v3898_v5, %v64_v45  ;;  %v762_v47 = vpop.f32.mrb[29].mxu1  ;;  %v60_v45 = vld [vmem:[%s6498_s3 + $0x10] sm:$0xff]  ;;  %v5232_v5 = vadd.f32 %v749_v48, %v59_v46 }
 0x544   :  { %v3899_v40 = vpop.f32.mrb[30].mxu1 }
 0x545   :  { %v765_v50 = vpop.f32.mrb[31].mxu1  ;;  %v844_v23 = vsel %vm825_vm4, %v5191_v53, -inf  ;;  %v5203_v15 = vadd.f32 %v3899_v40, %v65_v57  ;;  %v5239_v40 = vadd.f32 %v3894_v35, %v60_v45  ;;  %v829_v36 = vsel %vm825_vm4, %v5232_v5, -inf  ;;  %v68_v35 = vld [vmem:[%s6498_s3 + $0x50] sm:$0xff] }
 0x546   :  { %v5201_v51 = vadd.f32 %v765_v50, %v63_v7  ;;  %845 = vmax.xlane.f32.xlu1 %v844_v23  ;;  %v826_v50 = vsel %vm825_vm4, %v5223_v3, -inf  ;;  %v62_v23 = vld [vmem:[%s6498_s3 + $0x20] sm:$0xff] }
 0x547   :  { %v847_v44 = vsel %vm825_vm4, %v5203_v15, -inf }
 0x548   :  { %v841_v16 = vsel %vm825_vm4, %v5201_v51, -inf }
 0x549   :  { %842 = vmax.xlane.f32.xlu0 %v841_v16  ;;  %v5246_v16 = vadd.f32 %v3895_v42, %v61_v61  ;;  %v69_v42 = vld [vmem:[%s6498_s3 + $0x58] sm:$0xff]  ;;  %v71_v61 = vld [vmem:[%s6498_s3 + $0x68] sm:$0xff] }
 0x54a   :  { %v3902_v20 = vpop.f32.mrb[32].mxu1 }
 0x54b   :  { %v778_v0 = vpop.f32.mrb[33].mxu1  ;;  %v5260_v46 = vadd.f32 %v3902_v20, %v68_v35 }
 0x54c   :  { %v5216_v17 = vadd.f32 %v778_v0, %v66_v31  ;;  %v3903_v59 = vpop.f32.mrb[34].mxu1 }
 0x54d   :  { %v781_v21 = vpop.f32.mrb[35].mxu1  ;;  %848 = vmax.xlane.f32.xlu0 %v847_v44  ;;  %v832_v44 = vsel %vm825_vm4, %v5239_v40, -inf }
 0x54e   :  { %v5225_v12 = vadd.f32 %v781_v21, %v67_v49  ;;  %v850_v26 = vsel %vm825_vm4, %v5216_v17, -inf  ;;  %v5253_v49 = vadd.f32 %v762_v47, %v62_v23  ;;  %v835_v21 = vsel %vm825_vm4, %v5246_v16, -inf }
 0x54f   :  { %851 = vmax.xlane.f32.xlu1 %v850_v26  ;;  %v70_v26 = vld [vmem:[%s6498_s3 + $0x60] sm:$0xff]  ;;  %v5267_v47 = vadd.f32 %v3903_v59, %v69_v42  ;;  %v72_v59 = vld [vmem:[%s6498_s3 + $0x70] sm:$0xff] }
 0x550   :  { %v853_v7 = vsel %vm825_vm4, %v5225_v12, -inf }
 0x551   :  { %854 = vmax.xlane.f32.xlu0 %v853_v7  ;;  %v838_v7 = vsel %vm825_vm4, %v5253_v49, -inf  ;;  %v859_v42 = vsel %vm825_vm4, %v5267_v47, -inf }
 0x552   :  { %v3906_v57 = vpop.f32.mrb[36].mxu1 }
 0x553   :  { %v794_v48 = vpop.f32.mrb[37].mxu1  ;;  %827 = vmax.xlane.f32.xlu1 %v826_v50 }
 0x554   :  { %v3907_v31 = vpop.f32.mrb[38].mxu1  ;;  %v5274_v50 = vadd.f32 %v794_v48, %v70_v26  ;;  %v73_v48 = vld [vmem:[%s6498_s3 + $0x78] sm:$0xff] }
 0x555   :  { %v797_v0 = vpop.f32.mrb[39].mxu1  ;;  %830 = vmax.xlane.f32.xlu0 %v829_v36  ;;  %v856_v36 = vsel %vm825_vm4, %v5260_v46, -inf }
 0x556   :  { %v862_v26 = vsel %vm825_vm4, %v5274_v50, -inf }
 0x557   :  { %833 = vmax.xlane.f32.xlu1 %v832_v44  ;;  %v5283_v44 = vadd.f32 %v797_v0, %v71_v61  ;;  %v5297_v0 = vadd.f32 %v3907_v31, %v73_v48 }
 0x559   :  { %836 = vmax.xlane.f32.xlu0 %v835_v21  ;;  %v5290_v21 = vadd.f32 %v3906_v57, %v72_v59  ;;  %v865_v61 = vsel %vm825_vm4, %v5283_v44, -inf  ;;  %v871_v48 = vsel %vm825_vm4, %v5297_v0, -inf }
 0x55a   :  { %v3910_v45 = vpop.f32.mrb[40].mxu1 }
 0x55b   :  { %v810_v20 = vpop.f32.mrb[41].mxu1  ;;  %839 = vmax.xlane.f32.xlu1 %v838_v7  ;;  %v74_v7 = vld [vmem:[%s6498_s3 + $0x80] sm:$0xff]  ;;  %v868_v59 = vsel %vm825_vm4, %v5290_v21, -inf }
 0x55c   :  { %v5276_v23 = vpop.f32.mrb[42].mxu1  ;;  %v5304_v57 = vadd.f32 %v810_v20, %v74_v7 }
 0x55d   :  { %v813_v35 = vpop.f32.mrb[43].mxu1  ;;  %857 = vmax.xlane.f32.xlu0 %v856_v36  ;;  %v75_v36 = vld [vmem:[%s6498_s3 + $0x88] sm:$0xff] }
 0x55e   :  { %v5311_v31 = vadd.f32 %v813_v35, %v75_v36  ;;  %v874_v20 = vsel %vm825_vm4, %v5304_v57, -inf }
 0x55f   :  { %860 = vmax.xlane.f32.xlu1 %v859_v42  ;;  %v76_v42 = vld [vmem:[%s6498_s3 + $0x90] sm:$0xff] }
 0x560   :  { %v877_v7 = vsel %vm825_vm4, %v5311_v31, -inf }
 0x561   :  { %863 = vmax.xlane.f32.xlu0 %v862_v26  ;;  %v5315_v26 = vadd.f32 %v3910_v45, %v76_v42 }
 0x563   :  { %866 = vmax.xlane.f32.xlu1 %v865_v61  ;;  %v880_v61 = vsel %vm825_vm4, %v5315_v26, -inf }
 0x565   :  { %869 = vmax.xlane.f32.xlu0 %v868_v59 }
 0x567   :  { %872 = vmax.xlane.f32.xlu1 %v871_v48 }
 0x569   :  { %875 = vmax.xlane.f32.xlu0 %v874_v20 }
 0x56b   :  { %878 = vmax.xlane.f32.xlu1 %v877_v7 }
 0x56d   :  { %881 = vmax.xlane.f32.xlu0 %v880_v61 }
 0x5d3   :  { %v846_v35 = vpop.xlane.xlu1 %845 }
 0x5d4   :  { %v892_v36 = vsub.f32 %v5191_v53, %v846_v35 }
 0x5d6   :  { %v918_v59 = vmul.f32 1.442695, %v892_v36  ;;  %v843_v13 = vpop.xlane.xlu0 %842 }
 0x5d7   :  { %v891_v45 = vsub.f32 %v5201_v51, %v843_v13 }
 0x5d8   :  { %4410 = vpow2.f32 %v918_v59 }
 0x5d9   :  { %v916_v42 = vmul.f32 1.442695, %v891_v45  ;;  %v77_v45 = vld [vmem:[%s6498_s3 + $0x98] sm:$0xff] }
 0x5da   :  { %v849_v48 = vpop.xlane.xlu0 %848 }
 0x5db   :  { %4412 = vpow2.f32 %v916_v42  ;;  %v893_v20 = vsub.f32 %v5203_v15, %v849_v48 }
 0x5dc   :  { %v852_v62 = vpop.xlane.xlu1 %851 }
 0x5dd   :  { %v920_v58 = vmul.f32 1.442695, %v893_v20  ;;  %v894_v7 = vsub.f32 %v5216_v17, %v852_v62 }
 0x5de   :  { %v855_v56 = vpop.xlane.xlu0 %854 }
 0x5df   :  { %4414 = vpow2.f32 %v920_v58  ;;  %v922_v61 = vmul.f32 1.442695, %v894_v7  ;;  %v895_v55 = vsub.f32 %v5225_v12, %v855_v56 }
 0x5e0   :  { %v828_v53 = vpop.xlane.xlu1 %827 }
 0x5e1   :  { %4416 = vpow2.f32 %v922_v61  ;;  %v924_v35 = vmul.f32 1.442695, %v895_v55  ;;  %v886_v13 = vsub.f32 %v5223_v3, %v828_v53  ;;  %v5347_v61 = vadd.f32 %v5276_v23, %v77_v45 }
 0x5e2   :  { %v5329_v51 = vpop.eup %4410  ;;  %v831_v36 = vpop.xlane.xlu0 %830 }
 0x5e3   :  { %4418 = vpow2.f32 %v924_v35  ;;  %v906_v59 = vmul.f32 1.442695, %v886_v13  ;;  %v887_v15 = vsub.f32 %v5232_v5, %v831_v36  ;;  %v964_v62 = vsel %vm825_vm4, %v5329_v51, 0.0 }
 0x5e4   :  { %965 = vadd.xlane.f32.xlu0 %v964_v62  ;;  %v834_v58 = vpop.xlane.xlu1 %833 }
 0x5e5   :  { %v5334_v17 = vpop.eup %4412  ;;  %4420 = vpow2.f32 %v906_v59  ;;  %v908_v56 = vmul.f32 1.442695, %v887_v15  ;;  %v888_v55 = vsub.f32 %v5239_v40, %v834_v58 }
 0x5e6   :  { %v837_v12 = vpop.xlane.xlu0 %836  ;;  %v961_v3 = vsel %vm825_vm4, %v5334_v17, 0.0 }
 0x5e7   :  { %4422 = vpow2.f32 %v908_v56  ;;  %v910_v5 = vmul.f32 1.442695, %v888_v55  ;;  %v889_v42 = vsub.f32 %v5246_v16, %v837_v12  ;;  %962 = vadd.xlane.f32.xlu1 %v961_v3  ;;  %v883_v56 = vsel %vm825_vm4, %v5347_v61, -inf }
 0x5e8   :  { %v840_v48 = vpop.xlane.xlu1 %839 }
 0x5e9   :  { %v5343_v20 = vpop.eup %4414  ;;  %4424 = vpow2.f32 %v910_v5  ;;  %v912_v7 = vmul.f32 1.442695, %v889_v42  ;;  %v890_v40 = vsub.f32 %v5253_v49, %v840_v48 }
 0x5ea   :  { %v858_v53 = vpop.xlane.xlu0 %857  ;;  %v967_v35 = vsel %vm825_vm4, %v5343_v20, 0.0 }
 0x5eb   :  { %v5351_v13 = vpop.eup %4416  ;;  %4426 = vpow2.f32 %v912_v7  ;;  %v914_v36 = vmul.f32 1.442695, %v890_v40  ;;  %v896_v16 = vsub.f32 %v5260_v46, %v858_v53  ;;  %968 = vadd.xlane.f32.xlu1 %v967_v35 }
 0x5ec   :  { %v861_v59 = vpop.xlane.xlu1 %860  ;;  %v970_v15 = vsel %vm825_vm4, %v5351_v13, 0.0 }
 0x5ed   :  { %v5356_v62 = vpop.eup %4418  ;;  %4428 = vpow2.f32 %v914_v36  ;;  %v926_v49 = vmul.f32 1.442695, %v896_v16  ;;  %v897_v23 = vsub.f32 %v5267_v47, %v861_v59  ;;  %971 = vadd.xlane.f32.xlu0 %v970_v15 }
 0x5ee   :  { %v864_v58 = vpop.xlane.xlu0 %863  ;;  %v973_v45 = vsel %vm825_vm4, %v5356_v62, 0.0 }
 0x5ef   :  { %v5361_v55 = vpop.eup %4420  ;;  %4430 = vpow2.f32 %v926_v49  ;;  %v928_v46 = vmul.f32 1.442695, %v897_v23  ;;  %v898_v12 = vsub.f32 %v5274_v50, %v864_v58  ;;  %884 = vmax.xlane.f32.xlu1 %v883_v56 }
 0x5f0   :  { %v867_v3 = vpop.xlane.xlu1 %866  ;;  %v946_v7 = vsel %vm825_vm4, %v5361_v55, 0.0 }
 0x5f1   :  { %v5366_v5 = vpop.eup %4422  ;;  %4432 = vpow2.f32 %v928_v46  ;;  %v930_v47 = vmul.f32 1.442695, %v898_v12  ;;  %v899_v42 = vsub.f32 %v5283_v44, %v867_v3  ;;  %974 = vadd.xlane.f32.xlu0 %v973_v45 }
 0x5f2   :  { %v870_v48 = vpop.xlane.xlu0 %869  ;;  %v949_v36 = vsel %vm825_vm4, %v5366_v5, 0.0 }
 0x5f3   :  { %v5371_v40 = vpop.eup %4424  ;;  %4434 = vpow2.f32 %v930_v47  ;;  %v932_v50 = vmul.f32 1.442695, %v899_v42  ;;  %v900_v53 = vsub.f32 %v5290_v21, %v870_v48  ;;  %947 = vadd.xlane.f32.xlu1 %v946_v7 }
 0x5f4   :  { %v873_v35 = vpop.xlane.xlu1 %872  ;;  %v952_v49 = vsel %vm825_vm4, %v5371_v40, 0.0 }
 0x5f5   :  { %v5376_v16 = vpop.eup %4426  ;;  %4436 = vpow2.f32 %v932_v50  ;;  %v934_v44 = vmul.f32 1.442695, %v900_v53  ;;  %v901_v59 = vsub.f32 %v5297_v0, %v873_v35  ;;  %950 = vadd.xlane.f32.xlu0 %v949_v36 }
 0x5f6   :  { %v876_v15 = vpop.xlane.xlu0 %875  ;;  %v955_v46 = vsel %vm825_vm4, %v5376_v16, 0.0 }
 0x5f7   :  { %v5381_v23 = vpop.eup %4428  ;;  %4438 = vpow2.f32 %v934_v44  ;;  %v936_v21 = vmul.f32 1.442695, %v901_v59  ;;  %v902_v58 = vsub.f32 %v5304_v57, %v876_v15  ;;  %953 = vadd.xlane.f32.xlu1 %v952_v49 }
 0x5f8   :  { %v879_v56 = vpop.xlane.xlu1 %878  ;;  %v958_v47 = vsel %vm825_vm4, %v5381_v23, 0.0 }
 0x5f9   :  { %v5386_v12 = vpop.eup %4430  ;;  %4440 = vpow2.f32 %v936_v21  ;;  %v938_v0 = vmul.f32 1.442695, %v902_v58  ;;  %v903_v3 = vsub.f32 %v5311_v31, %v879_v56  ;;  %956 = vadd.xlane.f32.xlu0 %v955_v46 }
 0x5fa   :  { %v882_v45 = vpop.xlane.xlu0 %881  ;;  %v976_v7 = vsel %vm825_vm4, %v5386_v12, 0.0 }
 0x5fb   :  { %v5391_v42 = vpop.eup %4432  ;;  %4442 = vpow2.f32 %v938_v0  ;;  %v940_v57 = vmul.f32 1.442695, %v903_v3  ;;  %v904_v48 = vsub.f32 %v5315_v26, %v882_v45  ;;  %959 = vadd.xlane.f32.xlu1 %v958_v47 }
 0x5fc   :  { %v979_v31 = vsel %vm825_vm4, %v5391_v42, 0.0 }
 0x5fd   :  { %v5396_v50 = vpop.eup %4434  ;;  %4444 = vpow2.f32 %v940_v57  ;;  %v942_v53 = vmul.f32 1.442695, %v904_v48  ;;  %977 = vadd.xlane.f32.xlu0 %v976_v7 }
 0x5fe   :  { %v982_v36 = vsel %vm825_vm4, %v5396_v50, 0.0 }
 0x5ff   :  { %v5400_v35 = vpop.eup %4436  ;;  %4446 = vpow2.f32 %v942_v53  ;;  %980 = vadd.xlane.f32.xlu1 %v979_v31 }
 0x600   :  { %v985_v44 = vsel %vm825_vm4, %v5400_v35, 0.0 }
 0x601   :  { %v5404_v26 = vpop.eup %4438  ;;  %983 = vadd.xlane.f32.xlu0 %v982_v36 }
 0x602   :  { %v988_v15 = vsel %vm825_vm4, %v5404_v26, 0.0 }
 0x603   :  { %v5408_v59 = vpop.eup %4440  ;;  %986 = vadd.xlane.f32.xlu1 %v985_v44 }
 0x604   :  { %v991_v21 = vsel %vm825_vm4, %v5408_v59, 0.0 }
 0x605   :  { %v5412_v49 = vpop.eup %4442  ;;  %989 = vadd.xlane.f32.xlu0 %v988_v15 }
 0x606   :  { %v994_v56 = vsel %vm825_vm4, %v5412_v49, 0.0 }
 0x607   :  { %v5416_v58 = vpop.eup %4444  ;;  %992 = vadd.xlane.f32.xlu1 %v991_v21 }
 0x608   :  { %v997_v0 = vsel %vm825_vm4, %v5416_v58, 0.0 }
 0x609   :  { %v5420_v46 = vpop.eup %4446  ;;  %995 = vadd.xlane.f32.xlu0 %v994_v56 }
 0x60a   :  { %v1000_v3 = vsel %vm825_vm4, %v5420_v46, 0.0 }
 0x60b   :  { %998 = vadd.xlane.f32.xlu1 %v997_v0 }
 0x60d   :  { %1001 = vadd.xlane.f32.xlu0 %v1000_v3 }
 0x671   :  { %v966_v45 = vpop.xlane.xlu0 %965 }
 0x672   :  { %4448 = vrcp.f32 %v966_v45  ;;  %v1050_v45 = vmul.f32 %v5129_v30, %v5104_v43 }
 0x674   :  { %v963_v47 = vpop.xlane.xlu1 %962 }
 0x675   :  { %4450 = vrcp.f32 %v963_v47 }
 0x678   :  { %v969_v57 = vpop.xlane.xlu1 %968 }
 0x679   :  { %4452 = vrcp.f32 %v969_v57 }
 0x67a   :  { %v972_v48 = vpop.xlane.xlu0 %971 }
 0x67b   :  { %4454 = vrcp.f32 %v972_v48  ;;  %v1056_v48 = vpack.c.bf16 %v1050_v45, %v1050_v45 }
 0x67c   :  { %v885_v7 = vpop.xlane.xlu1 %884  ;;  %v4449_v53 = vpop.eup %4448 }
 0x67d   :  { %v905_v31 = vsub.f32 %v5347_v61, %v885_v7  ;;  %v1032_v21 = vmul.f32 %v4449_v53, %v5329_v51 }
 0x67e   :  { %v975_v36 = vpop.xlane.xlu0 %974 }
 0x67f   :  { %v4451_v44 = vpop.eup %4450  ;;  %v944_v15 = vmul.f32 1.442695, %v905_v31  ;;  %4456 = vrcp.f32 %v975_v36 }
 0x680   :  { %v1031_v56 = vmul.f32 %v4451_v44, %v5334_v17  ;;  %v948_v61 = vpop.xlane.xlu1 %947 }
 0x681   :  { %4458 = vpow2.f32 %v944_v15 }
 0x682   :  { %v1062_v0 = vpack.c.bf16 %v1032_v21, %v1031_v56  ;;  %v951_v51 = vpop.xlane.xlu0 %950  ;;  %v1209_v21 = vmul.f32 %v5129_v30, %v5112_v11  ;;  %v6517_v11 = vpack.c.bf16 %v5098_v9, %v5069_v28 }
 0x683   :  { %v4453_v3 = vpop.eup %4452  ;;  %4460 = vrcp.f32 %v951_v51 }
 0x684   :  { %3919 = vmatmul.mubr.msk.bf16.vlgmr.msra.gmra.mrb[24].mxu0 %vm825_vm4, %v1062_v0  ;;  %v1033_v57 = vmul.f32 %v4453_v3, %v5343_v20  ;;  %4462 = vrcp.f32 %v948_v61  ;;  %v954_v4 = vpop.xlane.xlu1 %953  ;;  %v1215_v45 = vpack.c.bf16 %v1209_v21, %v1209_v21 }
 0x685   :  { %v4455_v47 = vpop.eup %4454  ;;  %3931 = vmatpush3.bf16.msra.mxu0 %v1054_v14  ;;  %3922 = vmatprep.mubr.msk.bf16.mxu0 %vm4711_vm0, %v4710_v1  ;;  %v1147_v14 = vsel %vm1077_vm3, %v1056_v48, 0 }
 0x686   :  { %3932 = vmatprep.subr.bf16.mxu0 %v4710_v1  ;;  %v1034_v17 = vmul.f32 %v4455_v47, %v5351_v13  ;;  %v957_v13 = vpop.xlane.xlu0 %956  ;;  %v4357_v47 = vld [vmem:[%s6504_s9] sm:$0xff]  }
 0x687   :  { %4464 = vrcp.f32 %v957_v13  ;;  %3985 = vmatpush3.bf16.msra.mxu1 %v4357_v47 }
 0x688   :  { %v1063_v29 = vpack.c.bf16 %v1034_v17, %v1033_v57  ;;  %4466 = vrcp.f32 %v954_v4  ;;  %v960_v36 = vpop.xlane.xlu1 %959  ;;  %3986 = vmatprep.subr.bf16.mxu1 %v4710_v1 }
 0x689   :  { %3933 = vmatpush3.bf16.msra.mxu0 %v1055_v34  ;;  %v4457_v43 = vpop.eup %4456  ;;  %4468 = vrcp.f32 %v960_v36 }
 0x68a   :  { %3934 = vmatprep.subr.bf16.mxu0 %v4710_v1  ;;  %v1035_v25 = vmul.f32 %v4457_v43, %v5356_v62  ;;  %v978_v0 = vpop.xlane.xlu0 %977 }
 0x68b   :  { %v5444_v52 = vpop.eup %4458 }
 0x68c   :  { %3923 = vmatmul.mubr.msk.bf16.gmra.mrb[28].mxu0 %vm825_vm4, %v1063_v29  ;;  %v1003_v20 = vsel %vm825_vm4, %v5444_v52, 0.0  ;;  %v1064_v34 = vpack.c.bf16 %v1035_v25, %v1035_v25  ;;  %v1293_v29 = vmul.f32 %v5129_v30, %v5123_v19  ;;  %v6519_v19 = vpack.c.bf16 %v5118_v18, %v5081_v8 }
 0x68d   :  { %3935 = vmatpush3.bf16.msra.mxu0 %v1147_v14  ;;  %1004 = vadd.xlane.f32.xlu1 %v1003_v20  ;;  %v4461_v7 = vpop.eup %4460  ;;  %v6518_v20 = vpack.c.bf16 %v5054_v63, %v5021_v39 }
 0x68e   :  { %3926 = vmatprep.mubr.msk.bf16.mxu0 %vm4711_vm0, %v4710_v1  ;;  %3948 = vmatprep.subr.bf16.mxu0 %v4710_v1  ;;  %v4463_v53 = vpop.eup %4462  ;;  %v1027_v31 = vmul.f32 %v4461_v7, %v5366_v5  ;;  %v981_v5 = vpop.xlane.xlu1 %980  ;;  %v1299_v4 = vpack.c.bf16 %v1293_v29, %v1293_v29 }
 0x68f   :  { %v1026_v44 = vmul.f32 %v4463_v53, %v5361_v55  ;;  %4470 = vrcp.f32 %v981_v5  ;;  %v984_v28 = vpop.xlane.xlu0 %983 }
 0x690   :  { %4472 = vrcp.f32 %v978_v0  ;;  %v1310_v30 = vsel %vm1077_vm3, %v1299_v4, 0 }
 0x691   :  { %v1051_v62 = vpack.c.bf16 %v1027_v31, %v1026_v44  ;;  %v4465_v15 = vpop.eup %4464 }
 0x692   :  { %v4467_v56 = vpop.eup %4466  ;;  %v1029_v55 = vmul.f32 %v4465_v15, %v5376_v16 }
 0x693   :  { %v1028_v3 = vmul.f32 %v4467_v56, %v5371_v40  ;;  %v4469_v54 = vpop.eup %4468  ;;  %v987_v40 = vpop.xlane.xlu1 %986 }
 0x694   :  { %3927 = vmatmul.mubr.msk.bf16.gmra.mrb[32].mxu0 %vm825_vm4, %v1064_v34  ;;  %v1030_v16 = vmul.f32 %v4469_v54, %v5381_v23  ;;  %4474 = vrcp.f32 %v987_v40  ;;  %v990_v61 = vpop.xlane.xlu0 %989 }
 0x695   :  { %3936 = vmatprep.mubr.msk.bf16.mxu0 %vm4711_vm0, %v4710_v1  ;;  %v1052_v38 = vpack.c.bf16 %v1029_v55, %v1028_v3  ;;  %4476 = vrcp.f32 %v984_v28 }
 0x696   :  { %v1053_v9 = vpack.c.bf16 %v1030_v16, %v1030_v16  ;;  %4478 = vrcp.f32 %v990_v61 }
 0x697   :  { %v993_v13 = vpop.xlane.xlu1 %992 }
 0x699   :  { %v4471_v51 = vpop.eup %4470 }
 0x69a   :  { %v4473_v17 = vpop.eup %4472  ;;  %v1037_v23 = vmul.f32 %v4471_v51, %v5391_v42  ;;  %v996_v42 = vpop.xlane.xlu0 %995  ;;  %v5543_v51 = vld [vmem:[%s6500_s5 + $0x8] sm:$0xff] }
 0x69b   :  { %v1036_v57 = vmul.f32 %v4473_v17, %v5386_v12  ;;  %4480 = vrcp.f32 %v996_v42  ;;  %v999_v8 = vpop.xlane.xlu1 %998  ;;  %v1465_v17 = vrot.slane %v5543_v51, %v4867_v10 }
 0x69c   :  { %3937 = vmatmul.mubr.msk.bf16.vlgmr.msra.gmra.mrb[24].mxu0 %vm825_vm4, %v1051_v62  ;;  %4482 = vrcp.f32 %v993_v13 }
 0x69d   :  { %3949 = vmatpush3.bf16.msra.mxu0 %v1213_v60  ;;  %3940 = vmatprep.mubr.msk.bf16.mxu0 %vm4711_vm0, %v4710_v1  ;;  %v1226_v60 = vsel %vm1077_vm3, %v1215_v45, 0  ;;  %v1210_v48 = vpack.c.bf16 %v1037_v23, %v1036_v57 }
 0x69e   :  { %3950 = vmatprep.subr.bf16.mxu0 %v4710_v1  ;;  %v4475_v43 = vpop.eup %4474 }
 0x69f   :  { %v4477_v14 = vpop.eup %4476  ;;  %v1039_v12 = vmul.f32 %v4475_v43, %v5400_v35 }
 0x6a0   :  { %v1038_v25 = vmul.f32 %v4477_v14, %v5396_v50  ;;  %v4479_v63 = vpop.eup %4478  ;;  %v1002_v50 = vpop.xlane.xlu0 %1001 }
 0x6a1   :  { %3951 = vmatpush3.bf16.msra.mxu0 %v6517_v11  ;;  %v1040_v35 = vmul.f32 %v4479_v63, %v5404_v26  ;;  %4484 = vrcp.f32 %v1002_v50 }
 0x6a2   :  { %3952 = vmatprep.subr.bf16.mxu0 %v4710_v1  ;;  %v1211_v39 = vpack.c.bf16 %v1039_v12, %v1038_v25  ;;  %4486 = vrcp.f32 %v999_v8 }
 0x6a3   :  { %v1212_v18 = vpack.c.bf16 %v1040_v35, %v1040_v35 }
 0x6a4   :  { %3941 = vmatmul.mubr.msk.bf16.gmra.mrb[28].mxu0 %vm825_vm4, %v1052_v38 }
 0x6a5   :  { %3953 = vmatpush3.bf16.msra.mxu0 %v1226_v60  ;;  %3944 = vmatprep.mubr.msk.bf16.mxu0 %vm4711_vm0, %v4710_v1  ;;  %v4481_v34 = vpop.eup %4480 }
 0x6a6   :  { %3966 = vmatprep.subr.bf16.mxu0 %v4710_v1  ;;  %v4483_v7 = vpop.eup %4482  ;;  %v1042_v53 = vmul.f32 %v4481_v34, %v5412_v49 }
 0x6a7   :  { %v1041_v31 = vmul.f32 %v4483_v7, %v5408_v59  ;;  %v4358_v59 = vld [vmem:[%s6504_s9 + $0x8] sm:$0xff]  }
 0x6a8   :  { %3987 = vmatpush3.bf16.msra.mxu1 %v4358_v59 }
 0x6a9   :  { %v1294_v36 = vpack.c.bf16 %v1042_v53, %v1041_v31  ;;  %4000 = vmatprep.subr.bf16.mxu1 %v4710_v1 }
 0x6ab   :  { %v4485_v44 = vpop.eup %4484 }
 0x6ac   :  { %3945 = vmatmul.mubr.msk.bf16.gmra.mrb[32].mxu0 %vm825_vm4, %v1053_v9  ;;  %v4487_v26 = vpop.eup %4486  ;;  %v1044_v62 = vmul.f32 %v4485_v44, %v5420_v46 }
 0x6ad   :  { %3954 = vmatprep.mubr.msk.bf16.mxu0 %vm4711_vm0, %v4710_v1  ;;  %v1043_v15 = vmul.f32 %v4487_v26, %v5416_v58 }
 0x6af   :  { %v1295_v21 = vpack.c.bf16 %v1044_v62, %v1043_v15 }
 0x6b4   :  { %3955 = vmatmul.mubr.msk.bf16.vlgmr.msra.gmra.mrb[24].mxu0 %vm825_vm4, %v1210_v48 }
 0x6b5   :  { %3967 = vmatpush3.bf16.msra.mxu0 %v6518_v20  ;;  %3958 = vmatprep.mubr.msk.bf16.mxu0 %vm4711_vm0, %v4710_v1 }
 0x6b6   :  { %3968 = vmatprep.subr.bf16.mxu0 %v4710_v1 }
 0x6b9   :  { %3969 = vmatpush3.bf16.msra.mxu0 %v6519_v19 }
 0x6ba   :  { %3970 = vmatprep.subr.bf16.mxu0 %v4710_v1 }
 0x6bc   :  { %3959 = vmatmul.mubr.msk.bf16.gmra.mrb[28].mxu0 %vm825_vm4, %v1211_v39 }
 0x6bd   :  { %3971 = vmatpush3.bf16.msra.mxu0 %v1310_v30  ;;  %3962 = vmatprep.mubr.msk.bf16.mxu0 %vm4711_vm0, %v4710_v1 }
 0x6be   :  { %4044 = vmatprep.subr.bf16.mxu0 %v4710_v1 }
 0x6c4   :  { %3963 = vmatmul.mubr.msk.bf16.gmra.mrb[32].mxu0 %vm825_vm4, %v1212_v18 }
 0x6c5   :  { %3972 = vmatprep.mubr.msk.bf16.mxu0 %vm4711_vm0, %v4710_v1 }
 0x6cc   :  { %3973 = vmatmul.mubr.msk.bf16.vlgmr.msra.gmra.mrb[24].mxu0 %vm825_vm4, %v1294_v36 }
 0x6cd   :  { %3976 = vmatprep.mubr.msk.bf16.mxu0 %vm4711_vm0, %v4710_v1 }
 0x6d4   :  { %3977 = vmatmul.mubr.msk.bf16.gmra.mrb[28].mxu0 %vm825_vm4, %v1295_v21 }
 0x6d5   :  { %3980 = vmatprep.mubr.msk.bf16.mxu0 %vm4711_vm0, %v4710_v1 }
 0x71a   :  { %v1005_v49 = vpop.xlane.xlu1 %1004 }
 0x71b   :  { %4488 = vrcp.f32 %v1005_v49 }
 0x725   :  { %v4489_v56 = vpop.eup %4488 }
 0x726   :  { %v1045_v46 = vmul.f32 %v4489_v56, %v5444_v52 }
 0x728   :  { %v1296_v5 = vpack.c.bf16 %v1045_v46, %v1045_v46 }
 0x72a   :  { %3981 = vmatmul.mubr.msk.bf16.gmra.mrb[32].mxu0 %vm825_vm4, %v1296_v5 }
 0x72b   :  { %4048 = vmatprep.mubr.msk.bf16.mxu0 %vm4711_vm0, %v4710_v1 }
 0x79f   :  { %v1346_v58 = vpop.f32.mrb[24].mxu0 }
 0x7a0   :  { %v3974_v55 = vpop.f32.mrb[25].mxu0 }
 0x7a1   :  { %v1349_v0 = vpop.f32.mrb[26].mxu0 }
 0x7a2   :  { %v1373_v3 = vpack.c.bf16 %v1349_v0, %v1346_v58  ;;  %v3975_v45 = vpop.f32.mrb[27].mxu0 }
 0x7a4   :  { %3989 = vmatmul.mubr.msk.bf16.vlgmr.msra.gmra.mrb[44].mxu1 %vm212_vm2, %v1373_v3 }
 0x7a5   :  { %3992 = vmatprep.mubr.msk.bf16.mxu1 %vm4711_vm0, %v4710_v1 }
 0x7a7   :  { %v1354_v11 = vpop.f32.mrb[28].mxu0 }
 0x7a8   :  { %v3978_v38 = vpop.f32.mrb[29].mxu0 }
 0x7a9   :  { %v1357_v54 = vpop.f32.mrb[30].mxu0  ;;  %v4359_v38 = vld [vmem:[%s6505_s10] sm:$0xff]  }
 0x7aa   :  { %v1374_v52 = vpack.c.bf16 %v1357_v54, %v1354_v11  ;;  %v3979_v60 = vpop.f32.mrb[31].mxu0  ;;  %4001 = vmatpush3.bf16.msra.mxu1 %v4359_v38  ;;  %v4360_v54 = vld [vmem:[%s6505_s10 + $0x8] sm:$0xff]   ;;  %v4364_v38 = vld [vmem:[%s6507_s12 + $0x18] sm:$0xff]  }
 0x7ab   :  { %4002 = vmatprep.subr.bf16.mxu1 %v4710_v1 }
 0x7ac   :  { %3993 = vmatmul.mubr.msk.bf16.gmra.mrb[48].mxu1 %vm212_vm2, %v1374_v52 }
 0x7ad   :  { %3996 = vmatprep.mubr.msk.bf16.mxu1 %vm4711_vm0, %v4710_v1 }
 0x7ae   :  { %4003 = vmatpush3.bf16.msra.mxu1 %v4360_v54  ;;  %v4365_v54 = vld [vmem:[%s6507_s12 + $0x20] sm:$0xff]  }
 0x7af   :  { %4016 = vmatprep.subr.bf16.mxu1 %v4710_v1 }
 0x7fd   :  { %v1362_v40 = vpop.f32.mrb[32].mxu0 }
 0x7fe   :  { %v1375_v16 = vpack.c.bf16 %v1362_v40, %v1362_v40  ;;  %v3982_v28 = vpop.f32.mrb[33].mxu0 }
 0x7ff   :  { %v1365_v9 = vpop.f32.mrb[34].mxu0 }
 0x800   :  { %v3983_v47 = vpop.f32.mrb[35].mxu0  ;;  %3997 = vmatmul.mubr.msk.bf16.gmra.mrb[52].mxu1 %vm212_vm2, %v1375_v16 }
 0x801   :  { %4004 = vmatprep.mubr.msk.bf16.mxu1 %vm4711_vm0, %v4710_v1 }
 0x877   :  { %v1435_v23 = vpop.f32.mrb[44].mxu1 }
 0x878   :  { %v1457_v61 = vadd.f32 %v1435_v23, %v4873_v22  ;;  %v3990_v57 = vpop.f32.mrb[45].mxu1 }
 0x879   :  { %v1438_v48 = vpop.f32.mrb[46].mxu1 }
 0x87a   :  { %v5548_v43 = vadd.f32 %v1465_v17, %v1457_v61  ;;  %v1458_v29 = vadd.f32 %v1438_v48, %v4877_v27  ;;  %v3991_v14 = vpop.f32.mrb[47].mxu1 }
 0x87b   :  { %v5591_v14 = vsub.s32 2, %v4856_v2 }
 0x87c   :  { %v5551_v20 = vadd.f32 %v1465_v17, %v1458_v29  ;;  %v1471_v42 = vsel %vm212_vm2, %v5548_v43, 0.0 }
 0x87d   :  { %1472 = vadd.xlane.f32.xlu0 %v1471_v42 }
 0x87e   :  { %v1474_v12 = vsel %vm212_vm2, %v5551_v20, 0.0 }
 0x87f   :  { %1475 = vadd.xlane.f32.xlu1 %v1474_v12  ;;  %v1443_v13 = vpop.f32.mrb[48].mxu1 }
 0x880   :  { %v1459_v22 = vadd.f32 %v1443_v13, %v4881_v32  ;;  %v3994_v25 = vpop.f32.mrb[49].mxu1 }
 0x881   :  { %v1446_v4 = vpop.f32.mrb[50].mxu1  ;;  %v1539_v25 = vrot.slane %v5543_v51, %v5591_v14 }
 0x882   :  { %v5558_v19 = vadd.f32 %v1465_v17, %v1459_v22  ;;  %v1460_v27 = vadd.f32 %v1446_v4, %v4885_v37  ;;  %v3995_v39 = vpop.f32.mrb[51].mxu1  ;;  %v5596_v4 = vsub.s32 3, %v4856_v2 }
 0x884   :  { %v5561_v63 = vadd.f32 %v1465_v17, %v1460_v27  ;;  %v1477_v30 = vsel %vm212_vm2, %v5558_v19, 0.0 }
 0x885   :  { %1478 = vadd.xlane.f32.xlu0 %v1477_v30 }
 0x886   :  { %v1480_v50 = vsel %vm212_vm2, %v5561_v63, 0.0 }
 0x887   :  { %1481 = vadd.xlane.f32.xlu1 %v1480_v50  ;;  %v1548_v50 = vrot.slane %v5543_v51, %v5596_v4 }
 0x8d3   :  { %v1451_v35 = vpop.f32.mrb[52].mxu1 }
 0x8d4   :  { %v1461_v32 = vadd.f32 %v1451_v35, %v4889_v41  ;;  %v3998_v8 = vpop.f32.mrb[53].mxu1 }
 0x8d5   :  { %v1454_v18 = vpop.f32.mrb[54].mxu1 }
 0x8d6   :  { %v5568_v34 = vadd.f32 %v1465_v17, %v1461_v32  ;;  %v3999_v7 = vpop.f32.mrb[55].mxu1 }
 0x8d8   :  { %v1483_v37 = vsel %vm212_vm2, %v5568_v34, 0.0 }
 0x8d9   :  { %1484 = vadd.xlane.f32.xlu0 %v1483_v37 }
 0x90a   :  { %v1473_v53 = vpop.xlane.xlu0 %1472 }
 0x90b   :  { %v1486_v31 = vmul.f32 0.03125, %v1473_v53 }
 0x90c   :  { %v1476_v36 = vpop.xlane.xlu1 %1475 }
 0x90d   :  { %v1491_v44 = vsub.f32 %v5548_v43, %v1486_v31  ;;  %v1487_v26 = vmul.f32 0.03125, %v1476_v36 }
 0x90f   :  { %v1492_v62 = vsub.f32 %v5551_v20, %v1487_v26  ;;  %v1496_v15 = vmul.f32 %v1491_v44, %v1491_v44 }
 0x911   :  { %v1501_v41 = vsel %vm212_vm2, %v1496_v15, 0.0  ;;  %v1497_v21 = vmul.f32 %v1492_v62, %v1492_v62 }
 0x912   :  { %v1479_v49 = vpop.xlane.xlu0 %1478  ;;  %1502 = vadd.xlane.f32.xlu1 %v1501_v41 }
 0x913   :  { %v1488_v59 = vmul.f32 0.03125, %v1479_v49  ;;  %v1504_v56 = vsel %vm212_vm2, %v1497_v21, 0.0 }
 0x914   :  { %1505 = vadd.xlane.f32.xlu0 %v1504_v56  ;;  %v1482_v46 = vpop.xlane.xlu1 %1481 }
 0x915   :  { %v1493_v5 = vsub.f32 %v5558_v19, %v1488_v59  ;;  %v1489_v58 = vmul.f32 0.03125, %v1482_v46 }
 0x917   :  { %v1494_v55 = vsub.f32 %v5561_v63, %v1489_v58  ;;  %v1498_v0 = vmul.f32 %v1493_v5, %v1493_v5 }
 0x919   :  { %v1507_v3 = vsel %vm212_vm2, %v1498_v0, 0.0  ;;  %v1499_v45 = vmul.f32 %v1494_v55, %v1494_v55 }
 0x91a   :  { %1508 = vadd.xlane.f32.xlu1 %v1507_v3  ;;  %v4361_v3 = vld [vmem:[%s6507_s12] sm:$0xff]  }
 0x91b   :  { %v1510_v11 = vsel %vm212_vm2, %v1499_v45, 0.0  ;;  %v4362_v45 = vld [vmem:[%s6507_s12 + $0x8] sm:$0xff]  }
 0x91c   :  { %1511 = vadd.xlane.f32.xlu0 %v1510_v11  ;;  %v4363_v11 = vld [vmem:[%s6507_s12 + $0x10] sm:$0xff]  }
 0x966   :  { %v1485_v52 = vpop.xlane.xlu0 %1484 }
 0x967   :  { %v1490_v60 = vmul.f32 0.03125, %v1485_v52  ;;  %v4366_v52 = vld [vmem:[%s6507_s12 + $0x28] sm:$0xff]  }
 0x969   :  { %v1495_v40 = vsub.f32 %v5568_v34, %v1490_v60  ;;  %v4367_v60 = vld [vmem:[%s6507_s12 + $0x30] sm:$0xff]  }
 0x96b   :  { %v1500_v16 = vmul.f32 %v1495_v40, %v1495_v40 }
 0x96d   :  { %v1513_v28 = vsel %vm212_vm2, %v1500_v16, 0.0  ;;  %v98_v16 = vld [vmem:[%s6506_s11] sm:$0x3] }
 0x96e   :  { %1514 = vadd.xlane.f32.xlu1 %v1513_v28  ;;  %v1564_v28 = vrot.slane %v98_v16, %v4859_v6 }
 0x99f   :  { %v1503_v9 = vpop.xlane.xlu1 %1502 }
 0x9a0   :  { %v1516_v47 = vmul.f32 0.03125, %v1503_v9 }
 0x9a1   :  { %v1506_v17 = vpop.xlane.xlu0 %1505 }
 0x9a2   :  { %v1521_v23 = vadd.f32 1e-05, %v1516_v47  ;;  %v1517_v61 = vmul.f32 0.03125, %v1506_v17 }
 0x9a4   :  { %4490 = vrsqrt.f32 %v1521_v23  ;;  %v1522_v57 = vadd.f32 1e-05, %v1517_v61 }
 0x9a6   :  { %4492 = vrsqrt.f32 %v1522_v57 }
 0x9a7   :  { %v1509_v48 = vpop.xlane.xlu1 %1508 }
 0x9a8   :  { %v1518_v29 = vmul.f32 0.03125, %v1509_v48 }
 0x9a9   :  { %v1512_v42 = vpop.xlane.xlu0 %1511 }
 0x9aa   :  { %v1523_v12 = vadd.f32 1e-05, %v1518_v29  ;;  %v1519_v13 = vmul.f32 0.03125, %v1512_v42 }
 0x9ac   :  { %4494 = vrsqrt.f32 %v1523_v12  ;;  %v1524_v22 = vadd.f32 1e-05, %v1519_v13 }
 0x9ae   :  { %v4491_v27 = vpop.eup %4490  ;;  %4496 = vrsqrt.f32 %v1524_v22 }
 0x9af   :  { %v1531_v39 = vmul.f32 %v4491_v27, %v1491_v44 }
 0x9b0   :  { %v4493_v30 = vpop.eup %4492 }
 0x9b1   :  { %v1540_v35 = vmul.f32 %v1539_v25, %v1531_v39  ;;  %v1532_v32 = vmul.f32 %v4493_v30, %v1492_v62 }
 0x9b3   :  { %v1541_v8 = vmul.f32 %v1539_v25, %v1532_v32  ;;  %v1549_v18 = vadd.f32 %v1548_v50, %v1540_v35 }
 0x9b5   :  { %v1550_v7 = vadd.f32 %v1548_v50, %v1541_v8 }
 0x9b6   :  { %v4495_v37 = vpop.eup %4494 }
 0x9b7   :  { %v1533_v53 = vmul.f32 %v4495_v37, %v1493_v5  ;;  %v1554_v31 = vpack.c.bf16 %v1550_v7, %v1549_v18 }
 0x9b8   :  { %v4497_v36 = vpop.eup %4496 }
 0x9b9   :  { %v1534_v26 = vmul.f32 %v4497_v36, %v1494_v55  ;;  %4005 = vmatmul.mubr.msk.bf16.vlgmr.msra.gmra.mrb[56].mxu1 %vm212_vm2, %v1554_v31  ;;  %v1542_v15 = vmul.f32 %v1539_v25, %v1533_v53 }
 0x9ba   :  { %4008 = vmatprep.mubr.msk.bf16.mxu1 %vm4711_vm0, %v4710_v1  ;;  %4017 = vmatpush3.bf16.msra.mxu1 %v4361_v3 }
 0x9bb   :  { %v1543_v44 = vmul.f32 %v1539_v25, %v1534_v26  ;;  %v1551_v41 = vadd.f32 %v1548_v50, %v1542_v15  ;;  %4018 = vmatprep.subr.bf16.mxu1 %v4710_v1 }
 0x9bd   :  { %v1552_v21 = vadd.f32 %v1548_v50, %v1543_v44 }
 0x9be   :  { %4019 = vmatpush3.bf16.msra.mxu1 %v4362_v45 }
 0x9bf   :  { %v1555_v49 = vpack.c.bf16 %v1552_v21, %v1551_v41  ;;  %4020 = vmatprep.subr.bf16.mxu1 %v4710_v1 }
 0x9c1   :  { %4009 = vmatmul.mubr.msk.bf16.gmra.mrb[60].mxu1 %vm212_vm2, %v1555_v49 }
 0x9c2   :  { %4012 = vmatprep.mubr.msk.bf16.mxu1 %vm4711_vm0, %v4710_v1  ;;  %4021 = vmatpush3.bf16.msra.mxu1 %v4363_v11 }
 0x9c3   :  { %4022 = vmatprep.subr.bf16.mxu1 %v4710_v1 }
 0x9c6   :  { %4023 = vmatpush3.bf16.msra.mxu1 %v4364_v38 }
 0x9c7   :  { %4024 = vmatprep.subr.bf16.mxu1 %v4710_v1 }
 0x9ca   :  { %4025 = vmatpush3.bf16.msra.mxu1 %v4365_v54 }
 0x9cb   :  { %4026 = vmatprep.subr.bf16.mxu1 %v4710_v1 }
 0x9ce   :  { %4027 = vmatpush3.bf16.msra.mxu1 %v4366_v52 }
 0x9cf   :  { %4028 = vmatprep.subr.bf16.mxu1 %v4710_v1 }
 0x9d2   :  { %4029 = vmatpush3.bf16.msra.mxu1 %v4367_v60 }
 0x9d3   :  { %4030 = vmatprep.subr.bf16.mxu1 %v4710_v1 }
 0x9fb   :  { %v1515_v62 = vpop.xlane.xlu1 %1514 }
 0x9fc   :  { %v1520_v59 = vmul.f32 0.03125, %v1515_v62 }
 0x9fe   :  { %v1525_v56 = vadd.f32 1e-05, %v1520_v59 }
 0xa00   :  { %4498 = vrsqrt.f32 %v1525_v56 }
 0xa0a   :  { %v4499_v46 = vpop.eup %4498 }
 0xa0b   :  { %v1535_v5 = vmul.f32 %v4499_v46, %v1495_v40  ;;  %v4368_v40 = vld [vmem:[%s6507_s12 + $0x38] sm:$0xff]  }
 0xa0c   :  { %4031 = vmatpush3.bf16.msra.mxu1 %v4368_v40 }
 0xa0d   :  { %v1544_v58 = vmul.f32 %v1539_v25, %v1535_v5  ;;  %4060 = vmatprep.subr.bf16.mxu1 %v4710_v1 }
 0xa0f   :  { %v1553_v55 = vadd.f32 %v1548_v50, %v1544_v58 }
 0xa11   :  { %v1556_v0 = vpack.c.bf16 %v1553_v55, %v1553_v55 }
 0xa13   :  { %4013 = vmatmul.mubr.msk.bf16.gmra.mrb[64].mxu1 %vm212_vm2, %v1556_v0 }
 0xa14   :  { %4032 = vmatprep.mubr.msk.bf16.mxu1 %vm4711_vm0, %v4710_v1 }
 0xa8c   :  { %v1620_v9 = vpop.f32.mrb[56].mxu1 }
 0xa8d   :  { %v1621_v47 = vadd.f32 %v1620_v9, %v1564_v28  ;;  %v4006_v17 = vpop.f32.mrb[57].mxu1 }
 0xa8e   :  { %v1623_v23 = vpop.f32.mrb[58].mxu1 }
 0xa8f   :  { %v3548_v61 = vmul.f32 -1.702, %v1621_v47  ;;  %v1624_v57 = vadd.f32 %v1623_v23, %v1564_v28  ;;  %v4007_v48 = vpop.f32.mrb[59].mxu1 }
 0xa91   :  { %v1652_v29 = vmul.f32 1.442695, %v3548_v61  ;;  %v3549_v42 = vmul.f32 -1.702, %v1624_v57 }
 0xa93   :  { %4500 = vpow2.f32 %v1652_v29  ;;  %v1654_v12 = vmul.f32 1.442695, %v3549_v42 }
 0xa94   :  { %v1628_v13 = vpop.f32.mrb[60].mxu1 }
 0xa95   :  { %4502 = vpow2.f32 %v1654_v12  ;;  %v1629_v22 = vadd.f32 %v1628_v13, %v1564_v28  ;;  %v4010_v25 = vpop.f32.mrb[61].mxu1 }
 0xa96   :  { %v1631_v27 = vpop.f32.mrb[62].mxu1 }
 0xa97   :  { %v3550_v39 = vmul.f32 -1.702, %v1629_v22  ;;  %v1632_v30 = vadd.f32 %v1631_v27, %v1564_v28  ;;  %v4011_v50 = vpop.f32.mrb[63].mxu1 }
 0xa99   :  { %v1656_v35 = vmul.f32 1.442695, %v3550_v39  ;;  %v3551_v32 = vmul.f32 -1.702, %v1632_v30 }
 0xa9b   :  { %4504 = vpow2.f32 %v1656_v35  ;;  %v1658_v8 = vmul.f32 1.442695, %v3551_v32 }
 0xa9d   :  { %v4501_v18 = vpop.eup %4500  ;;  %4506 = vpow2.f32 %v1658_v8 }
 0xa9e   :  { %v1662_v7 = vadd.f32 1.0, %v4501_v18 }
 0xa9f   :  { %v4503_v37 = vpop.eup %4502 }
 0xaa0   :  { %4508 = vrcp.f32 %v1662_v7  ;;  %v1663_v53 = vadd.f32 1.0, %v4503_v37 }
 0xaa2   :  { %4510 = vrcp.f32 %v1663_v53 }
 0xaa5   :  { %v4505_v31 = vpop.eup %4504 }
 0xaa6   :  { %v1664_v36 = vadd.f32 1.0, %v4505_v31 }
 0xaa7   :  { %v4507_v26 = vpop.eup %4506 }
 0xaa8   :  { %4512 = vrcp.f32 %v1664_v36  ;;  %v1665_v15 = vadd.f32 1.0, %v4507_v26 }
 0xaaa   :  { %v4509_v44 = vpop.eup %4508  ;;  %4514 = vrcp.f32 %v1665_v15 }
 0xaab   :  { %v1677_v21 = vmul.f32 %v4509_v44, %v1621_v47  ;;  %v1813_v47 = vrot.slane %v5543_v51, %v4932_v24 }
 0xaac   :  { %v4511_v41 = vpop.eup %4510 }
 0xaad   :  { %v1678_v49 = vmul.f32 %v4511_v41, %v1624_v57 }
 0xaaf   :  { %v1682_v62 = vpack.c.bf16 %v1678_v49, %v1677_v21 }
 0xab1   :  { %4033 = vmatmul.mubr.bf16.vlgmr.msra.gmra.mrb[68].mxu1 %v1682_v62 }
 0xab2   :  { %v4513_v59 = vpop.eup %4512  ;;  %4036 = vmatprep.mubr.msk.bf16.mxu1 %vm4711_vm0, %v4710_v1 }
 0xab3   :  { %v1679_v46 = vmul.f32 %v4513_v59, %v1629_v22 }
 0xab4   :  { %v4515_v56 = vpop.eup %4514 }
 0xab5   :  { %v1680_v5 = vmul.f32 %v4515_v56, %v1632_v30 }
 0xab7   :  { %v1683_v58 = vpack.c.bf16 %v1680_v5, %v1679_v46 }
 0xab9   :  { %4037 = vmatmul.mubr.bf16.gmra.mrb[72].mxu1 %v1683_v58 }
 0xaba   :  { %4040 = vmatprep.mubr.msk.bf16.mxu1 %vm4711_vm0, %v4710_v1 }
 0xae6   :  { %v1636_v55 = vpop.f32.mrb[64].mxu1 }
 0xae7   :  { %v1637_v0 = vadd.f32 %v1636_v55, %v1564_v28  ;;  %v4014_v3 = vpop.f32.mrb[65].mxu1 }
 0xae8   :  { %v1639_v45 = vpop.f32.mrb[66].mxu1 }
 0xae9   :  { %v3552_v11 = vmul.f32 -1.702, %v1637_v0  ;;  %v4015_v38 = vpop.f32.mrb[67].mxu1 }
 0xaea   :  { %v4369_v38 = vld [vmem:[%s6501_s6 + $0x10] sm:$0xff]  }
 0xaeb   :  { %v1660_v54 = vmul.f32 1.442695, %v3552_v11  ;;  %4045 = vmatpush3.bf16.msra.mxu0 %v4369_v38 }
 0xaec   :  { %4046 = vmatprep.subr.bf16.mxu0 %v4710_v1 }
 0xaed   :  { %4516 = vpow2.f32 %v1660_v54  ;;  %v4370_v54 = vld [vmem:[%s6502_s7 + $0x10] sm:$0xff]  }
 0xaee   :  { %4061 = vmatpush3.bf16.msra.mxu1 %v4370_v54 }
 0xaef   :  { %4062 = vmatprep.subr.bf16.mxu1 %v4710_v1 }
 0xaf7   :  { %v4517_v52 = vpop.eup %4516 }
 0xaf8   :  { %v1666_v60 = vadd.f32 1.0, %v4517_v52  ;;  %v4371_v52 = vld [vmem:[%s6501_s6 + $0x18] sm:$0xff]  }
 0xaf9   :  { %4047 = vmatpush3.bf16.msra.mxu0 %v4371_v52  ;;  %v6521_v52 = vsub.s32 7, %v4856_v2 }
 0xafa   :  { %4518 = vrcp.f32 %v1666_v60  ;;  %v4372_v60 = vld [vmem:[%s6502_s7 + $0x18] sm:$0xff]   ;;  %4076 = vmatprep.subr.bf16.mxu0 %v4710_v1 }
 0xafb   :  { %4063 = vmatpush3.bf16.msra.mxu1 %v4372_v60  ;;  %v5744_v60 = vrot.slane %v5543_v51, %v6521_v52 }
 0xb04   :  { %v4519_v40 = vpop.eup %4518 }
 0xb05   :  { %v1681_v16 = vmul.f32 %v4519_v40, %v1637_v0 }
 0xb07   :  { %v1684_v9 = vpack.c.bf16 %v1681_v16, %v1681_v16 }
 0xb09   :  { %4041 = vmatmul.mubr.bf16.gmra.mrb[76].mxu1 %v1684_v9 }
 0xb0a   :  { %4064 = vmatprep.mubr.msk.bf16.mxu1 %vm4711_vm0, %v4710_v1 }
 0xb84   :  { %v1783_v28 = vpop.f32.mrb[68].mxu1 }
 0xb85   :  { %v1805_v17 = vadd.f32 %v1783_v28, %v5548_v43  ;;  %v4034_v23 = vpop.f32.mrb[69].mxu1 }
 0xb86   :  { %v1786_v61 = vpop.f32.mrb[70].mxu1 }
 0xb87   :  { %v5654_v57 = vadd.f32 %v1813_v47, %v1805_v17  ;;  %v1806_v48 = vadd.f32 %v1786_v61, %v5551_v20  ;;  %v4035_v29 = vpop.f32.mrb[71].mxu1 }
 0xb89   :  { %v5657_v42 = vadd.f32 %v1813_v47, %v1806_v48  ;;  %v1819_v12 = vsel %vm212_vm2, %v5654_v57, 0.0 }
 0xb8a   :  { %1820 = vadd.xlane.f32.xlu0 %v1819_v12 }
 0xb8b   :  { %v1822_v13 = vsel %vm212_vm2, %v5657_v42, 0.0 }
 0xb8c   :  { %1823 = vadd.xlane.f32.xlu1 %v1822_v13  ;;  %v1791_v22 = vpop.f32.mrb[72].mxu1 }
 0xb8d   :  { %v1807_v43 = vadd.f32 %v1791_v22, %v5558_v19  ;;  %v4038_v25 = vpop.f32.mrb[73].mxu1 }
 0xb8e   :  { %v1794_v27 = vpop.f32.mrb[74].mxu1 }
 0xb8f   :  { %v5664_v39 = vadd.f32 %v1813_v47, %v1807_v43  ;;  %v1808_v20 = vadd.f32 %v1794_v27, %v5561_v63  ;;  %v4039_v30 = vpop.f32.mrb[75].mxu1 }
 0xb90   :  { %v1887_v30 = vrot.slane %v5543_v51, %v4937_v33 }
 0xb91   :  { %v5667_v50 = vadd.f32 %v1813_v47, %v1808_v20  ;;  %v1825_v35 = vsel %vm212_vm2, %v5664_v39, 0.0 }
 0xb92   :  { %1826 = vadd.xlane.f32.xlu0 %v1825_v35 }
 0xb93   :  { %v1828_v32 = vsel %vm212_vm2, %v5667_v50, 0.0 }
 0xb94   :  { %1829 = vadd.xlane.f32.xlu1 %v1828_v32 }
 0xbdc   :  { %v1799_v8 = vpop.f32.mrb[76].mxu1 }
 0xbdd   :  { %v1809_v19 = vadd.f32 %v1799_v8, %v5568_v34  ;;  %v4042_v18 = vpop.f32.mrb[77].mxu1 }
 0xbde   :  { %v1802_v7 = vpop.f32.mrb[78].mxu1 }
 0xbdf   :  { %v5674_v37 = vadd.f32 %v1813_v47, %v1809_v19  ;;  %v4043_v53 = vpop.f32.mrb[79].mxu1  ;;  %v6520_v19 = vsub.s32 6, %v4856_v2 }
 0xbe1   :  { %v1831_v63 = vsel %vm212_vm2, %v5674_v37, 0.0  ;;  %v1896_v18 = vrot.slane %v5543_v51, %v6520_v19  ;;  %v5761_v51 = vld [vmem:[%s6499_s4] sm:$0xff] }
 0xbe2   :  { %1832 = vadd.xlane.f32.xlu0 %v1831_v63 }
 0xc17   :  { %v1821_v31 = vpop.xlane.xlu0 %1820 }
 0xc18   :  { %v1834_v36 = vmul.f32 0.03125, %v1821_v31 }
 0xc19   :  { %v1824_v26 = vpop.xlane.xlu1 %1823 }
 0xc1a   :  { %v1839_v15 = vsub.f32 %v5654_v57, %v1834_v36  ;;  %v1835_v44 = vmul.f32 0.03125, %v1824_v26 }
 0xc1c   :  { %v1840_v41 = vsub.f32 %v5657_v42, %v1835_v44  ;;  %v1844_v21 = vmul.f32 %v1839_v15, %v1839_v15 }
 0xc1e   :  { %v1849_v34 = vsel %vm212_vm2, %v1844_v21, 0.0  ;;  %v1845_v49 = vmul.f32 %v1840_v41, %v1840_v41 }
 0xc1f   :  { %v1827_v62 = vpop.xlane.xlu0 %1826  ;;  %1850 = vadd.xlane.f32.xlu1 %v1849_v34  ;;  %v4373_v34 = vld [vmem:[%s6503_s8 + $0x10] sm:$0xff]  }
 0xc20   :  { %v1836_v59 = vmul.f32 0.03125, %v1827_v62  ;;  %v1852_v56 = vsel %vm212_vm2, %v1845_v49, 0.0 }
 0xc21   :  { %v1830_v46 = vpop.xlane.xlu1 %1829  ;;  %1853 = vadd.xlane.f32.xlu0 %v1852_v56 }
 0xc22   :  { %v1841_v5 = vsub.f32 %v5664_v39, %v1836_v59  ;;  %v1837_v58 = vmul.f32 0.03125, %v1830_v46  ;;  %v4374_v59 = vld [vmem:[%s6503_s8 + $0x18] sm:$0xff]  }
 0xc24   :  { %v1842_v55 = vsub.f32 %v5667_v50, %v1837_v58  ;;  %v1846_v0 = vmul.f32 %v1841_v5, %v1841_v5 }
 0xc26   :  { %v1855_v3 = vsel %vm212_vm2, %v1846_v0, 0.0  ;;  %v1847_v45 = vmul.f32 %v1842_v55, %v1842_v55 }
 0xc27   :  { %1856 = vadd.xlane.f32.xlu1 %v1855_v3 }
 0xc28   :  { %v1858_v11 = vsel %vm212_vm2, %v1847_v45, 0.0 }
 0xc29   :  { %1859 = vadd.xlane.f32.xlu0 %v1858_v11 }
 0xc6f   :  { %v1833_v40 = vpop.xlane.xlu0 %1832 }
 0xc70   :  { %v1838_v16 = vmul.f32 0.03125, %v1833_v40  ;;  %v5749_v40 = vld [vmem:[%s6500_s5 + $0x10] sm:$0x3f] }
 0xc72   :  { %v1843_v9 = vsub.f32 %v5674_v37, %v1838_v16 }
 0xc74   :  { %v1848_v47 = vmul.f32 %v1843_v9, %v1843_v9 }
 0xc76   :  { %v1861_v28 = vsel %vm212_vm2, %v1848_v47, 0.0 }
 0xc77   :  { %1862 = vadd.xlane.f32.xlu1 %v1861_v28  ;;  %v5756_v28 = vrot.slane %v5749_v40, %v4859_v6 }
 0xcac   :  { %v1851_v17 = vpop.xlane.xlu1 %1850 }
 0xcad   :  { %v1864_v23 = vmul.f32 0.03125, %v1851_v17 }
 0xcae   :  { %v1854_v61 = vpop.xlane.xlu0 %1853 }
 0xcaf   :  { %v1869_v48 = vadd.f32 1e-05, %v1864_v23  ;;  %v1865_v29 = vmul.f32 0.03125, %v1854_v61 }
 0xcb1   :  { %4520 = vrsqrt.f32 %v1869_v48  ;;  %v1870_v12 = vadd.f32 1e-05, %v1865_v29 }
 0xcb3   :  { %4522 = vrsqrt.f32 %v1870_v12 }
 0xcb4   :  { %v1857_v13 = vpop.xlane.xlu1 %1856 }
 0xcb5   :  { %v1866_v22 = vmul.f32 0.03125, %v1857_v13  ;;  %v5768_v13 = vld [vmem:[%s6499_s4 + $0x50] sm:$0xff] }
 0xcb6   :  { %v1860_v43 = vpop.xlane.xlu0 %1859 }
 0xcb7   :  { %v1871_v25 = vadd.f32 1e-05, %v1866_v22  ;;  %v1867_v27 = vmul.f32 0.03125, %v1860_v43 }
 0xcb9   :  { %4524 = vrsqrt.f32 %v1871_v25  ;;  %v1872_v20 = vadd.f32 1e-05, %v1867_v27  ;;  %v5778_v27 = vld [vmem:[%s6499_s4 + $0x8] sm:$0xff] }
 0xcbb   :  { %v4521_v35 = vpop.eup %4520  ;;  %4526 = vrsqrt.f32 %v1872_v20 }
 0xcbc   :  { %v1879_v32 = vmul.f32 %v4521_v35, %v1839_v15 }
 0xcbd   :  { %v4523_v8 = vpop.eup %4522 }
 0xcbe   :  { %v1888_v7 = vmul.f32 %v1887_v30, %v1879_v32  ;;  %v1880_v53 = vmul.f32 %v4523_v8, %v1840_v41 }
 0xcc0   :  { %v1889_v63 = vmul.f32 %v1887_v30, %v1880_v53  ;;  %v1897_v31 = vadd.f32 %v1896_v18, %v1888_v7 }
 0xcc2   :  { %v1898_v36 = vadd.f32 %v1896_v18, %v1889_v63 }
 0xcc3   :  { %v4525_v26 = vpop.eup %4524 }
 0xcc4   :  { %v1881_v44 = vmul.f32 %v4525_v26, %v1841_v5  ;;  %v1902_v21 = vpack.c.bf16 %v1898_v36, %v1897_v31  ;;  %v5796_v36 = vld [vmem:[%s6499_s4 + $0x30] sm:$0xff] }
 0xcc5   :  { %v4527_v49 = vpop.eup %4526 }
 0xcc6   :  { %v1882_v62 = vmul.f32 %v4527_v49, %v1842_v55  ;;  %4049 = vmatmul.mubr.msk.bf16.vlgmr.msra.gmra.mrb[36].mxu0 %vm212_vm2, %v1902_v21  ;;  %4065 = vmatmul.mubr.msk.bf16.vlgmr.msra.gmra.mrb[80].mxu1 %vm212_vm2, %v1902_v21  ;;  %v1890_v15 = vmul.f32 %v1887_v30, %v1881_v44 }
 0xcc7   :  { %4052 = vmatprep.mubr.msk.bf16.mxu0 %vm4711_vm0, %v4710_v1  ;;  %4068 = vmatprep.mubr.msk.bf16.mxu1 %vm4711_vm0, %v4710_v1 }
 0xcc8   :  { %v1891_v41 = vmul.f32 %v1887_v30, %v1882_v62  ;;  %4077 = vmatpush3.bf16.msra.mxu0 %v4373_v34  ;;  %v1899_v56 = vadd.f32 %v1896_v18, %v1890_v15  ;;  %v5805_v15 = vld [vmem:[%s6499_s4 + $0x80] sm:$0xff] }
 0xcc9   :  { %4078 = vmatprep.subr.bf16.mxu0 %v4710_v1 }
 0xcca   :  { %v1900_v46 = vadd.f32 %v1896_v18, %v1891_v41 }
 0xccc   :  { %v1903_v5 = vpack.c.bf16 %v1900_v46, %v1899_v56  ;;  %4079 = vmatpush3.bf16.msra.mxu0 %v4374_v59  ;;  %v5811_v46 = vld [vmem:[%s6499_s4 + $0x10] sm:$0xff] }
 0xccd   :  { %4118 = vmatprep.subr.bf16.mxu0 %v4710_v1 }
 0xcce   :  { %4053 = vmatmul.mubr.msk.bf16.gmra.mrb[40].mxu0 %vm212_vm2, %v1903_v5  ;;  %4069 = vmatmul.mubr.msk.bf16.gmra.mrb[84].mxu1 %vm212_vm2, %v1903_v5 }
 0xccf   :  { %4056 = vmatprep.mubr.msk.bf16.mxu0 %vm4711_vm0, %v4710_v1  ;;  %4072 = vmatprep.mubr.msk.bf16.mxu1 %vm4711_vm0, %v4710_v1 }
 0xd04   :  { %v1863_v58 = vpop.xlane.xlu1 %1862 }
 0xd05   :  { %v1868_v55 = vmul.f32 0.03125, %v1863_v58  ;;  %v5817_v58 = vld [vmem:[%s6499_s4 + $0x38] sm:$0xff] }
 0xd07   :  { %v1873_v0 = vadd.f32 1e-05, %v1868_v55 }
 0xd09   :  { %4528 = vrsqrt.f32 %v1873_v0  ;;  %v5823_v0 = vld [vmem:[%s6499_s4 + $0x88] sm:$0xff] }
 0xd13   :  { %v4529_v3 = vpop.eup %4528 }
 0xd14   :  { %v1883_v45 = vmul.f32 %v4529_v3, %v1843_v9 }
 0xd16   :  { %v1892_v11 = vmul.f32 %v1887_v30, %v1883_v45  ;;  %v5784_v30 = vld [vmem:[%s6499_s4 + $0x58] sm:$0xff] }
 0xd18   :  { %v1901_v38 = vadd.f32 %v1896_v18, %v1892_v11 }
 0xd1a   :  { %v1904_v54 = vpack.c.bf16 %v1901_v38, %v1901_v38  ;;  %v5830_v38 = vld [vmem:[%s6499_s4 + $0x60] sm:$0xff] }
 0xd1c   :  { %4057 = vmatmul.mubr.msk.bf16.gmra.mrb[44].mxu0 %vm212_vm2, %v1904_v54  ;;  %4073 = vmatmul.mubr.msk.bf16.gmra.mrb[88].mxu1 %vm212_vm2, %v1904_v54 }
 0xd1d   :  { %4080 = vmatprep.mubr.msk.bf16.mxu0 %vm4711_vm0, %v4710_v1 }
 0xd24   :  { %4081 = vmatmul.mubr.msk.bf16.vlgmr.msra.gmra.mrb[48].mxu0 %vm212_vm2, %v1902_v21 }
 0xd25   :  { %4084 = vmatprep.mubr.msk.bf16.mxu0 %vm4711_vm0, %v4710_v1 }
 0xd2c   :  { %4085 = vmatmul.mubr.msk.bf16.gmra.mrb[52].mxu0 %vm212_vm2, %v1903_v5 }
 0xd2d   :  { %4088 = vmatprep.mubr.msk.bf16.mxu0 %vm4711_vm0, %v4710_v1 }
 0xd34   :  { %4089 = vmatmul.mubr.msk.bf16.gmra.mrb[56].mxu0 %vm212_vm2, %v1904_v54 }
 0xd35   :  { %4124 = vmatprep.mubr.msk.bf16.mxu0 %vm4711_vm0, %v4710_v1 }
 0xd99   :  { %v1969_v16 = vpop.f32.mrb[36].mxu0  ;;  %v2046_v9 = vpop.f32.mrb[80].mxu1 }
 0xd9a   :  { %v5752_v47 = vadd.f32 %v1969_v16, %v5744_v60  ;;  %v4050_v17 = vpop.f32.mrb[37].mxu0  ;;  %v4066_v23 = vpop.f32.mrb[81].mxu1  ;;  %v2047_v25 = vadd.f32 %v2046_v9, %v5756_v28 }
 0xd9b   :  { %v1972_v2 = vpop.f32.mrb[38].mxu0  ;;  %v2049_v61 = vpop.f32.mrb[82].mxu1 }
 0xd9c   :  { %v2145_v48 = vmul.f32 %v5761_v51, %v5752_v47  ;;  %v4051_v29 = vpop.f32.mrb[39].mxu0  ;;  %v4067_v12 = vpop.f32.mrb[83].mxu1  ;;  %v2155_v6 = vmul.f32 %v5768_v13, %v5752_v47  ;;  %v1973_v22 = vadd.f32 %v1972_v2, %v5744_v60  ;;  %v2050_v43 = vadd.f32 %v2049_v61, %v5756_v28 }
 0xd9d   :  { %v5853_v12 = vld [vmem:[%s6499_s4 + $0x68] sm:$0xff] }
 0xd9e   :  { %v2146_v20 = vmul.f32 %v5778_v27, %v1973_v22  ;;  %v2156_v35 = vmul.f32 %v5784_v30, %v1973_v22  ;;  %v2165_v32 = vmul.f32 0.35355338, %v2145_v48  ;;  %v2195_v8 = vpack.c.bf16 %v2050_v43, %v2047_v25  ;;  %v5847_v48 = vld [vmem:[%s6499_s4 + $0x18] sm:$0xff] }
 0xd9f   :  { %v5787_v19 = vmul.f32 0.35355338, %v2155_v6  ;;  %v2151_v26 = vmul.f32 %v5796_v36, %v1973_v22  ;;  %v2161_v41 = vmul.f32 %v5805_v15, %v1973_v22 }
 0xda0   :  { %v2166_v18 = vmul.f32 0.35355338, %v2146_v20  ;;  %v5789_v7 = vmul.f32 0.35355338, %v2156_v35  ;;  %4339 = vmatprep.subr.msk.bf16.mxu1 %vm212_vm2, %v2195_v8  ;;  %v2229_v31 = vsel %vm212_vm2, %v2195_v8, 0  ;;  %v2076_v8 = vrot.slane %v5749_v40, %v4867_v10 }
 0xda1   :  { %v1977_v53 = vpop.f32.mrb[40].mxu0  ;;  %v2054_v63 = vpop.f32.mrb[84].mxu1  ;;  %4093 = vmatpush3.bf16.xpose.msra.mxu1 %v2229_v31  ;;  %v5835_v9 = vmul.f32 0.35355338, %v2151_v26  ;;  %v5840_v2 = vmul.f32 0.35355338, %v2161_v41 }
 0xda2   :  { %v1978_v44 = vadd.f32 %v1977_v53, %v5744_v60  ;;  %v4054_v21 = vpop.f32.mrb[41].mxu0  ;;  %v4070_v34 = vpop.f32.mrb[85].mxu1  ;;  %v2185_v49 = vpack.c.bf16 %v2166_v18, %v2165_v32  ;;  %v2055_v23 = vadd.f32 %v2054_v63, %v5756_v28  ;;  %v4655_v31 = vld [vmem:[%s6499_s4 + $0x28] sm:$0xff] }
 0xda3   :  { %v1980_v59 = vpop.f32.mrb[42].mxu0  ;;  %v2057_v56 = vpop.f32.mrb[86].mxu1  ;;  %v2150_v26 = vmul.f32 %v4655_v31, %v5752_v47  ;;  %v5885_v34 = vld [vmem:[%s6499_s4 + $0x40] sm:$0xff] }
 0xda4   :  { %v2147_v5 = vmul.f32 %v5811_v46, %v1978_v44  ;;  %v2152_v55 = vmul.f32 %v5817_v58, %v1978_v44  ;;  %v2162_v3 = vmul.f32 %v5823_v0, %v1978_v44  ;;  %v4055_v45 = vpop.f32.mrb[43].mxu0  ;;  %v4071_v11 = vpop.f32.mrb[87].mxu1  ;;  %4098 = vmatprep.mubr.msk.bf16.mxu1 %vm212_vm2, %v2185_v49  ;;  %v2157_v54 = vmul.f32 %v5830_v38, %v1978_v44  ;;  %v4656_v44 = vld [vmem:[%s6499_s4 + $0x78] sm:$0xff] }
 0xda5   :  { %v1981_v52 = vadd.f32 %v1980_v59, %v5744_v60  ;;  %v2058_v16 = vadd.f32 %v2057_v56, %v5756_v28  ;;  %v2160_v21 = vmul.f32 %v4656_v44, %v5752_v47  ;;  %v5893_v45 = vld [vmem:[%s6499_s4 + $0x90] sm:$0xff] }
 0xda6   :  { %v5837_v17 = vmul.f32 0.35355338, %v2152_v55  ;;  %v5842_v61 = vmul.f32 0.35355338, %v2162_v3  ;;  %v5856_v22 = vmul.f32 0.35355338, %v2147_v5 }
 0xda7   :  { %v2148_v29 = vmul.f32 %v5847_v48, %v1981_v52  ;;  %v2158_v6 = vmul.f32 %v5853_v12, %v1981_v52  ;;  %v2196_v43 = vpack.c.bf16 %v2058_v16, %v2055_v23  ;;  %v5860_v20 = vmul.f32 0.35355338, %v2157_v54  ;;  %v5899_v16 = vld [vmem:[%s6499_s4 + $0x20] sm:$0xff] }
 0xda8   :  { %v2188_v25 = vpack.c.bf16 %v5837_v17, %v5835_v9  ;;  %v2153_v49 = vmul.f32 %v5885_v34, %v1981_v52  ;;  %v2163_v47 = vmul.f32 %v5893_v45, %v1981_v52  ;;  %v5911_v52 = vld [vmem:[%s6499_s4 + $0x70] sm:$0xff] }
 0xda9   :  { %v5862_v35 = vmul.f32 0.35355338, %v2148_v29  ;;  %v5864_v32 = vmul.f32 0.35355338, %v2158_v6  ;;  %4340 = vmatprep.subr.msk.bf16.mxu1 %vm212_vm2, %v2196_v43  ;;  %v2232_v18 = vsel %vm212_vm2, %v2196_v43, 0  ;;  %v5917_v6 = vld [vmem:[%s6499_s4 + $0x98] sm:$0xff] }
 0xdaa   :  { %4095 = vmatpush3.bf16.xpose.msra.mxu1 %v2232_v18  ;;  %v2170_v18 = vmul.f32 0.35355338, %v2150_v26  ;;  %v5926_v63 = vmul.f32 0.35355338, %v2163_v47 }
 0xdab   :  { %v2186_v53 = vpack.c.bf16 %v5862_v35, %v5856_v22 }
 0xdef   :  { %v1985_v41 = vpop.f32.mrb[44].mxu0  ;;  %v2062_v59 = vpop.f32.mrb[88].mxu1 }
 0xdf0   :  { %v1986_v56 = vadd.f32 %v1985_v41, %v5744_v60  ;;  %v2063_v5 = vadd.f32 %v2062_v59, %v5756_v28  ;;  %v4058_v55 = vpop.f32.mrb[45].mxu0  ;;  %v4074_v3 = vpop.f32.mrb[89].mxu1  ;;  %v5905_v28 = vld [vmem:[%s6499_s4 + $0x48] sm:$0xff]  ;;  %v5920_v41 = vmul.f32 0.35355338, %v2160_v21 }
 0xdf1   :  { %v1988_v11 = vpop.f32.mrb[46].mxu0  ;;  %v2065_v54 = vpop.f32.mrb[90].mxu1  ;;  %v2173_v59 = vmul.f32 0.35355338, %v2153_v49 }
 0xdf2   :  { %v2149_v60 = vmul.f32 %v5899_v16, %v1986_v56  ;;  %v2154_v23 = vmul.f32 %v5905_v28, %v1986_v56  ;;  %v2159_v29 = vmul.f32 %v5911_v52, %v1986_v56  ;;  %v2164_v22 = vmul.f32 %v5917_v6, %v1986_v56  ;;  %v4059_v43 = vpop.f32.mrb[47].mxu0  ;;  %v4075_v35 = vpop.f32.mrb[91].mxu1 }
 0xdf3   :  { %v2197_v55 = vpack.c.bf16 %v2063_v5, %v2063_v5 }
 0xdf4   :  { %v2169_v3 = vmul.f32 0.35355338, %v2149_v60  ;;  %v2174_v11 = vmul.f32 0.35355338, %v2154_v23  ;;  %v5922_v54 = vmul.f32 0.35355338, %v2159_v29 }
 0xdf5   :  { %v5928_v62 = vmul.f32 0.35355338, %v2164_v22  ;;  %v2235_v56 = vsel %vm212_vm2, %v2197_v55, 0  ;;  %4341 = vmatprep.subr.msk.bf16.mxu1 %vm212_vm2, %v2197_v55 }
 0xdf6   :  { %4097 = vmatpush3.bf16.xpose.msra.mxu1 %v2235_v56  ;;  %v2187_v26 = vpack.c.bf16 %v2170_v18, %v2169_v3  ;;  %v2189_v21 = vpack.c.bf16 %v2174_v11, %v2173_v59  ;;  %v2192_v49 = vpack.c.bf16 %v5920_v41, %v5922_v54 }
 0xdf7   :  { %v2123_v5 = vpop.f32.mrb[48].mxu0  ;;  %v2194_v60 = vpack.c.bf16 %v5928_v62, %v5926_v63  ;;  %4190 = vmatprep.subr.bf16.mxu1 %v4710_v1 }
 0xdf8   :  { %v2124_v40 = vadd.f32 %v2123_v5, %v2076_v8  ;;  %v4082_v47 = vpop.f32.mrb[49].mxu0 }
 0xdf9   :  { %v2126_v23 = vpop.f32.mrb[50].mxu0 }
 0xdfa   :  { %v4083_v29 = vpop.f32.mrb[51].mxu0  ;;  %v2127_v22 = vadd.f32 %v2126_v23, %v2076_v8  ;;  %v5938_v43 = vmul.f32 %v5761_v51, %v2124_v40  ;;  %v2581_v35 = vmul.f32 %v4655_v31, %v2124_v40  ;;  %v5941_v18 = vmul.f32 %v5768_v13, %v2124_v40 }
 0xdfb   :  { %v5943_v59 = vmul.f32 %v4656_v44, %v2124_v40  ;;  %v6523_v29 = vpack.c.bf16 %v5864_v32, %v5860_v20 }
 0xdfc   :  { %v5946_v41 = vmul.f32 %v5778_v27, %v2127_v22  ;;  %v2582_v62 = vmul.f32 %v5796_v36, %v2127_v22  ;;  %v5950_v63 = vmul.f32 %v5784_v30, %v2127_v22  ;;  %v5953_v55 = vmul.f32 %v5805_v15, %v2127_v22 }
 0xdfd   :  { %4099 = vmatmul.mubr.msk.bf16.vlgmr.msra.gmra.mrb[92].mxu1 %vm212_vm2, %v2186_v53 }
 0xdfe   :  { %4102 = vmatprep.mubr.msk.bf16.mxu1 %vm212_vm2, %v2187_v26  ;;  %v2589_v13 = vpack.c.bf16 %v2582_v62, %v2581_v35  ;;  %v2578_v31 = vpack.c.bf16 %v5946_v41, %v5938_v43  ;;  %v2736_v27 = vpack.c.bf16 %v5950_v63, %v5941_v18  ;;  %v4663_v35 = vld [vmem:[%s6498_s3 + $0x30] sm:$0xff] }
 0xdff   :  { %v2131_v51 = vpop.f32.mrb[52].mxu0 }
 0xe00   :  { %v2132_v30 = vadd.f32 %v2131_v51, %v2076_v8  ;;  %v4086_v44 = vpop.f32.mrb[53].mxu0  ;;  %4119 = vmatpush3.bf16.msra.mxu0 %v2589_v13  ;;  %v4664_v51 = vld [vmem:[%s6498_s3 + $0x28] sm:$0xff] }
 0xe01   :  { %v2134_v15 = vpop.f32.mrb[54].mxu0  ;;  %4120 = vmatprep.subr.bf16.mxu0 %v4710_v1 }
 0xe02   :  { %v4087_v3 = vpop.f32.mrb[55].mxu0  ;;  %v2135_v53 = vadd.f32 %v2134_v15, %v2076_v8  ;;  %v5965_v11 = vmul.f32 %v5811_v46, %v2132_v30  ;;  %v2583_v54 = vmul.f32 %v5817_v58, %v2132_v30  ;;  %v5969_v56 = vmul.f32 %v5830_v38, %v2132_v30 }
 0xe03   :  { %v5972_v26 = vmul.f32 %v5823_v0, %v2132_v30  ;;  %v4665_v30 = vld [vmem:[%s6498_s3 + $0x38] sm:$0xff] }
 0xe04   :  { %v5975_v5 = vmul.f32 %v5847_v48, %v2135_v53  ;;  %v2584_v40 = vmul.f32 %v5885_v34, %v2135_v53  ;;  %v5979_v47 = vmul.f32 %v5853_v12, %v2135_v53  ;;  %v5982_v23 = vmul.f32 %v5893_v45, %v2135_v53 }
 0xe05   :  { %4103 = vmatmul.mubr.msk.bf16.gmra.mrb[96].mxu1 %vm212_vm2, %v2188_v25 }
 0xe06   :  { %4106 = vmatprep.mubr.msk.bf16.mxu1 %vm212_vm2, %v2189_v21  ;;  %v2590_v58 = vpack.c.bf16 %v2584_v40, %v2583_v54  ;;  %v2579_v0 = vpack.c.bf16 %v5975_v5, %v5965_v11  ;;  %v6522_v21 = vpack.c.bf16 %v5789_v7, %v5787_v19  ;;  %v4666_v54 = vld [vmem:[%s6498_s3 + $0x40] sm:$0xff] }
 0xe07   :  { %v2139_v46 = vpop.f32.mrb[56].mxu0 }
 0xe08   :  { %v5995_v12 = vadd.f32 %v2139_v46, %v2076_v8  ;;  %v4090_v34 = vpop.f32.mrb[57].mxu0  ;;  %4121 = vmatpush3.bf16.msra.mxu0 %v2590_v58 }
 0xe09   :  { %v2142_v9 = vpop.f32.mrb[58].mxu0  ;;  %4122 = vmatprep.subr.bf16.mxu0 %v4710_v1 }
 0xe0a   :  { %v4091_v17 = vpop.f32.mrb[59].mxu0  ;;  %v2585_v25 = vmul.f32 %v5905_v28, %v5995_v12  ;;  %v6524_v28 = vpack.c.bf16 %v5842_v61, %v5840_v2  ;;  %v4667_v9 = vld [vmem:[%s6498_s3] sm:$0xff] }
 0xe0c   :  { %v2591_v45 = vpack.c.bf16 %v2585_v25, %v2585_v25  ;;  %v4668_v25 = vld [vmem:[%s6498_s3 + $0x48] sm:$0xff] }
 0xe0d   :  { %4107 = vmatmul.mubr.msk.bf16.gmra.mrb[100].mxu1 %vm212_vm2, %v6522_v21 }
 0xe0e   :  { %4110 = vmatprep.mubr.msk.bf16.mxu1 %vm212_vm2, %v6523_v29  ;;  %v2602_v8 = vsel %vm1077_vm3, %v2591_v45, 0  ;;  %v4669_v29 = vld [vmem:[%s6498_s3 + $0x8] sm:$0xff] }
 0xe0f   :  { %4123 = vmatpush3.bf16.msra.mxu0 %v2602_v8 }
 0xe10   :  { %4136 = vmatprep.subr.bf16.mxu0 %v4710_v1 }
 0xe15   :  { %4111 = vmatmul.mubr.msk.bf16.gmra.mrb[104].mxu1 %vm212_vm2, %v2192_v49 }
 0xe16   :  { %4114 = vmatprep.mubr.msk.bf16.mxu1 %vm212_vm2, %v6524_v28 }
 0xe1d   :  { %4115 = vmatmul.mubr.msk.bf16.gmra.mrb[108].mxu1 %vm212_vm2, %v2194_v60 }
 0xe1e   :  { %4194 = vmatprep.mubr.msk.bf16.mxu1 %vm4711_vm0, %v4710_v1 }
 0xed0   :  { %v4100_v19 = vpop.f32.mrb[92].mxu1 }
 0xed1   :  { %v2271_v7 = vpop.f32.mrb[93].mxu1 }
 0xed2   :  { %v4101_v20 = vpop.f32.mrb[94].mxu1  ;;  %v6047_v17 = vadd.f32 %v4667_v9, %v2271_v7  ;;  %v4670_v7 = vld [vmem:[%s6498_s3 + $0x10] sm:$0xff]  ;;  %v4674_v9 = vld [vmem:[%s6498_s3 + $0x58] sm:$0xff] }
 0xed3   :  { %v2274_v32 = vpop.f32.mrb[95].mxu1 }
 0xed4   :  { %v6059_v8 = vadd.f32 %v4669_v29, %v2274_v32  ;;  %v4671_v32 = vld [vmem:[%s6498_s3 + $0x18] sm:$0xff] }
 0xed8   :  { %v4104_v22 = vpop.f32.mrb[96].mxu1 }
 0xed9   :  { %v6021_v49 = vadd.f32 %v4663_v35, %v4104_v22  ;;  %v2287_v62 = vpop.f32.mrb[97].mxu1  ;;  %v6066_v22 = vadd.f32 %v4670_v7, %v4100_v19  ;;  %v4672_v19 = vld [vmem:[%s6498_s3 + $0x20] sm:$0xff] }
 0xeda   :  { %v4105_v2 = vpop.f32.mrb[98].mxu1 }
 0xedb   :  { %v2290_v61 = vpop.f32.mrb[99].mxu1  ;;  %v2368_v60 = vsel %vm825_vm4, %v6021_v49, -inf  ;;  %v6033_v44 = vadd.f32 %v4665_v30, %v4105_v2  ;;  %v2350_v2 = vsel %vm825_vm4, %v6047_v17, -inf  ;;  %v2353_v30 = vsel %vm825_vm4, %v6059_v8, -inf }
 0xedc   :  { %v6028_v13 = vadd.f32 %v4664_v51, %v2290_v61  ;;  %2369 = vmax.xlane.f32.xlu1 %v2368_v60  ;;  %v6073_v60 = vadd.f32 %v4671_v32, %v4101_v20  ;;  %v4673_v20 = vld [vmem:[%s6498_s3 + $0x50] sm:$0xff] }
 0xedd   :  { %v2371_v58 = vsel %vm825_vm4, %v6033_v44, -inf }
 0xede   :  { %v2365_v15 = vsel %vm825_vm4, %v6028_v13, -inf }
 0xedf   :  { %2366 = vmax.xlane.f32.xlu0 %v2365_v15 }
 0xee0   :  { %v4108_v3 = vpop.f32.mrb[100].mxu1 }
 0xee1   :  { %v2303_v53 = vpop.f32.mrb[101].mxu1 }
 0xee2   :  { %v6040_v40 = vadd.f32 %v4666_v54, %v2303_v53  ;;  %v4109_v46 = vpop.f32.mrb[102].mxu1  ;;  %v6080_v53 = vadd.f32 %v4672_v19, %v2287_v62  ;;  %v2356_v54 = vsel %vm825_vm4, %v6066_v22, -inf }
 0xee3   :  { %v2306_v34 = vpop.f32.mrb[103].mxu1  ;;  %2372 = vmax.xlane.f32.xlu0 %v2371_v58  ;;  %v6087_v58 = vadd.f32 %v4673_v20, %v4108_v3  ;;  %v6094_v62 = vadd.f32 %v4674_v9, %v4109_v46  ;;  %v4675_v3 = vld [vmem:[%s6498_s3 + $0x60] sm:$0xff]  ;;  %v4676_v46 = vld [vmem:[%s6498_s3 + $0x68] sm:$0xff] }
 0xee4   :  { %v6052_v45 = vadd.f32 %v4668_v25, %v2306_v34  ;;  %v2374_v21 = vsel %vm825_vm4, %v6040_v40, -inf  ;;  %v2359_v34 = vsel %vm825_vm4, %v6073_v60, -inf }
 0xee5   :  { %2375 = vmax.xlane.f32.xlu1 %v2374_v21  ;;  %v2362_v21 = vsel %vm825_vm4, %v6080_v53, -inf  ;;  %v2383_v19 = vsel %vm825_vm4, %v6094_v62, -inf }
 0xee6   :  { %v2377_v28 = vsel %vm825_vm4, %v6052_v45, -inf }
 0xee7   :  { %2378 = vmax.xlane.f32.xlu0 %v2377_v28 }
 0xee8   :  { %v4112_v35 = vpop.f32.mrb[104].mxu1 }
 0xee9   :  { %v2319_v61 = vpop.f32.mrb[105].mxu1  ;;  %2351 = vmax.xlane.f32.xlu1 %v2350_v2  ;;  %v2380_v2 = vsel %vm825_vm4, %v6087_v58, -inf }
 0xeea   :  { %v4113_v51 = vpop.f32.mrb[106].mxu1  ;;  %v6101_v28 = vadd.f32 %v4675_v3, %v2319_v61  ;;  %v4677_v61 = vld [vmem:[%s6498_s3 + $0x70] sm:$0xff] }
 0xeeb   :  { %v2322_v15 = vpop.f32.mrb[107].mxu1  ;;  %2354 = vmax.xlane.f32.xlu0 %v2353_v30 }
 0xeec   :  { %v6110_v30 = vadd.f32 %v4676_v46, %v2322_v15  ;;  %v2386_v20 = vsel %vm825_vm4, %v6101_v28, -inf }
 0xeed   :  { %2357 = vmax.xlane.f32.xlu1 %v2356_v54  ;;  %v6117_v54 = vadd.f32 %v4677_v61, %v4112_v35 }
 0xeee   :  { %v2389_v9 = vsel %vm825_vm4, %v6110_v30, -inf }
 0xeef   :  { %2360 = vmax.xlane.f32.xlu0 %v2359_v34  ;;  %v4678_v34 = vld [vmem:[%s6498_s3 + $0x78] sm:$0xff]  ;;  %v2392_v3 = vsel %vm825_vm4, %v6117_v54, -inf }
 0xef0   :  { %v4116_v25 = vpop.f32.mrb[108].mxu1  ;;  %v6124_v15 = vadd.f32 %v4678_v34, %v4113_v51 }
 0xef1   :  { %v2335_v29 = vpop.f32.mrb[109].mxu1  ;;  %2363 = vmax.xlane.f32.xlu1 %v2362_v21  ;;  %v4679_v21 = vld [vmem:[%s6498_s3 + $0x80] sm:$0xff] }
 0xef2   :  { %v6103_v7 = vpop.f32.mrb[110].mxu1  ;;  %v6131_v35 = vadd.f32 %v4679_v21, %v2335_v29  ;;  %v2395_v46 = vsel %vm825_vm4, %v6124_v15, -inf }
 0xef3   :  { %v2338_v32 = vpop.f32.mrb[111].mxu1  ;;  %2381 = vmax.xlane.f32.xlu0 %v2380_v2  ;;  %v4680_v2 = vld [vmem:[%s6498_s3 + $0x88] sm:$0xff] }
 0xef4   :  { %v6138_v51 = vadd.f32 %v4680_v2, %v2338_v32  ;;  %v2398_v61 = vsel %vm825_vm4, %v6131_v35, -inf }
 0xef5   :  { %2384 = vmax.xlane.f32.xlu1 %v2383_v19  ;;  %v4681_v19 = vld [vmem:[%s6498_s3 + $0x90] sm:$0xff] }
 0xef6   :  { %v6145_v29 = vadd.f32 %v4681_v19, %v4116_v25 }
 0xef7   :  { %2387 = vmax.xlane.f32.xlu0 %v2386_v20  ;;  %v2401_v20 = vsel %vm825_vm4, %v6138_v51, -inf }
 0xef8   :  { %v2404_v32 = vsel %vm825_vm4, %v6145_v29, -inf }
 0xef9   :  { %2390 = vmax.xlane.f32.xlu1 %v2389_v9 }
 0xefb   :  { %2393 = vmax.xlane.f32.xlu0 %v2392_v3 }
 0xefd   :  { %2396 = vmax.xlane.f32.xlu1 %v2395_v46 }
 0xeff   :  { %2399 = vmax.xlane.f32.xlu0 %v2398_v61 }
 0xf01   :  { %2402 = vmax.xlane.f32.xlu1 %v2401_v20 }
 0xf03   :  { %2405 = vmax.xlane.f32.xlu0 %v2404_v32 }
 0xf69   :  { %v2370_v34 = vpop.xlane.xlu1 %2369 }
 0xf6a   :  { %v2416_v9 = vsub.f32 %v6021_v49, %v2370_v34 }
 0xf6c   :  { %v2442_v21 = vmul.f32 1.442695, %v2416_v9  ;;  %v2367_v3 = vpop.xlane.xlu0 %2366 }
 0xf6d   :  { %v2415_v25 = vsub.f32 %v6028_v13, %v2367_v3 }
 0xf6e   :  { %4530 = vpow2.f32 %v2442_v21 }
 0xf6f   :  { %v2440_v2 = vmul.f32 1.442695, %v2415_v25 }
 0xf70   :  { %v2373_v46 = vpop.xlane.xlu0 %2372 }
 0xf71   :  { %4532 = vpow2.f32 %v2440_v2  ;;  %v2417_v19 = vsub.f32 %v6033_v44, %v2373_v46 }
 0xf72   :  { %v2376_v61 = vpop.xlane.xlu1 %2375 }
 0xf73   :  { %v2444_v48 = vmul.f32 1.442695, %v2417_v19  ;;  %v2418_v20 = vsub.f32 %v6040_v40, %v2376_v61 }
 0xf74   :  { %v2379_v36 = vpop.xlane.xlu0 %2378 }
 0xf75   :  { %4534 = vpow2.f32 %v2444_v48  ;;  %v2446_v32 = vmul.f32 1.442695, %v2418_v20  ;;  %v2419_v38 = vsub.f32 %v6052_v45, %v2379_v36 }
 0xf76   :  { %v2352_v49 = vpop.xlane.xlu1 %2351 }
 0xf77   :  { %4536 = vpow2.f32 %v2446_v32  ;;  %v2448_v34 = vmul.f32 1.442695, %v2419_v38  ;;  %v2410_v13 = vsub.f32 %v6047_v17, %v2352_v49  ;;  %v4682_v17 = vld [vmem:[%s6498_s3 + $0x98] sm:$0xff] }
 0xf78   :  { %v6159_v9 = vpop.eup %4530  ;;  %v2355_v21 = vpop.xlane.xlu0 %2354  ;;  %v6171_v45 = vadd.f32 %v4682_v17, %v6103_v7 }
 0xf79   :  { %4538 = vpow2.f32 %v2448_v34  ;;  %v2430_v3 = vmul.f32 1.442695, %v2410_v13  ;;  %v2411_v44 = vsub.f32 %v6059_v8, %v2355_v21  ;;  %v2488_v40 = vsel %vm825_vm4, %v6159_v9, 0.0 }
 0xf7a   :  { %2489 = vadd.xlane.f32.xlu0 %v2488_v40  ;;  %v2358_v48 = vpop.xlane.xlu1 %2357  ;;  %v2407_v34 = vsel %vm825_vm4, %v6171_v45, -inf }
 0xf7b   :  { %v6164_v25 = vpop.eup %4532  ;;  %4540 = vpow2.f32 %v2430_v3  ;;  %v2432_v36 = vmul.f32 1.442695, %v2411_v44  ;;  %v2412_v38 = vsub.f32 %v6066_v22, %v2358_v48 }
 0xf7c   :  { %v2361_v2 = vpop.xlane.xlu0 %2360  ;;  %v2485_v8 = vsel %vm825_vm4, %v6164_v25, 0.0 }
 0xf7d   :  { %4542 = vpow2.f32 %v2432_v36  ;;  %v2434_v46 = vmul.f32 1.442695, %v2412_v38  ;;  %v2413_v19 = vsub.f32 %v6073_v60, %v2361_v2  ;;  %2486 = vadd.xlane.f32.xlu1 %v2485_v8 }
 0xf7e   :  { %v2364_v61 = vpop.xlane.xlu1 %2363 }
 0xf7f   :  { %v6176_v20 = vpop.eup %4534  ;;  %4544 = vpow2.f32 %v2434_v46  ;;  %v2436_v22 = vmul.f32 1.442695, %v2413_v19  ;;  %v2414_v32 = vsub.f32 %v6080_v53, %v2364_v61 }
 0xf80   :  { %v2382_v49 = vpop.xlane.xlu0 %2381  ;;  %v2491_v7 = vsel %vm825_vm4, %v6176_v20, 0.0 }
 0xf81   :  { %v6183_v13 = vpop.eup %4536  ;;  %4546 = vpow2.f32 %v2436_v22  ;;  %v2438_v21 = vmul.f32 1.442695, %v2414_v32  ;;  %v2420_v60 = vsub.f32 %v6087_v58, %v2382_v49  ;;  %2492 = vadd.xlane.f32.xlu0 %v2491_v7  ;;  %2408 = vmax.xlane.f32.xlu1 %v2407_v34 }
 0xf82   :  { %v2385_v3 = vpop.xlane.xlu1 %2384  ;;  %v2494_v38 = vsel %vm825_vm4, %v6183_v13, 0.0 }
 0xf83   :  { %v6186_v44 = vpop.eup %4538  ;;  %4548 = vpow2.f32 %v2438_v21  ;;  %v2450_v53 = vmul.f32 1.442695, %v2420_v60  ;;  %v2421_v40 = vsub.f32 %v6094_v62, %v2385_v3 }
 0xf84   :  { %v2388_v48 = vpop.xlane.xlu0 %2387  ;;  %v2497_v36 = vsel %vm825_vm4, %v6186_v44, 0.0 }
 0xf85   :  { %v6193_v17 = vpop.eup %4540  ;;  %4550 = vpow2.f32 %v2450_v53  ;;  %v2452_v58 = vmul.f32 1.442695, %v2421_v40  ;;  %v2422_v2 = vsub.f32 %v6101_v28, %v2388_v48  ;;  %2498 = vadd.xlane.f32.xlu0 %v2497_v36  ;;  %2495 = vadd.xlane.f32.xlu1 %v2494_v38 }
 0xf86   :  { %v2391_v8 = vpop.xlane.xlu1 %2390  ;;  %v2470_v32 = vsel %vm825_vm4, %v6193_v17, 0.0 }
 0xf87   :  { %v6196_v46 = vpop.eup %4542  ;;  %4552 = vpow2.f32 %v2452_v58  ;;  %v2454_v62 = vmul.f32 1.442695, %v2422_v2  ;;  %v2423_v19 = vsub.f32 %v6110_v30, %v2391_v8 }
 0xf88   :  { %v2394_v61 = vpop.xlane.xlu0 %2393  ;;  %v2473_v22 = vsel %vm825_vm4, %v6196_v46, 0.0 }
 0xf89   :  { %v6203_v49 = vpop.eup %4544  ;;  %4554 = vpow2.f32 %v2454_v62  ;;  %v2456_v28 = vmul.f32 1.442695, %v2423_v19  ;;  %v2424_v7 = vsub.f32 %v6117_v54, %v2394_v61  ;;  %2474 = vadd.xlane.f32.xlu0 %v2473_v22  ;;  %2471 = vadd.xlane.f32.xlu1 %v2470_v32 }
 0xf8a   :  { %v2397_v34 = vpop.xlane.xlu1 %2396  ;;  %v2476_v40 = vsel %vm825_vm4, %v6203_v49, 0.0 }
 0xf8b   :  { %v6206_v21 = vpop.eup %4546  ;;  %4556 = vpow2.f32 %v2456_v28  ;;  %v2458_v30 = vmul.f32 1.442695, %v2424_v7  ;;  %v2425_v60 = vsub.f32 %v6124_v15, %v2397_v34 }
 0xf8c   :  { %v2400_v3 = vpop.xlane.xlu0 %2399  ;;  %v2479_v53 = vsel %vm825_vm4, %v6206_v21, 0.0 }
 0xf8d   :  { %v6213_v48 = vpop.eup %4548  ;;  %4558 = vpow2.f32 %v2458_v30  ;;  %v2460_v54 = vmul.f32 1.442695, %v2425_v60  ;;  %v2426_v36 = vsub.f32 %v6131_v35, %v2400_v3  ;;  %2480 = vadd.xlane.f32.xlu0 %v2479_v53  ;;  %2477 = vadd.xlane.f32.xlu1 %v2476_v40 }
 0xf8e   :  { %v2403_v38 = vpop.xlane.xlu1 %2402  ;;  %v2482_v19 = vsel %vm825_vm4, %v6213_v48, 0.0 }
 0xf8f   :  { %v6216_v58 = vpop.eup %4550  ;;  %4560 = vpow2.f32 %v2460_v54  ;;  %v2462_v15 = vmul.f32 1.442695, %v2426_v36  ;;  %v2427_v2 = vsub.f32 %v6138_v51, %v2403_v38 }
 0xf90   :  { %v2406_v8 = vpop.xlane.xlu0 %2405  ;;  %v2500_v62 = vsel %vm825_vm4, %v6216_v58, 0.0 }
 0xf91   :  { %v6223_v61 = vpop.eup %4552  ;;  %4562 = vpow2.f32 %v2462_v15  ;;  %v2464_v35 = vmul.f32 1.442695, %v2427_v2  ;;  %v2428_v22 = vsub.f32 %v6145_v29, %v2406_v8  ;;  %2501 = vadd.xlane.f32.xlu0 %v2500_v62  ;;  %2483 = vadd.xlane.f32.xlu1 %v2482_v19 }
 0xf92   :  { %v2503_v7 = vsel %vm825_vm4, %v6223_v61, 0.0 }
 0xf93   :  { %v6226_v32 = vpop.eup %4554  ;;  %4564 = vpow2.f32 %v2464_v35  ;;  %v2466_v28 = vmul.f32 1.442695, %v2428_v22 }
 0xf94   :  { %v2506_v51 = vsel %vm825_vm4, %v6226_v32, 0.0 }
 0xf95   :  { %v6232_v34 = vpop.eup %4556  ;;  %4566 = vpow2.f32 %v2466_v28  ;;  %2507 = vadd.xlane.f32.xlu0 %v2506_v51  ;;  %2504 = vadd.xlane.f32.xlu1 %v2503_v7 }
 0xf96   :  { %v2509_v60 = vsel %vm825_vm4, %v6232_v34, 0.0 }
 0xf97   :  { %v6234_v30 = vpop.eup %4558 }
 0xf98   :  { %v2512_v29 = vsel %vm825_vm4, %v6234_v30, 0.0 }
 0xf99   :  { %v6240_v3 = vpop.eup %4560  ;;  %2513 = vadd.xlane.f32.xlu0 %v2512_v29  ;;  %2510 = vadd.xlane.f32.xlu1 %v2509_v60 }
 0xf9a   :  { %v2515_v54 = vsel %vm825_vm4, %v6240_v3, 0.0 }
 0xf9b   :  { %v6242_v53 = vpop.eup %4562 }
 0xf9c   :  { %v2518_v40 = vsel %vm825_vm4, %v6242_v53, 0.0 }
 0xf9d   :  { %v6248_v36 = vpop.eup %4564  ;;  %2519 = vadd.xlane.f32.xlu0 %v2518_v40  ;;  %2516 = vadd.xlane.f32.xlu1 %v2515_v54 }
 0xf9e   :  { %v2521_v2 = vsel %vm825_vm4, %v6248_v36, 0.0 }
 0xf9f   :  { %v6250_v38 = vpop.eup %4566 }
 0xfa0   :  { %v2524_v15 = vsel %vm825_vm4, %v6250_v38, 0.0 }
 0xfa1   :  { %2525 = vadd.xlane.f32.xlu0 %v2524_v15  ;;  %2522 = vadd.xlane.f32.xlu1 %v2521_v2  ;;  %v2574_v2 = vmul.f32 %v5899_v16, %v5995_v12 }
0x1007   :  { %v2490_v8 = vpop.xlane.xlu0 %2489 }
0x1008   :  { %4568 = vrcp.f32 %v2490_v8 }
0x100a   :  { %v2487_v62 = vpop.xlane.xlu1 %2486 }
0x100b   :  { %4570 = vrcp.f32 %v2487_v62 }
0x100e   :  { %v2409_v19 = vpop.xlane.xlu1 %2408  ;;  %v2493_v35 = vpop.xlane.xlu0 %2492 }
0x100f   :  { %v2429_v22 = vsub.f32 %v6171_v45, %v2409_v19  ;;  %4572 = vrcp.f32 %v2493_v35  ;;  %v2580_v19 = vpack.c.bf16 %v2574_v2, %v2574_v2 }
0x1011   :  { %v2468_v28 = vmul.f32 1.442695, %v2429_v22 }
0x1012   :  { %v2496_v51 = vpop.xlane.xlu1 %2495  ;;  %v4569_v7 = vpop.eup %4568 }
0x1013   :  { %4574 = vpow2.f32 %v2468_v28  ;;  %v2556_v60 = vmul.f32 %v4569_v7, %v6159_v9  ;;  %v2499_v54 = vpop.xlane.xlu0 %2498 }
0x1014   :  { %4576 = vrcp.f32 %v2496_v51 }
0x1015   :  { %v4571_v29 = vpop.eup %4570  ;;  %4578 = vrcp.f32 %v2499_v54 }
0x1016   :  { %v2555_v40 = vmul.f32 %v4571_v29, %v6164_v25  ;;  %v2472_v8 = vpop.xlane.xlu1 %2471 }
0x1017   :  { %v2475_v25 = vpop.xlane.xlu0 %2474 }
0x1018   :  { %v2586_v15 = vpack.c.bf16 %v2556_v60, %v2555_v40  ;;  %4580 = vrcp.f32 %v2475_v25 }
0x1019   :  { %v4573_v45 = vpop.eup %4572  ;;  %4582 = vrcp.f32 %v2472_v8 }
0x101a   :  { %4125 = vmatmul.mubr.msk.bf16.vlgmr.msra.gmra.mrb[60].mxu0 %vm825_vm4, %v2586_v15  ;;  %v2557_v16 = vmul.f32 %v4573_v45, %v6176_v20  ;;  %v2478_v5 = vpop.xlane.xlu1 %2477 }
0x101b   :  { %4137 = vmatpush3.bf16.msra.mxu0 %v2578_v31  ;;  %4128 = vmatprep.mubr.msk.bf16.mxu0 %vm4711_vm0, %v4710_v1  ;;  %v2670_v31 = vsel %vm1077_vm3, %v2580_v19, 0  ;;  %v2481_v11 = vpop.xlane.xlu0 %2480 }
0x101c   :  { %4138 = vmatprep.subr.bf16.mxu0 %v4710_v1  ;;  %4584 = vrcp.f32 %v2481_v11  ;;  %v6526_v11 = vpack.c.bf16 %v5953_v55, %v5943_v59 }
0x101d   :  { %v6268_v9 = vpop.eup %4574  ;;  %4586 = vrcp.f32 %v2478_v5 }
0x101e   :  { %v2527_v62 = vsel %vm825_vm4, %v6268_v9, 0.0  ;;  %v4577_v35 = vpop.eup %4576  ;;  %v2484_v29 = vpop.xlane.xlu1 %2483 }
0x101f   :  { %4139 = vmatpush3.bf16.msra.mxu0 %v2579_v0  ;;  %2528 = vadd.xlane.f32.xlu1 %v2527_v62  ;;  %v2558_v43 = vmul.f32 %v4577_v35, %v6183_v13  ;;  %v4579_v22 = vpop.eup %4578  ;;  %4588 = vrcp.f32 %v2484_v29  ;;  %v2502_v2 = vpop.xlane.xlu0 %2501 }
0x1020   :  { %4140 = vmatprep.subr.bf16.mxu0 %v4710_v1  ;;  %v2559_v0 = vmul.f32 %v4579_v22, %v6186_v44  ;;  %v2732_v44 = vmul.f32 %v5911_v52, %v5995_v12  ;;  %v6525_v52 = vpack.c.bf16 %v5979_v47, %v5969_v56 }
0x1021   :  { %v2587_v41 = vpack.c.bf16 %v2558_v43, %v2557_v16 }
0x1022   :  { %v4581_v20 = vpop.eup %4580  ;;  %v2588_v13 = vpack.c.bf16 %v2559_v0, %v2559_v0  ;;  %v2738_v45 = vpack.c.bf16 %v2732_v44, %v2732_v44 }
0x1023   :  { %4141 = vmatpush3.bf16.msra.mxu0 %v2670_v31  ;;  %v4583_v28 = vpop.eup %4582  ;;  %v2551_v51 = vmul.f32 %v4581_v20, %v6196_v46  ;;  %v2505_v46 = vpop.xlane.xlu1 %2504 }
0x1024   :  { %4129 = vmatmul.mubr.msk.bf16.gmra.mrb[64].mxu0 %vm825_vm4, %v2587_v41  ;;  %4154 = vmatprep.subr.bf16.mxu0 %v4710_v1  ;;  %v2550_v7 = vmul.f32 %v4583_v28, %v6193_v17  ;;  %4590 = vrcp.f32 %v2505_v46  ;;  %v2508_v47 = vpop.xlane.xlu0 %2507  ;;  %v2816_v41 = vmul.f32 %v5917_v6, %v5995_v12  ;;  %v6527_v6 = vpack.c.bf16 %v5982_v23, %v5972_v26 }
0x1025   :  { %4132 = vmatprep.mubr.msk.bf16.mxu0 %vm4711_vm0, %v4710_v1  ;;  %4592 = vrcp.f32 %v2502_v2 }
0x1026   :  { %v4585_v60 = vpop.eup %4584  ;;  %v2575_v40 = vpack.c.bf16 %v2551_v51, %v2550_v7  ;;  %v2822_v0 = vpack.c.bf16 %v2816_v41, %v2816_v41 }
0x1027   :  { %v4587_v54 = vpop.eup %4586  ;;  %v2553_v15 = vmul.f32 %v4585_v60, %v6206_v21  ;;  %v2511_v21 = vpop.xlane.xlu1 %2510 }
0x1028   :  { %v2552_v17 = vmul.f32 %v4587_v54, %v6203_v49  ;;  %v4375_v49 = vld [vmem:[%s6504_s9 + $0x10] sm:$0xff]   ;;  %4594 = vrcp.f32 %v2511_v21  ;;  %v2514_v35 = vpop.xlane.xlu0 %2513  ;;  %v2833_v12 = vsel %vm1077_vm3, %v2822_v0, 0 }
0x1029   :  { %v4589_v63 = vpop.eup %4588  ;;  %4191 = vmatpush3.bf16.msra.mxu1 %v4375_v49  ;;  %4596 = vrcp.f32 %v2508_v47 }
0x102a   :  { %v2576_v18 = vpack.c.bf16 %v2553_v15, %v2552_v17  ;;  %v2554_v56 = vmul.f32 %v4589_v63, %v6213_v48  ;;  %4192 = vmatprep.subr.bf16.mxu1 %v4710_v1  ;;  %4598 = vrcp.f32 %v2514_v35  ;;  %v4376_v17 = vld [vmem:[%s6504_s9 + $0x18] sm:$0xff]  }
0x102c   :  { %4133 = vmatmul.mubr.msk.bf16.gmra.mrb[68].mxu0 %vm825_vm4, %v2588_v13  ;;  %v2577_v25 = vpack.c.bf16 %v2554_v56, %v2554_v56  ;;  %v2520_v22 = vpop.xlane.xlu0 %2519 }
0x102d   :  { %4142 = vmatprep.mubr.msk.bf16.mxu0 %vm4711_vm0, %v4710_v1  ;;  %4600 = vrcp.f32 %v2520_v22  ;;  %4193 = vmatpush3.bf16.msra.mxu1 %v4376_v17 }
0x102e   :  { %v4591_v8 = vpop.eup %4590  ;;  %4206 = vmatprep.subr.bf16.mxu1 %v4710_v1 }
0x102f   :  { %v4593_v62 = vpop.eup %4592  ;;  %v2561_v19 = vmul.f32 %v4591_v8, %v6223_v61  ;;  %v2517_v61 = vpop.xlane.xlu1 %2516  ;;  %v6373_v8 = vld [vmem:[%s6500_s5 + $0x10] sm:$0x3f] }
0x1030   :  { %v2560_v48 = vmul.f32 %v4593_v62, %v6216_v58  ;;  %4602 = vrcp.f32 %v2517_v61  ;;  %v2526_v20 = vpop.xlane.xlu0 %2525  ;;  %v2989_v62 = vrot.slane %v6373_v8, %v5591_v14 }
0x1031   :  { %4604 = vrcp.f32 %v2526_v20 }
0x1032   :  { %v2733_v16 = vpack.c.bf16 %v2561_v19, %v2560_v48  ;;  %v4595_v43 = vpop.eup %4594 }
0x1033   :  { %v4597_v31 = vpop.eup %4596  ;;  %v2563_v58 = vmul.f32 %v4595_v43, %v6232_v34 }
0x1034   :  { %4143 = vmatmul.mubr.msk.bf16.vlgmr.msra.gmra.mrb[60].mxu0 %vm825_vm4, %v2575_v40  ;;  %v2562_v5 = vmul.f32 %v4597_v31, %v6226_v32  ;;  %v4599_v55 = vpop.eup %4598  ;;  %v2523_v32 = vpop.xlane.xlu1 %2522 }
0x1035   :  { %4155 = vmatpush3.bf16.msra.mxu0 %v2736_v27  ;;  %4146 = vmatprep.mubr.msk.bf16.mxu0 %vm4711_vm0, %v4710_v1  ;;  %v2749_v27 = vsel %vm1077_vm3, %v2738_v45, 0  ;;  %v2564_v34 = vmul.f32 %v4599_v55, %v6234_v30  ;;  %4606 = vrcp.f32 %v2523_v32 }
0x1036   :  { %4156 = vmatprep.subr.bf16.mxu0 %v4710_v1  ;;  %v2734_v59 = vpack.c.bf16 %v2563_v58, %v2562_v5 }
0x1037   :  { %v4601_v26 = vpop.eup %4600  ;;  %v2735_v23 = vpack.c.bf16 %v2564_v34, %v2564_v34 }
0x1038   :  { %v2566_v28 = vmul.f32 %v4601_v26, %v6242_v53 }
0x1039   :  { %4157 = vmatpush3.bf16.msra.mxu0 %v6525_v52 }
0x103a   :  { %4158 = vmatprep.subr.bf16.mxu0 %v4710_v1  ;;  %v4603_v13 = vpop.eup %4602 }
0x103b   :  { %v2565_v51 = vmul.f32 %v4603_v13, %v6240_v3  ;;  %v4605_v7 = vpop.eup %4604 }
0x103c   :  { %4147 = vmatmul.mubr.msk.bf16.gmra.mrb[64].mxu0 %vm825_vm4, %v2576_v18  ;;  %v2568_v40 = vmul.f32 %v4605_v7, %v6250_v38 }
0x103d   :  { %4159 = vmatpush3.bf16.msra.mxu0 %v2749_v27  ;;  %4150 = vmatprep.mubr.msk.bf16.mxu0 %vm4711_vm0, %v4710_v1  ;;  %v2817_v29 = vpack.c.bf16 %v2566_v28, %v2565_v51 }
0x103e   :  { %4172 = vmatprep.subr.bf16.mxu0 %v4710_v1 }
0x103f   :  { %v4607_v60 = vpop.eup %4606 }
0x1040   :  { %v2567_v30 = vmul.f32 %v4607_v60, %v6248_v36 }
0x1042   :  { %v2818_v54 = vpack.c.bf16 %v2568_v40, %v2567_v30 }
0x1044   :  { %4151 = vmatmul.mubr.msk.bf16.gmra.mrb[68].mxu0 %vm825_vm4, %v2577_v25 }
0x1045   :  { %4160 = vmatprep.mubr.msk.bf16.mxu0 %vm4711_vm0, %v4710_v1 }
0x104c   :  { %4161 = vmatmul.mubr.msk.bf16.vlgmr.msra.gmra.mrb[60].mxu0 %vm825_vm4, %v2733_v16 }
0x104d   :  { %4173 = vmatpush3.bf16.msra.mxu0 %v6526_v11  ;;  %4164 = vmatprep.mubr.msk.bf16.mxu0 %vm4711_vm0, %v4710_v1 }
0x104e   :  { %4174 = vmatprep.subr.bf16.mxu0 %v4710_v1 }
0x1051   :  { %4175 = vmatpush3.bf16.msra.mxu0 %v6527_v6 }
0x1052   :  { %4176 = vmatprep.subr.bf16.mxu0 %v4710_v1 }
0x1054   :  { %4165 = vmatmul.mubr.msk.bf16.gmra.mrb[64].mxu0 %vm825_vm4, %v2734_v59 }
0x1055   :  { %4177 = vmatpush3.bf16.msra.mxu0 %v2833_v12  ;;  %4168 = vmatprep.mubr.msk.bf16.mxu0 %vm4711_vm0, %v4710_v1 }
0x1056   :  { %4250 = vmatprep.subr.bf16.mxu0 %v4710_v1 }
0x105c   :  { %4169 = vmatmul.mubr.msk.bf16.gmra.mrb[68].mxu0 %vm825_vm4, %v2735_v23 }
0x105d   :  { %4178 = vmatprep.mubr.msk.bf16.mxu0 %vm4711_vm0, %v4710_v1 }
0x1064   :  { %4179 = vmatmul.mubr.msk.bf16.vlgmr.msra.gmra.mrb[60].mxu0 %vm825_vm4, %v2817_v29 }
0x1065   :  { %4182 = vmatprep.mubr.msk.bf16.mxu0 %vm4711_vm0, %v4710_v1 }
0x106c   :  { %4183 = vmatmul.mubr.msk.bf16.gmra.mrb[64].mxu0 %vm825_vm4, %v2818_v54 }
0x106d   :  { %4186 = vmatprep.mubr.msk.bf16.mxu0 %vm4711_vm0, %v4710_v1 }
0x10ac   :  { %v2529_v53 = vpop.xlane.xlu1 %2528 }
0x10ad   :  { %4608 = vrcp.f32 %v2529_v53 }
0x10b7   :  { %v4609_v3 = vpop.eup %4608 }
0x10b8   :  { %v2569_v44 = vmul.f32 %v4609_v3, %v6268_v9 }
0x10ba   :  { %v2819_v46 = vpack.c.bf16 %v2569_v44, %v2569_v44 }
0x10bc   :  { %4187 = vmatmul.mubr.msk.bf16.gmra.mrb[68].mxu0 %vm825_vm4, %v2819_v46 }
0x10bd   :  { %4254 = vmatprep.mubr.msk.bf16.mxu0 %vm4711_vm0, %v4710_v1 }
0x1137   :  { %v2869_v36 = vpop.f32.mrb[60].mxu0 }
0x1138   :  { %v4180_v38 = vpop.f32.mrb[61].mxu0 }
0x1139   :  { %v2872_v15 = vpop.f32.mrb[62].mxu0 }
0x113a   :  { %v2896_v2 = vpack.c.bf16 %v2872_v15, %v2869_v36  ;;  %v4181_v45 = vpop.f32.mrb[63].mxu0 }
0x113c   :  { %4195 = vmatmul.mubr.msk.bf16.vlgmr.msra.gmra.mrb[112].mxu1 %vm212_vm2, %v2896_v2 }
0x113d   :  { %4198 = vmatprep.mubr.msk.bf16.mxu1 %vm4711_vm0, %v4710_v1 }
0x113f   :  { %v2877_v9 = vpop.f32.mrb[64].mxu0 }
0x1140   :  { %v4184_v52 = vpop.f32.mrb[65].mxu0 }
0x1141   :  { %v2880_v18 = vpop.f32.mrb[66].mxu0  ;;  %v4377_v52 = vld [vmem:[%s6505_s10 + $0x10] sm:$0xff]  }
0x1142   :  { %v2897_v63 = vpack.c.bf16 %v2880_v18, %v2877_v9  ;;  %v4185_v27 = vpop.f32.mrb[67].mxu0  ;;  %4207 = vmatpush3.bf16.msra.mxu1 %v4377_v52  ;;  %v4378_v18 = vld [vmem:[%s6505_s10 + $0x18] sm:$0xff]   ;;  %s4712_s10 = smov [#allocation2]  }
0x1143   :  { %4208 = vmatprep.subr.bf16.mxu1 %v4710_v1 }
0x1144   :  { %4199 = vmatmul.mubr.msk.bf16.gmra.mrb[116].mxu1 %vm212_vm2, %v2897_v63 }
0x1145   :  { %4202 = vmatprep.mubr.msk.bf16.mxu1 %vm4711_vm0, %v4710_v1 }
0x1146   :  { %4209 = vmatpush3.bf16.msra.mxu1 %v4378_v18 }
0x1147   :  { %4222 = vmatprep.subr.bf16.mxu1 %v4710_v1 }
0x118f   :  { %v2885_v49 = vpop.f32.mrb[68].mxu0 }
0x1190   :  { %v2898_v21 = vpack.c.bf16 %v2885_v49, %v2885_v49  ;;  %v4188_v56 = vpop.f32.mrb[69].mxu0 }
0x1191   :  { %v2888_v47 = vpop.f32.mrb[70].mxu0 }
0x1192   :  { %v4189_v25 = vpop.f32.mrb[71].mxu0  ;;  %4203 = vmatmul.mubr.msk.bf16.gmra.mrb[120].mxu1 %vm212_vm2, %v2898_v21 }
0x1193   :  { %4210 = vmatprep.mubr.msk.bf16.mxu1 %vm4711_vm0, %v4710_v1 }
0x120f   :  { %v2959_v19 = vpop.f32.mrb[112].mxu1 }
0x1210   :  { %v2981_v35 = vadd.f32 %v2959_v19, %v5654_v57  ;;  %v4196_v48 = vpop.f32.mrb[113].mxu1 }
0x1211   :  { %v2962_v16 = vpop.f32.mrb[114].mxu1 }
0x1212   :  { %v2990_v43 = vadd.f32 %v2989_v62, %v2981_v35  ;;  %v2982_v41 = vadd.f32 %v2962_v16, %v5657_v42  ;;  %v4197_v31 = vpop.f32.mrb[115].mxu1 }
0x1214   :  { %v2991_v22 = vadd.f32 %v2989_v62, %v2982_v41  ;;  %v2995_v11 = vsel %vm212_vm2, %v2990_v43, 0.0 }
0x1215   :  { %2996 = vadd.xlane.f32.xlu0 %v2995_v11 }
0x1216   :  { %v2998_v61 = vsel %vm212_vm2, %v2991_v22, 0.0 }
0x1217   :  { %2999 = vadd.xlane.f32.xlu1 %v2998_v61  ;;  %v2967_v58 = vpop.f32.mrb[116].mxu1  ;;  %v3063_v61 = vrot.slane %v6373_v8, %v5596_v4 }
0x1218   :  { %v2983_v5 = vadd.f32 %v2967_v58, %v5664_v39  ;;  %v4200_v0 = vpop.f32.mrb[117].mxu1 }
0x1219   :  { %v2970_v6 = vpop.f32.mrb[118].mxu1 }
0x121a   :  { %v2992_v59 = vadd.f32 %v2989_v62, %v2983_v5  ;;  %v2984_v57 = vadd.f32 %v2970_v6, %v5667_v50  ;;  %v4201_v55 = vpop.f32.mrb[119].mxu1  ;;  %v3072_v6 = vrot.slane %v6373_v8, %v4932_v24 }
0x121c   :  { %v2993_v12 = vadd.f32 %v2989_v62, %v2984_v57  ;;  %v3001_v42 = vsel %vm212_vm2, %v2992_v59, 0.0 }
0x121d   :  { %3002 = vadd.xlane.f32.xlu0 %v3001_v42 }
0x121e   :  { %v3004_v20 = vsel %vm212_vm2, %v2993_v12, 0.0 }
0x121f   :  { %3005 = vadd.xlane.f32.xlu1 %v3004_v20 }
0x1265   :  { %v2975_v32 = vpop.f32.mrb[120].mxu1 }
0x1266   :  { %v2985_v34 = vadd.f32 %v2975_v32, %v5674_v37  ;;  %v4204_v26 = vpop.f32.mrb[121].mxu1 }
0x1267   :  { %v2978_v23 = vpop.f32.mrb[122].mxu1 }
0x1268   :  { %v6386_v13 = vadd.f32 %v2989_v62, %v2985_v34  ;;  %v4205_v39 = vpop.f32.mrb[123].mxu1 }
0x126a   :  { %v3007_v28 = vsel %vm212_vm2, %v6386_v13, 0.0 }
0x126b   :  { %3008 = vadd.xlane.f32.xlu0 %v3007_v28 }
0x12a2   :  { %v2997_v50 = vpop.xlane.xlu0 %2996 }
0x12a3   :  { %v3010_v51 = vmul.f32 0.03125, %v2997_v50 }
0x12a4   :  { %v3000_v7 = vpop.xlane.xlu1 %2999 }
0x12a5   :  { %v3015_v29 = vsub.f32 %v2990_v43, %v3010_v51  ;;  %v3011_v60 = vmul.f32 0.03125, %v3000_v7 }
0x12a7   :  { %v3016_v30 = vsub.f32 %v2991_v22, %v3011_v60  ;;  %v3020_v40 = vmul.f32 %v3015_v29, %v3015_v29 }
0x12a9   :  { %v3025_v54 = vsel %vm212_vm2, %v3020_v40, 0.0  ;;  %v3021_v53 = vmul.f32 %v3016_v30, %v3016_v30 }
0x12aa   :  { %v3003_v37 = vpop.xlane.xlu0 %3002  ;;  %3026 = vadd.xlane.f32.xlu1 %v3025_v54 }
0x12ab   :  { %v3012_v3 = vmul.f32 0.03125, %v3003_v37  ;;  %v3028_v44 = vsel %vm212_vm2, %v3021_v53, 0.0 }
0x12ac   :  { %3029 = vadd.xlane.f32.xlu0 %v3028_v44  ;;  %v3006_v46 = vpop.xlane.xlu1 %3005  ;;  %v4380_v44 = vld [vmem:[%s6507_s12 + $0x48] sm:$0xff]  }
0x12ad   :  { %v3017_v17 = vsub.f32 %v2992_v59, %v3012_v3  ;;  %v3013_v36 = vmul.f32 0.03125, %v3006_v46  ;;  %v4379_v3 = vld [vmem:[%s6507_s12 + $0x40] sm:$0xff]   ;;  %v4381_v46 = vld [vmem:[%s6507_s12 + $0x50] sm:$0xff]  }
0x12af   :  { %v3018_v38 = vsub.f32 %v2993_v12, %v3013_v36  ;;  %v3022_v15 = vmul.f32 %v3017_v17, %v3017_v17  ;;  %v4383_v36 = vld [vmem:[%s6507_s12 + $0x60] sm:$0xff]  }
0x12b1   :  { %v3031_v2 = vsel %vm212_vm2, %v3022_v15, 0.0  ;;  %v3023_v45 = vmul.f32 %v3018_v38, %v3018_v38  ;;  %v4385_v15 = vld [vmem:[%s6507_s12 + $0x70] sm:$0xff]  }
0x12b2   :  { %3032 = vadd.xlane.f32.xlu1 %v3031_v2  ;;  %v4386_v2 = vld [vmem:[%s6507_s12 + $0x78] sm:$0xff]  }
0x12b3   :  { %v3034_v9 = vsel %vm212_vm2, %v3023_v45, 0.0  ;;  %v4684_v45 = vld [vmem:[%s6506_s11] sm:$0x3] }
0x12b4   :  { %3035 = vadd.xlane.f32.xlu0 %v3034_v9  ;;  %v3089_v9 = vrot.slane %v4684_v45, %v4867_v10 }
0x12f8   :  { %v3009_v63 = vpop.xlane.xlu0 %3008 }
0x12f9   :  { %v3014_v27 = vmul.f32 0.03125, %v3009_v63 }
0x12fb   :  { %v3019_v49 = vsub.f32 %v6386_v13, %v3014_v27 }
0x12fd   :  { %v3024_v21 = vmul.f32 %v3019_v49, %v3019_v49 }
0x12ff   :  { %v3037_v56 = vsel %vm212_vm2, %v3024_v21, 0.0 }
0x1300   :  { %3038 = vadd.xlane.f32.xlu1 %v3037_v56 }
0x1337   :  { %v3027_v47 = vpop.xlane.xlu1 %3026 }
0x1338   :  { %v3040_v25 = vmul.f32 0.03125, %v3027_v47 }
0x1339   :  { %v3030_v62 = vpop.xlane.xlu0 %3029 }
0x133a   :  { %v3045_v19 = vadd.f32 1e-05, %v3040_v25  ;;  %v3041_v35 = vmul.f32 0.03125, %v3030_v62 }
0x133c   :  { %4610 = vrsqrt.f32 %v3045_v19  ;;  %v3046_v48 = vadd.f32 1e-05, %v3041_v35 }
0x133e   :  { %4612 = vrsqrt.f32 %v3046_v48 }
0x133f   :  { %v3033_v16 = vpop.xlane.xlu1 %3032 }
0x1340   :  { %v3042_v43 = vmul.f32 0.03125, %v3033_v16 }
0x1341   :  { %v3036_v41 = vpop.xlane.xlu0 %3035 }
0x1342   :  { %v3047_v31 = vadd.f32 1e-05, %v3042_v43  ;;  %v3043_v22 = vmul.f32 0.03125, %v3036_v41 }
0x1344   :  { %4614 = vrsqrt.f32 %v3047_v31  ;;  %v3048_v11 = vadd.f32 1e-05, %v3043_v22 }
0x1346   :  { %v4611_v58 = vpop.eup %4610  ;;  %4616 = vrsqrt.f32 %v3048_v11 }
0x1347   :  { %v3055_v5 = vmul.f32 %v4611_v58, %v3015_v29 }
0x1348   :  { %v4613_v0 = vpop.eup %4612 }
0x1349   :  { %v3064_v59 = vmul.f32 %v3063_v61, %v3055_v5  ;;  %v3056_v57 = vmul.f32 %v4613_v0, %v3016_v30 }
0x134b   :  { %v3065_v55 = vmul.f32 %v3063_v61, %v3056_v57  ;;  %v3073_v12 = vadd.f32 %v3072_v6, %v3064_v59 }
0x134d   :  { %v3074_v42 = vadd.f32 %v3072_v6, %v3065_v55 }
0x134e   :  { %v4615_v20 = vpop.eup %4614 }
0x134f   :  { %v3057_v32 = vmul.f32 %v4615_v20, %v3017_v17  ;;  %v3078_v34 = vpack.c.bf16 %v3074_v42, %v3073_v12  ;;  %v4382_v17 = vld [vmem:[%s6507_s12 + $0x58] sm:$0xff]  }
0x1350   :  { %v4617_v26 = vpop.eup %4616 }
0x1351   :  { %v3058_v23 = vmul.f32 %v4617_v26, %v3018_v38  ;;  %4211 = vmatmul.mubr.msk.bf16.vlgmr.msra.gmra.mrb[124].mxu1 %vm212_vm2, %v3078_v34  ;;  %v3066_v39 = vmul.f32 %v3063_v61, %v3057_v32  ;;  %v4384_v38 = vld [vmem:[%s6507_s12 + $0x68] sm:$0xff]  }
0x1352   :  { %4214 = vmatprep.mubr.msk.bf16.mxu1 %vm4711_vm0, %v4710_v1  ;;  %4223 = vmatpush3.bf16.msra.mxu1 %v4379_v3 }
0x1353   :  { %v3067_v28 = vmul.f32 %v3063_v61, %v3058_v23  ;;  %v3075_v50 = vadd.f32 %v3072_v6, %v3066_v39  ;;  %4224 = vmatprep.subr.bf16.mxu1 %v4710_v1 }
0x1355   :  { %v3076_v51 = vadd.f32 %v3072_v6, %v3067_v28 }
0x1356   :  { %4225 = vmatpush3.bf16.msra.mxu1 %v4380_v44 }
0x1357   :  { %v3079_v24 = vpack.c.bf16 %v3076_v51, %v3075_v50  ;;  %4226 = vmatprep.subr.bf16.mxu1 %v4710_v1 }
0x1359   :  { %4215 = vmatmul.mubr.msk.bf16.gmra.mrb[128].mxu1 %vm212_vm2, %v3079_v24 }
0x135a   :  { %4218 = vmatprep.mubr.msk.bf16.mxu1 %vm4711_vm0, %v4710_v1  ;;  %4227 = vmatpush3.bf16.msra.mxu1 %v4381_v46 }
0x135b   :  { %4228 = vmatprep.subr.bf16.mxu1 %v4710_v1 }
0x135e   :  { %4229 = vmatpush3.bf16.msra.mxu1 %v4382_v17 }
0x135f   :  { %4230 = vmatprep.subr.bf16.mxu1 %v4710_v1 }
0x1362   :  { %4231 = vmatpush3.bf16.msra.mxu1 %v4383_v36 }
0x1363   :  { %4232 = vmatprep.subr.bf16.mxu1 %v4710_v1 }
0x1366   :  { %4233 = vmatpush3.bf16.msra.mxu1 %v4384_v38 }
0x1367   :  { %4234 = vmatprep.subr.bf16.mxu1 %v4710_v1 }
0x136a   :  { %4235 = vmatpush3.bf16.msra.mxu1 %v4385_v15 }
0x136b   :  { %4236 = vmatprep.subr.bf16.mxu1 %v4710_v1 }
0x136e   :  { %4237 = vmatpush3.bf16.msra.mxu1 %v4386_v2 }
0x138d   :  { %v3039_v7 = vpop.xlane.xlu1 %3038 }
0x138e   :  { %v3044_v29 = vmul.f32 0.03125, %v3039_v7 }
0x1390   :  { %v3049_v60 = vadd.f32 1e-05, %v3044_v29 }
0x1392   :  { %4618 = vrsqrt.f32 %v3049_v60 }
0x139c   :  { %v4619_v30 = vpop.eup %4618 }
0x139d   :  { %v3059_v40 = vmul.f32 %v4619_v30, %v3019_v49 }
0x139f   :  { %v3068_v54 = vmul.f32 %v3063_v61, %v3059_v40 }
0x13a1   :  { %v3077_v53 = vadd.f32 %v3072_v6, %v3068_v54 }
0x13a3   :  { %v3080_v37 = vpack.c.bf16 %v3077_v53, %v3077_v53 }
0x13a5   :  { %4219 = vmatmul.mubr.msk.bf16.gmra.mrb[132].mxu1 %vm212_vm2, %v3080_v37 }
0x13a6   :  { %4238 = vmatprep.mubr.msk.bf16.mxu1 %vm4711_vm0, %v4710_v1 }
0x1424   :  { %v3145_v52 = vpop.f32.mrb[124].mxu1 }
0x1425   :  { %v3146_v18 = vadd.f32 %v3145_v52, %v3089_v9  ;;  %v4212_v63 = vpop.f32.mrb[125].mxu1  ;;  %v3331_v52 = vrot.slane %v6373_v8, %v4937_v33  ;;  %v4387_v33 = vld [vmem:[%s6508_s13] sm:$0xff]   ;;  %v4388_v8 = vld [vmem:[%s6508_s13 + $0x8] sm:$0xff]  }
0x1426   :  { %v3148_v27 = vpop.f32.mrb[126].mxu1  ;;  %4251 = vmatpush3.bf16.msra.mxu0 %v4387_v33 }
0x1427   :  { %v3628_v49 = vmul.f32 -1.702, %v3146_v18  ;;  %v3149_v21 = vadd.f32 %v3148_v27, %v3089_v9  ;;  %v4213_v56 = vpop.f32.mrb[127].mxu1  ;;  %4252 = vmatprep.subr.bf16.mxu0 %v4710_v1 }
0x1429   :  { %v3177_v47 = vmul.f32 1.442695, %v3628_v49  ;;  %v3629_v25 = vmul.f32 -1.702, %v3149_v21 }
0x142a   :  { %4253 = vmatpush3.bf16.msra.mxu0 %v4388_v8 }
0x142b   :  { %4620 = vpow2.f32 %v3177_v47  ;;  %v3179_v62 = vmul.f32 1.442695, %v3629_v25  ;;  %4258 = vmatprep.subr.bf16.mxu0 %v4710_v1 }
0x142c   :  { %v3153_v19 = vpop.f32.mrb[128].mxu1 }
0x142d   :  { %4622 = vpow2.f32 %v3179_v62  ;;  %v3154_v35 = vadd.f32 %v3153_v19, %v3089_v9  ;;  %v4216_v48 = vpop.f32.mrb[129].mxu1 }
0x142e   :  { %v3156_v16 = vpop.f32.mrb[130].mxu1 }
0x142f   :  { %v3630_v43 = vmul.f32 -1.702, %v3154_v35  ;;  %v3157_v41 = vadd.f32 %v3156_v16, %v3089_v9  ;;  %v4217_v31 = vpop.f32.mrb[131].mxu1 }
0x1431   :  { %v3181_v10 = vmul.f32 1.442695, %v3630_v43  ;;  %v3631_v22 = vmul.f32 -1.702, %v3157_v41 }
0x1433   :  { %4624 = vpow2.f32 %v3181_v10  ;;  %v3183_v11 = vmul.f32 1.442695, %v3631_v22 }
0x1435   :  { %v4621_v61 = vpop.eup %4620  ;;  %4626 = vpow2.f32 %v3183_v11 }
0x1436   :  { %v3187_v58 = vadd.f32 1.0, %v4621_v61 }
0x1437   :  { %v4623_v5 = vpop.eup %4622 }
0x1438   :  { %4628 = vrcp.f32 %v3187_v58  ;;  %v3188_v0 = vadd.f32 1.0, %v4623_v5  ;;  %v4389_v5 = vld [vmem:[%s6509_s14] sm:$0xff]   ;;  %s3484_s14 = sshll.u32 %s4712_s10, 4  ;;  %s3485_s14 = int_to_ptr.vmem [resolvable:$true] %s3484_s14 }
0x1439   :  { %s4686_s0 = scalar_lea.vmem %s3485_s14, 32  ;;  %p4691_p1 = scmp.lt.s32.totalorder %s3485_s14, %s3485_s14 }
0x143a   :  { %4630 = vrcp.f32 %v3188_v0  ;;  %p4687_p0 = scmp.ne.s32.totalorder %s3485_s14, %s4686_s0  ;;  %p4692_p2 = scmp.lt.s32.totalorder %s4686_s0, %s4686_s0 }
0x143c   :  { %p4693_p3 = por %p4692_p2, %p4691_p1 }
0x143d   :  { %v4625_v6 = vpop.eup %4624 }
0x143e   :  { %v3189_v59 = vadd.f32 1.0, %v4625_v6  ;;  %p4694_p4 = pnand %p4693_p3, %p4687_p0 }
0x143f   :  { %v4627_v57 = vpop.eup %4626 }
0x1440   :  { %4632 = vrcp.f32 %v3189_v59  ;;  %v3190_v55 = vadd.f32 1.0, %v4627_v57 }
0x1442   :  { %v4629_v12 = vpop.eup %4628  ;;  %4634 = vrcp.f32 %v3190_v55  ;;  %v3660_v55 = vld [vmem:[%s6510_s15] ss:$0 sm:$0xff] }
0x1443   :  { %v3202_v20 = vmul.f32 %v4629_v12, %v3146_v18 }
0x1444   :  { %v4631_v42 = vpop.eup %4630 }
0x1445   :  { %v3203_v32 = vmul.f32 %v4631_v42, %v3149_v21 }
0x1447   :  { %v3207_v34 = vpack.c.bf16 %v3203_v32, %v3202_v20 }
0x1449   :  { %4239 = vmatmul.mubr.bf16.vlgmr.msra.gmra.mrb[136].mxu1 %v3207_v34 }
0x144a   :  { %v4633_v26 = vpop.eup %4632  ;;  %4242 = vmatprep.mubr.msk.bf16.mxu1 %vm4711_vm0, %v4710_v1 }
0x144b   :  { %v3204_v39 = vmul.f32 %v4633_v26, %v3154_v35 }
0x144c   :  { %v4635_v23 = vpop.eup %4634 }
0x144d   :  { %v3205_v28 = vmul.f32 %v4635_v23, %v3157_v41  ;;  %v4685_v41 = vld [vmem:[%s6500_s5] sm:$0xff] }
0x144e   :  { %v3349_v31 = vrot.slane %v4685_v41, %v5591_v14  ;;  %v3354_v22 = vrot.slane %v4685_v41, %v5596_v4 }
0x144f   :  { %v3208_v50 = vpack.c.bf16 %v3205_v28, %v3204_v39 }
0x1451   :  { %4243 = vmatmul.mubr.bf16.gmra.mrb[140].mxu1 %v3208_v50 }
0x1452   :  { %4246 = vmatprep.mubr.msk.bf16.mxu1 %vm4711_vm0, %v4710_v1 }
0x1478   :  { %v3161_v51 = vpop.f32.mrb[132].mxu1 }
0x1479   :  { %v3162_v24 = vadd.f32 %v3161_v51, %v3089_v9  ;;  %v4220_v7 = vpop.f32.mrb[133].mxu1 }
0x147a   :  { %v3164_v29 = vpop.f32.mrb[134].mxu1 }
0x147b   :  { %v3632_v60 = vmul.f32 -1.702, %v3162_v24  ;;  %v4221_v30 = vpop.f32.mrb[135].mxu1 }
0x147d   :  { %v3185_v40 = vmul.f32 1.442695, %v3632_v60 }
0x147f   :  { %4636 = vpow2.f32 %v3185_v40 }
0x1489   :  { %v4637_v54 = vpop.eup %4636 }
0x148a   :  { %v3191_v53 = vadd.f32 1.0, %v4637_v54 }
0x148c   :  { %4638 = vrcp.f32 %v3191_v53 }
0x1496   :  { %v4639_v37 = vpop.eup %4638 }
0x1497   :  { %v3206_v3 = vmul.f32 %v4639_v37, %v3162_v24 }
0x1499   :  { %v3209_v44 = vpack.c.bf16 %v3206_v3, %v3206_v3 }
0x149b   :  { %4247 = vmatmul.mubr.bf16.gmra.mrb[144].mxu1 %v3209_v44 }
0x151c   :  { %v3309_v46 = vpop.f32.mrb[136].mxu1 }
0x151d   :  { %v4240_v17 = vpop.f32.mrb[137].mxu1 }
0x151e   :  { %v3311_v36 = vpop.f32.mrb[138].mxu1 }
0x151f   :  { %v4241_v38 = vpop.f32.mrb[139].mxu1 }
0x1524   :  { %v3315_v15 = vpop.f32.mrb[140].mxu1 }
0x1525   :  { %v4244_v2 = vpop.f32.mrb[141].mxu1 }
0x1526   :  { %v3317_v45 = vpop.f32.mrb[142].mxu1 }
0x1527   :  { %v4245_v9 = vpop.f32.mrb[143].mxu1 }
0x156e   :  { %v3321_v18 = vpop.f32.mrb[144].mxu1 }
0x156f   :  { %v3327_v63 = vadd.f32 %v3321_v18, %v6386_v13  ;;  %v4248_v27 = vpop.f32.mrb[145].mxu1 }
0x1570   :  { %v3324_v49 = vpop.f32.mrb[146].mxu1 }
0x1571   :  { %v3332_v21 = vadd.f32 %v3331_v52, %v3327_v63  ;;  %v4249_v56 = vpop.f32.mrb[147].mxu1 }
0x1573   :  { %v3333_v47 = vsel %vm212_vm2, %v3332_v21, 0.0 }
0x1574   :  { %3334 = vadd.xlane.f32.xlu0 %v3333_v47 }
0x1601   :  { %v3335_v25 = vpop.xlane.xlu0 %3334 }
0x1602   :  { %v3336_v62 = vmul.f32 0.03125, %v3335_v25 }
0x1604   :  { %v3337_v19 = vsub.f32 %v3332_v21, %v3336_v62 }
0x1606   :  { %v3338_v35 = vmul.f32 %v3337_v19, %v3337_v19 }
0x1608   :  { %v3339_v48 = vsel %vm212_vm2, %v3338_v35, 0.0 }
0x1609   :  { %3340 = vadd.xlane.f32.xlu1 %v3339_v48 }
0x1696   :  { %v3341_v13 = vpop.xlane.xlu1 %3340 }
0x1697   :  { %v3342_v16 = vmul.f32 0.03125, %v3341_v13 }
0x1699   :  { %v3343_v43 = vadd.f32 1e-05, %v3342_v16 }
0x169b   :  { %4640 = vrsqrt.f32 %v3343_v43 }
0x16a5   :  { %v4641_v10 = vpop.eup %4640 }
0x16a6   :  { %v3345_v11 = vmul.f32 %v4641_v10, %v3337_v19 }
0x16a8   :  { %v3350_v61 = vmul.f32 %v3349_v31, %v3345_v11 }
0x16aa   :  { %v3355_v58 = vadd.f32 %v3354_v22, %v3350_v61 }
0x16ac   :  { %v3356_v0 = vpack.c.bf16 %v3355_v58, %v3355_v58 }
0x16ae   :  { %4255 = vmatmul.mubr.msk.bf16.vlgmr.msra.gmra.mrb[72].mxu0 %vm212_vm2, %v3356_v0 }
0x16af   :  { %4259 = vmatpush3.bf16.msra.mxu0 %v4389_v5  ;;  %4260 = vmatprep.mubr.msk.bf16.mxu0 %vm4711_vm0, %v4710_v1 }
0x1781   :  { %v3410_v6 = vpop.f32.mrb[72].mxu0 }
0x1782   :  { %v3416_v14 = vpack.c.bf16 %v3410_v6, %v3410_v6  ;;  %v4256_v59 = vpop.f32.mrb[73].mxu0 }
0x1783   :  { %v3413_v57 = vpop.f32.mrb[74].mxu0 }
0x1784   :  { %v4257_v4 = vpop.f32.mrb[75].mxu0  ;;  %4261 = vmatmul.mubr.msk.bf16.vlgmr.msra.gmra.mrb[76].mxu0 %vm3432_vm5, %v3416_v14 }
0x1857   :  { %v3470_v12 = vpop.f32.mrb[76].mxu0 }
0x1858   :  { %v3471_v42 = vadd.f32 %v3660_v55, %v3470_v12  ;;  %v4262_v20 = vpop.f32.mrb[77].mxu0 }
0x1859   :  { %v3473_v32 = vpop.f32.mrb[78].mxu0 }
0x185a   :  { %v4263_v1 = vpop.f32.mrb[79].mxu0  ;;  %3477 = vst.msk [vmem:[#allocation2] sm:$0x3] %vm3476_vm6, %v3471_v42 }
0x185b   :  { %4697 = shalt.err (!%p4694_p4)
}
0x185c   :  { %s4698_s15 = scalar_lea.hbm %s6511_s16, 32 }
0x185d   :  { %p4699_p5 = scmp.ne.s32.totalorder %s6511_s16, %s4698_s15  ;;  %p4702_p6 = scmp.lt.u32.totalorder %s4698_s15, %s6511_s16 }
0x185f   :  { %p4704_p7 = pnand %p4702_p6, %p4699_p5 }
0x1861   :  { %4707 = shalt.err (!%p4704_p7)
}
0x1862   :  { %3487 = dma.vmem_to_hbm [thread:$0]  %s3485_s14, 32, %s6511_s16, [#allocation3]  }
0x1863   :  { %4708 = dma.done.wait [#allocation3], 32  }
0x1864   :  { %4709 = vsyncadd [#allocation3], 4294967264 }
0x1865   :  { %3491 = vsyncpa [#allocation3], 1 }

</bundles_post_ra>
